<compile_context>
chip_gen: v5e
topology: v5e:2x2
jax: 0.10.0
libtpu: 0.0.40
codegen_flags: <defaults>
</compile_context>

<pallas_src>
import math

import jax
import jax.numpy as jnp
from jax import lax
from jax.experimental import pallas as pl
from jax.experimental.pallas import tpu as pltpu


# ----------------------------------------------------------------------------
# Kernel 1: tiled matmul + bias (hoisted layer-0 input projection + decoder).
# ----------------------------------------------------------------------------
def matmul_bias_kernel(x_ref, w_ref, b_ref, o_ref):
    o_ref[...] = (jnp.dot(x_ref[...], w_ref[...],
                          preferred_element_type=jnp.float32)
                  + b_ref[...]).astype(o_ref.dtype)


def matmul_bias(x, w, b, *, tile_n=256, tile_v=512):
    """x: (N, K) bf16, w: (K, V) bf16, b: (1, V) f32 -> (N, V) f32."""
    N, K = x.shape
    V = w.shape[1]
    tn = tile_n if (N >= tile_n and N % tile_n == 0) else N
    tv = tile_v if (V >= tile_v and V % tile_v == 0) else V
    grid = (N // tn, V // tv)
    return pl.pallas_call(
        matmul_bias_kernel,
        grid=grid,
        in_specs=[
            pl.BlockSpec((tn, K), lambda i, j: (i, 0)),
            pl.BlockSpec((K, tv), lambda i, j: (0, j)),
            pl.BlockSpec((1, tv), lambda i, j: (0, j)),
        ],
        out_specs=pl.BlockSpec((tn, tv), lambda i, j: (i, j)),
        out_shape=jax.ShapeDtypeStruct((N, V), jnp.float32),
        compiler_params=pltpu.CompilerParams(
            dimension_semantics=("parallel", "parallel")),
    )(x, w, b)


# ----------------------------------------------------------------------------
# Kernel 2: fused multi-layer LSTM recurrence (single pallas_call, no grid).
# ----------------------------------------------------------------------------
def lstm_stack_kernel(gx0_ref, h0_ref, c0_ref, whh_ref, wih_rest_ref,
                      bias_rest_ref, y_ref, hn_ref, cn_ref, gx_s, xb_s):
    NB, H = y_ref.shape                     # NB = S * B
    nlayers, B, _ = h0_ref.shape
    S = NB // B
    unroll = True if S <= 32 else 8

    for layer in range(nlayers):            # static Python loop, nlayers small
        is_last = layer == nlayers - 1

        # --- hoisted input projection (one big-M matmul, bias folded in) ---
        if layer == 0:
            gx_src = gx0_ref                # precomputed outside the kernel
        else:
            x_prev = xb_s[...].astype(jnp.bfloat16)              # (S*B, H)
            gx_s[...] = (jnp.dot(x_prev, wih_rest_ref[layer - 1],
                                 preferred_element_type=jnp.float32)
                         + bias_rest_ref[layer - 1])
            gx_src = gx_s

        whh = whh_ref[layer]                # (H, 4H) bf16, hoisted out of loop
        out_ref = y_ref if is_last else xb_s

        # --- serial recurrence: only h @ W_hh per step ---
        def step(t, carry):
            h, c = carry
            row = pl.multiple_of(t * B, B)
            gates = (gx_src[pl.ds(row, B), :]
                     + jnp.dot(h.astype(jnp.bfloat16), whh,
                               preferred_element_type=jnp.float32))
            i_g = jax.nn.sigmoid(gates[:, 0 * H:1 * H])
            f_g = jax.nn.sigmoid(gates[:, 1 * H:2 * H])
            g_g = jnp.tanh(gates[:, 2 * H:3 * H])
            o_g = jax.nn.sigmoid(gates[:, 3 * H:4 * H])
            c_new = f_g * c + i_g * g_g
            h_new = o_g * jnp.tanh(c_new)
            out_ref[pl.ds(row, B), :] = h_new
            return h_new, c_new

        h_fin, c_fin = lax.fori_loop(0, S, step,
                                     (h0_ref[layer], c0_ref[layer]),
                                     unroll=unroll)
        hn_ref[layer] = h_fin
        cn_ref[layer] = c_fin


def lstm_stack(gx0, h0, c0, whh_t, wih_rest_t, bias_rest):
    """gx0: (S*B, 4H) f32 precomputed layer-0 gates; h0/c0: (L, B, H) f32;
    whh_t: (L, H, 4H) bf16; wih_rest_t: (max(L-1,1), H, 4H) bf16;
    bias_rest: (max(L-1,1), 1, 4H) f32.
    Returns y: (S*B, H) f32 (last-layer output), hN, cN: (L, B, H) f32."""
    NB, G = gx0.shape
    H = G // 4
    nlayers, B, _ = h0.shape
    vmem = pl.BlockSpec(memory_space=pltpu.MemorySpace.VMEM)
    return pl.pallas_call(
        lstm_stack_kernel,
        in_specs=[vmem] * 6,
        out_specs=(vmem, vmem, vmem),
        out_shape=(
            jax.ShapeDtypeStruct((NB, H), jnp.float32),
            jax.ShapeDtypeStruct((nlayers, B, H), jnp.float32),
            jax.ShapeDtypeStruct((nlayers, B, H), jnp.float32),
        ),
        scratch_shapes=[
            pltpu.VMEM((NB, 4 * H), jnp.float32),   # per-layer hoisted gates_x
            pltpu.VMEM((NB, H), jnp.float32),       # inter-layer activations
        ],
    )(gx0, h0, c0, whh_t, wih_rest_t, bias_rest)


# ----------------------------------------------------------------------------
# Forward pass
# ----------------------------------------------------------------------------
def original_rnn_model_forward(tokens, hidden, params):
    """tokens: (S, B) int32, hidden = (h0, c0) each (nlayers, B, H).
    Returns (decoded (S, B, V), (hN, cN))."""
    h0, c0 = hidden
    S, B = tokens.shape

    # Embedding lookup (gather) -- plain-JAX glue; dropout = identity (eval).
    emb = jnp.take(params["encoder_weight"], tokens, axis=0)    # (S, B, ninp)
    ninp = emb.shape[-1]

    # Layer-0 input projection hoisted out of the recurrence: one big-M matmul.
    gx0 = matmul_bias(emb.reshape(S * B, ninp).astype(jnp.bfloat16),
                      params["wih0_t"], params["bias0"])        # (S*B, 4H) f32

    # Fused multi-layer recurrence (single kernel, activations stay in VMEM).
    y2d, hN, cN = lstm_stack(gx0, h0, c0, params["whh_t"],
                             params["wih_rest_t"], params["bias_rest"])

    # Decoder: tiled, parallel-grid matmul kernel.
    decoded = matmul_bias(y2d.astype(jnp.bfloat16),
                          params["w_dec_t"], params["b_dec"])   # (S*B, V)
    return decoded.reshape(S, B, -1), (hN, cN)


# ----------------------------------------------------------------------------
# Pure-JAX reference (mirrors the bf16-matmul / f32-accumulate semantics)
# ----------------------------------------------------------------------------
def reference_forward(tokens, hidden, params):
    h0, c0 = hidden
    S, B = tokens.shape
    nlayers, _, H = h0.shape
    emb = jnp.take(params["encoder_weight"], tokens, axis=0)

    def dot_bf16(a, b):
        return jnp.dot(a.astype(jnp.bfloat16), b,
                       preferred_element_type=jnp.float32)

    x = emb
    h_fin, c_fin = [], []
    for layer in range(nlayers):
        if layer == 0:
            wih_t, bias = params["wih0_t"], params["bias0"]
        else:
            wih_t = params["wih_rest_t"][layer - 1]
            bias = params["bias_rest"][layer - 1]
        whh_t = params["whh_t"][layer]

        gx = (dot_bf16(x.reshape(S * B, -1), wih_t) + bias).reshape(S, B, 4 * H)

        def step(carry, g_t):
            h, c = carry
            gates = g_t + dot_bf16(h, whh_t)
            i = jax.nn.sigmoid(gates[:, 0 * H:1 * H])
            f = jax.nn.sigmoid(gates[:, 1 * H:2 * H])
            g = jnp.tanh(gates[:, 2 * H:3 * H])
            o = jax.nn.sigmoid(gates[:, 3 * H:4 * H])
            c_new = f * c + i * g
            h_new = o * jnp.tanh(c_new)
            return (h_new, c_new), h_new

        (hN, cN), y = lax.scan(step, (h0[layer], c0[layer]), gx)
        h_fin.append(hN)
        c_fin.append(cN)
        x = y

    dec = dot_bf16(x.reshape(S * B, H), params["w_dec_t"]) + params["b_dec"]
    return dec.reshape(S, B, -1), (jnp.stack(h_fin), jnp.stack(c_fin))


# ----------------------------------------------------------------------------
# Parameter init (deterministic, mirrors OriginalRNNModel.__init__ shapes)
# ----------------------------------------------------------------------------
def init_params(key, ntoken, ninp, nhid, nlayers):
    initrange = 0.1
    stdv = 1.0 / math.sqrt(nhid)
    keys = jax.random.split(key, 2 + 4 * nlayers)

    wih_list, whh_list, bias_list = [], [], []
    for layer in range(nlayers):
        in_dim = ninp if layer == 0 else nhid
        k = keys[2 + 4 * layer: 6 + 4 * layer]
        # PyTorch nn.LSTM params: weight_ih (4H, in), weight_hh (4H, H),
        # bias_ih (4H,), bias_hh (4H,), all uniform(-1/sqrt(H), 1/sqrt(H)).
        wih = jax.random.uniform(k[0], (4 * nhid, in_dim), jnp.float32, -stdv, stdv)
        whh = jax.random.uniform(k[1], (4 * nhid, nhid), jnp.float32, -stdv, stdv)
        bih = jax.random.uniform(k[2], (4 * nhid,), jnp.float32, -stdv, stdv)
        bhh = jax.random.uniform(k[3], (4 * nhid,), jnp.float32, -stdv, stdv)
        wih_list.append(wih.T)                     # (in, 4H)
        whh_list.append(whh.T)                     # (H, 4H)
        bias_list.append((bih + bhh)[None, :])     # (1, 4H) -- biases folded

    params = {
        # nn.Embedding(ntoken, ninp), uniform(-0.1, 0.1)
        "encoder_weight": jax.random.uniform(
            keys[0], (ntoken, ninp), jnp.float32, -initrange, initrange),
        # nn.Linear(nhid, ntoken): weight (ntoken, nhid) uniform, bias zero.
        "w_dec_t": jax.random.uniform(
            keys[1], (ntoken, nhid), jnp.float32,
            -initrange, initrange).T.astype(jnp.bfloat16),       # (H, V) bf16
        "b_dec": jnp.zeros((1, ntoken), jnp.float32),
        # layer-0 input projection (hoisted outside the recurrence kernel)
        "wih0_t": wih_list[0].astype(jnp.bfloat16),              # (ninp, 4H)
        "bias0": bias_list[0],                                   # (1, 4H) f32
        # layers 1..L-1 input projections (computed inside the fused kernel)
        "wih_rest_t": (jnp.stack(wih_list[1:]) if nlayers > 1
                       else jnp.zeros((1, nhid, 4 * nhid),
                                      jnp.float32)).astype(jnp.bfloat16),
        "bias_rest": (jnp.stack(bias_list[1:]) if nlayers > 1
                      else jnp.zeros((1, 1, 4 * nhid), jnp.float32)),
        # recurrent weights, all layers
        "whh_t": jnp.stack(whh_list).astype(jnp.bfloat16),       # (L, H, 4H)
    }
    return params


# ----------------------------------------------------------------------------
if __name__ == "__main__":
    # Small, TPU-friendly shapes consistent with the module.
    ntoken, ninp, nhid, nlayers = 256, 128, 128, 2
    S, B = 8, 8   # (seq_len, batch) -- PyTorch nn.LSTM default layout
    # TODO(synk): with B=8 the recurrent matmul uses only 8 MXU rows (latency
    # bound); batch more sequences per call when the workload allows.

    key = jax.random.PRNGKey(0)
    k_params, k_tok = jax.random.split(key)
    params = init_params(k_params, ntoken, ninp, nhid, nlayers)

    tokens = jax.random.randint(k_tok, (S, B), 0, ntoken, dtype=jnp.int32)
    # init_hidden(bsz): zeros (nlayers, B, nhid) for h and c.
    hidden = (jnp.zeros((nlayers, B, nhid), jnp.float32),
              jnp.zeros((nlayers, B, nhid), jnp.float32))

    fwd = jax.jit(original_rnn_model_forward)
    decoded, (hN, cN) = fwd(tokens, hidden, params)
    jax.block_until_ready((decoded, hN, cN))

    # Sanity check against a pure-JAX reference with matching bf16 matmuls.
    ref_dec, (ref_h, ref_c) = reference_forward(tokens, hidden, params)
    assert decoded.shape == (S, B, ntoken)
    assert hN.shape == (nlayers, B, nhid) and cN.shape == (nlayers, B, nhid)
    assert jnp.allclose(decoded, ref_dec, atol=5e-3, rtol=5e-3)
    assert jnp.allclose(hN, ref_h, atol=5e-3, rtol=5e-3)
    assert jnp.allclose(cN, ref_c, atol=5e-3, rtol=5e-3)

    print("KERNEL_OK")
</pallas_src>

<mosaic_0001>
module attributes {stable_mosaic.version = 11 : i64} {
  func.func @matmul_bias_kernel(%arg0: i32, %arg1: i32, %arg2: memref<64x128xbf16, #tpu.memory_space<vmem>>, %arg3: memref<128x512xbf16, #tpu.memory_space<vmem>>, %arg4: memref<1x512xf32, #tpu.memory_space<vmem>>, %arg5: memref<64x512xf32, #tpu.memory_space<vmem>>) attributes {dimension_semantics = [#tpu.dimension_semantics<parallel>, #tpu.dimension_semantics<parallel>], iteration_bounds = array<i64: 1, 1>, scalar_prefetch = 0 : i64, scratch_operands = 0 : i64, tpu.core_type = #tpu.core_type<tc>, window_params = [{transform_indices = @transform_0, window_bounds = array<i64: 64, 128>}, {transform_indices = @transform_1, window_bounds = array<i64: 128, 512>}, {transform_indices = @transform_2, window_bounds = array<i64: 1, 512>}, {transform_indices = @transform_3, window_bounds = array<i64: 64, 512>}]} {
    %c0 = arith.constant 0 : index
    %c0_0 = arith.constant 0 : index
    %0 = vector.load %arg2[%c0, %c0_0] : memref<64x128xbf16, #tpu.memory_space<vmem>>, vector<64x128xbf16>
    %c0_1 = arith.constant 0 : index
    %c0_2 = arith.constant 0 : index
    %1 = vector.load %arg3[%c0_1, %c0_2] : memref<128x512xbf16, #tpu.memory_space<vmem>>, vector<128x512xbf16>
    %cst = arith.constant dense<0.000000e+00> : vector<64x512xf32>
    %2 = tpu.matmul %0, %1, %cst {dimension_numbers = #tpu.dot_dimension_numbers<[1], [0], [0], [1], [0, 0, 1, 1], [], []>} : vector<64x128xbf16>, vector<128x512xbf16>, vector<64x512xf32> -> vector<64x512xf32>
    %c0_3 = arith.constant 0 : index
    %c0_4 = arith.constant 0 : index
    %3 = vector.load %arg4[%c0_3, %c0_4] : memref<1x512xf32, #tpu.memory_space<vmem>>, vector<1x512xf32>
    %4 = vector.broadcast %3 : vector<1x512xf32> to vector<64x512xf32>
    %5 = arith.addf %2, %4 : vector<64x512xf32>
    %c0_5 = arith.constant 0 : index
    %c0_6 = arith.constant 0 : index
    %6 = vector.load %arg5[%c0_5, %c0_6] : memref<64x512xf32, #tpu.memory_space<vmem>>, vector<64x512xf32>
    tpu.vector_store %arg5[%c0_5, %c0_6], %5 {strides = array<i32>} : memref<64x512xf32, #tpu.memory_space<vmem>>, vector<64x512xf32>,
    return
  }
  func.func @transform_0(%arg0: i32, %arg1: i32) -> (i32, i32) {
    %c0_i32 = arith.constant 0 : i32
    %c0_i32_0 = arith.constant 0 : i32
    return %arg0, %c0_i32 : i32, i32
  }
  func.func @transform_1(%arg0: i32, %arg1: i32) -> (i32, i32) {
    %c0_i32 = arith.constant 0 : i32
    %c0_i32_0 = arith.constant 0 : i32
    return %c0_i32, %arg1 : i32, i32
  }
  func.func @transform_2(%arg0: i32, %arg1: i32) -> (i32, i32) {
    %c0_i32 = arith.constant 0 : i32
    %c0_i32_0 = arith.constant 0 : i32
    return %c0_i32, %arg1 : i32, i32
  }
  func.func @transform_3(%arg0: i32, %arg1: i32) -> (i32, i32) {
    %c0_i32 = arith.constant 0 : i32
    return %arg0, %arg1 : i32, i32
  }
}

module attributes {stable_mosaic.version = 11 : i64} {
  func.func @matmul_bias_kernel(%arg0: i32, %arg1: i32, %arg2: memref<64x128xbf16, #tpu.memory_space<vmem>>, %arg3: memref<128x256xbf16, #tpu.memory_space<vmem>>, %arg4: memref<1x256xf32, #tpu.memory_space<vmem>>, %arg5: memref<64x256xf32, #tpu.memory_space<vmem>>) attributes {dimension_semantics = [#tpu.dimension_semantics<parallel>, #tpu.dimension_semantics<parallel>], iteration_bounds = array<i64: 1, 1>, scalar_prefetch = 0 : i64, scratch_operands = 0 : i64, tpu.core_type = #tpu.core_type<tc>, window_params = [{transform_indices = @transform_0, window_bounds = array<i64: 64, 128>}, {transform_indices = @transform_1, window_bounds = array<i64: 128, 256>}, {transform_indices = @transform_2, window_bounds = array<i64: 1, 256>}, {transform_indices = @transform_3, window_bounds = array<i64: 64, 256>}]} {
    %c0 = arith.constant 0 : index
    %c0_0 = arith.constant 0 : index
    %0 = vector.load %arg2[%c0, %c0_0] : memref<64x128xbf16, #tpu.memory_space<vmem>>, vector<64x128xbf16>
    %c0_1 = arith.constant 0 : index
    %c0_2 = arith.constant 0 : index
    %1 = vector.load %arg3[%c0_1, %c0_2] : memref<128x256xbf16, #tpu.memory_space<vmem>>, vector<128x256xbf16>
    %cst = arith.constant dense<0.000000e+00> : vector<64x256xf32>
    %2 = tpu.matmul %0, %1, %cst {dimension_numbers = #tpu.dot_dimension_numbers<[1], [0], [0], [1], [0, 0, 1, 1], [], []>} : vector<64x128xbf16>, vector<128x256xbf16>, vector<64x256xf32> -> vector<64x256xf32>
    %c0_3 = arith.constant 0 : index
    %c0_4 = arith.constant 0 : index
    %3 = vector.load %arg4[%c0_3, %c0_4] : memref<1x256xf32, #tpu.memory_space<vmem>>, vector<1x256xf32>
    %4 = vector.broadcast %3 : vector<1x256xf32> to vector<64x256xf32>
    %5 = arith.addf %2, %4 : vector<64x256xf32>
    %c0_5 = arith.constant 0 : index
    %c0_6 = arith.constant 0 : index
    %6 = vector.load %arg5[%c0_5, %c0_6] : memref<64x256xf32, #tpu.memory_space<vmem>>, vector<64x256xf32>
    tpu.vector_store %arg5[%c0_5, %c0_6], %5 {strides = array<i32>} : memref<64x256xf32, #tpu.memory_space<vmem>>, vector<64x256xf32>,
    return
  }
  func.func @transform_0(%arg0: i32, %arg1: i32) -> (i32, i32) {
    %c0_i32 = arith.constant 0 : i32
    %c0_i32_0 = arith.constant 0 : i32
    return %arg0, %c0_i32 : i32, i32
  }
  func.func @transform_1(%arg0: i32, %arg1: i32) -> (i32, i32) {
    %c0_i32 = arith.constant 0 : i32
    %c0_i32_0 = arith.constant 0 : i32
    return %c0_i32, %arg1 : i32, i32
  }
  func.func @transform_2(%arg0: i32, %arg1: i32) -> (i32, i32) {
    %c0_i32 = arith.constant 0 : i32
    %c0_i32_0 = arith.constant 0 : i32
    return %c0_i32, %arg1 : i32, i32
  }
  func.func @transform_3(%arg0: i32, %arg1: i32) -> (i32, i32) {
    %c0_i32 = arith.constant 0 : i32
    return %arg0, %arg1 : i32, i32
  }
}

module attributes {stable_mosaic.version = 11 : i64} {
  func.func @lstm_stack_kernel(%arg0: memref<64x512xf32, #tpu.memory_space<vmem>>, %arg1: memref<2x8x128xf32, #tpu.memory_space<vmem>>, %arg2: memref<2x8x128xf32, #tpu.memory_space<vmem>>, %arg3: memref<2x128x512xbf16, #tpu.memory_space<vmem>>, %arg4: memref<1x128x512xbf16, #tpu.memory_space<vmem>>, %arg5: memref<1x1x512xf32, #tpu.memory_space<vmem>>, %arg6: memref<64x128xf32, #tpu.memory_space<vmem>>, %arg7: memref<2x8x128xf32, #tpu.memory_space<vmem>>, %arg8: memref<2x8x128xf32, #tpu.memory_space<vmem>>, %arg9: memref<64x512xf32, #tpu.memory_space<vmem>>, %arg10: memref<64x128xf32, #tpu.memory_space<vmem>>) attributes {dimension_semantics = [], scalar_prefetch = 0 : i64, scratch_operands = 2 : i64, tpu.core_type = #tpu.core_type<tc>} {
    %c0 = arith.constant 0 : index
    %c0_0 = arith.constant 0 : index
    %c0_1 = arith.constant 0 : index
    %0 = vector.load %arg3[%c0, %c0_0, %c0_1] : memref<2x128x512xbf16, #tpu.memory_space<vmem>>, vector<1x128x512xbf16>
    %1 = vector.shape_cast %0 : vector<1x128x512xbf16> to vector<128x512xbf16>
    %c0_2 = arith.constant 0 : index
    %c0_3 = arith.constant 0 : index
    %c0_4 = arith.constant 0 : index
    %2 = vector.load %arg1[%c0_2, %c0_3, %c0_4] : memref<2x8x128xf32, #tpu.memory_space<vmem>>, vector<1x8x128xf32>
    %3 = vector.shape_cast %2 : vector<1x8x128xf32> to vector<8x128xf32>
    %c0_5 = arith.constant 0 : index
    %c0_6 = arith.constant 0 : index
    %c0_7 = arith.constant 0 : index
    %4 = vector.load %arg2[%c0_5, %c0_6, %c0_7] : memref<2x8x128xf32, #tpu.memory_space<vmem>>, vector<1x8x128xf32>
    %5 = vector.shape_cast %4 : vector<1x8x128xf32> to vector<8x128xf32>
    %c0_i32 = arith.constant 0 : i32
    %c8_i32 = arith.constant 8 : i32
    %6 = arith.muli %c0_i32, %c8_i32 : i32
    %7 = tpu.assume_multiple %6, 8 : i32
    %8 = arith.index_cast %7 : i32 to index
    %c0_8 = arith.constant 0 : index
    %9 = vector.load %arg0[%8, %c0_8] : memref<64x512xf32, #tpu.memory_space<vmem>>, vector<8x512xf32>
    %10 = arith.truncf %3 : vector<8x128xf32> to vector<8x128xbf16>
    %cst = arith.constant dense<0.000000e+00> : vector<8x512xf32>
    %11 = tpu.matmul %10, %1, %cst {dimension_numbers = #tpu.dot_dimension_numbers<[1], [0], [0], [1], [0, 0, 1, 1], [], []>} : vector<8x128xbf16>, vector<128x512xbf16>, vector<8x512xf32> -> vector<8x512xf32>
    %12 = arith.addf %9, %11 : vector<8x512xf32>
    %13 = vector.extract_strided_slice %12 {offsets = [0, 0], sizes = [8, 128], strides = [1, 1]} : vector<8x512xf32> to vector<8x128xf32>
    %14 = arith.negf %13 : vector<8x128xf32>
    %15 = math.exp %14 : vector<8x128xf32>
    %cst_9 = arith.constant 1.000000e+00 : f32
    %16 = vector.broadcast %cst_9 : f32 to vector<8x128xf32>
    %17 = arith.addf %16, %15 : vector<8x128xf32>
    %18 = arith.divf %16, %17 : vector<8x128xf32>
    %19 = vector.extract_strided_slice %12 {offsets = [0, 128], sizes = [8, 128], strides = [1, 1]} : vector<8x512xf32> to vector<8x128xf32>
    %20 = arith.negf %19 : vector<8x128xf32>
    %21 = math.exp %20 : vector<8x128xf32>
    %cst_10 = arith.constant 1.000000e+00 : f32
    %22 = vector.broadcast %cst_10 : f32 to vector<8x128xf32>
    %23 = arith.addf %22, %21 : vector<8x128xf32>
    %24 = arith.divf %22, %23 : vector<8x128xf32>
    %25 = vector.extract_strided_slice %12 {offsets = [0, 256], sizes = [8, 128], strides = [1, 1]} : vector<8x512xf32> to vector<8x128xf32>
    %26 = math.tanh %25 : vector<8x128xf32>
    %27 = vector.extract_strided_slice %12 {offsets = [0, 384], sizes = [8, 128], strides = [1, 1]} : vector<8x512xf32> to vector<8x128xf32>
    %28 = arith.negf %27 : vector<8x128xf32>
    %29 = math.exp %28 : vector<8x128xf32>
    %cst_11 = arith.constant 1.000000e+00 : f32
    %30 = vector.broadcast %cst_11 : f32 to vector<8x128xf32>
    %31 = arith.addf %30, %29 : vector<8x128xf32>
    %32 = arith.divf %30, %31 : vector<8x128xf32>
    %33 = arith.mulf %24, %5 : vector<8x128xf32>
    %34 = arith.mulf %18, %26 : vector<8x128xf32>
    %35 = arith.addf %33, %34 : vector<8x128xf32>
    %36 = math.tanh %35 : vector<8x128xf32>
    %37 = arith.mulf %32, %36 : vector<8x128xf32>
    %38 = arith.index_cast %7 : i32 to index
    %c0_12 = arith.constant 0 : index
    %39 = vector.load %arg10[%38, %c0_12] : memref<64x128xf32, #tpu.memory_space<vmem>>, vector<8x128xf32>
    tpu.vector_store %arg10[%38, %c0_12], %37 {strides = array<i32>} : memref<64x128xf32, #tpu.memory_space<vmem>>, vector<8x128xf32>,
    %c1_i32 = arith.constant 1 : i32
    %c8_i32_13 = arith.constant 8 : i32
    %40 = arith.muli %c1_i32, %c8_i32_13 : i32
    %41 = tpu.assume_multiple %40, 8 : i32
    %42 = arith.index_cast %41 : i32 to index
    %c0_14 = arith.constant 0 : index
    %43 = vector.load %arg0[%42, %c0_14] : memref<64x512xf32, #tpu.memory_space<vmem>>, vector<8x512xf32>
    %44 = arith.truncf %37 : vector<8x128xf32> to vector<8x128xbf16>
    %cst_15 = arith.constant dense<0.000000e+00> : vector<8x512xf32>
    %45 = tpu.matmul %44, %1, %cst_15 {dimension_numbers = #tpu.dot_dimension_numbers<[1], [0], [0], [1], [0, 0, 1, 1], [], []>} : vector<8x128xbf16>, vector<128x512xbf16>, vector<8x512xf32> -> vector<8x512xf32>
    %46 = arith.addf %43, %45 : vector<8x512xf32>
    %47 = vector.extract_strided_slice %46 {offsets = [0, 0], sizes = [8, 128], strides = [1, 1]} : vector<8x512xf32> to vector<8x128xf32>
    %48 = arith.negf %47 : vector<8x128xf32>
    %49 = math.exp %48 : vector<8x128xf32>
    %cst_16 = arith.constant 1.000000e+00 : f32
    %50 = vector.broadcast %cst_16 : f32 to vector<8x128xf32>
    %51 = arith.addf %50, %49 : vector<8x128xf32>
    %52 = arith.divf %50, %51 : vector<8x128xf32>
    %53 = vector.extract_strided_slice %46 {offsets = [0, 128], sizes = [8, 128], strides = [1, 1]} : vector<8x512xf32> to vector<8x128xf32>
    %54 = arith.negf %53 : vector<8x128xf32>
    %55 = math.exp %54 : vector<8x128xf32>
    %cst_17 = arith.constant 1.000000e+00 : f32
    %56 = vector.broadcast %cst_17 : f32 to vector<8x128xf32>
    %57 = arith.addf %56, %55 : vector<8x128xf32>
    %58 = arith.divf %56, %57 : vector<8x128xf32>
    %59 = vector.extract_strided_slice %46 {offsets = [0, 256], sizes = [8, 128], strides = [1, 1]} : vector<8x512xf32> to vector<8x128xf32>
    %60 = math.tanh %59 : vector<8x128xf32>
    %61 = vector.extract_strided_slice %46 {offsets = [0, 384], sizes = [8, 128], strides = [1, 1]} : vector<8x512xf32> to vector<8x128xf32>
    %62 = arith.negf %61 : vector<8x128xf32>
    %63 = math.exp %62 : vector<8x128xf32>
    %cst_18 = arith.constant 1.000000e+00 : f32
    %64 = vector.broadcast %cst_18 : f32 to vector<8x128xf32>
    %65 = arith.addf %64, %63 : vector<8x128xf32>
    %66 = arith.divf %64, %65 : vector<8x128xf32>
    %67 = arith.mulf %58, %35 : vector<8x128xf32>
    %68 = arith.mulf %52, %60 : vector<8x128xf32>
    %69 = arith.addf %67, %68 : vector<8x128xf32>
    %70 = math.tanh %69 : vector<8x128xf32>
    %71 = arith.mulf %66, %70 : vector<8x128xf32>
    %72 = arith.index_cast %41 : i32 to index
    %c0_19 = arith.constant 0 : index
    %73 = vector.load %arg10[%72, %c0_19] : memref<64x128xf32, #tpu.memory_space<vmem>>, vector<8x128xf32>
    tpu.vector_store %arg10[%72, %c0_19], %71 {strides = array<i32>} : memref<64x128xf32, #tpu.memory_space<vmem>>, vector<8x128xf32>,
    %c2_i32 = arith.constant 2 : i32
    %c8_i32_20 = arith.constant 8 : i32
    %74 = arith.muli %c2_i32, %c8_i32_20 : i32
    %75 = tpu.assume_multiple %74, 8 : i32
    %76 = arith.index_cast %75 : i32 to index
    %c0_21 = arith.constant 0 : index
    %77 = vector.load %arg0[%76, %c0_21] : memref<64x512xf32, #tpu.memory_space<vmem>>, vector<8x512xf32>
    %78 = arith.truncf %71 : vector<8x128xf32> to vector<8x128xbf16>
    %cst_22 = arith.constant dense<0.000000e+00> : vector<8x512xf32>
    %79 = tpu.matmul %78, %1, %cst_22 {dimension_numbers = #tpu.dot_dimension_numbers<[1], [0], [0], [1], [0, 0, 1, 1], [], []>} : vector<8x128xbf16>, vector<128x512xbf16>, vector<8x512xf32> -> vector<8x512xf32>
    %80 = arith.addf %77, %79 : vector<8x512xf32>
    %81 = vector.extract_strided_slice %80 {offsets = [0, 0], sizes = [8, 128], strides = [1, 1]} : vector<8x512xf32> to vector<8x128xf32>
    %82 = arith.negf %81 : vector<8x128xf32>
    %83 = math.exp %82 : vector<8x128xf32>
    %cst_23 = arith.constant 1.000000e+00 : f32
    %84 = vector.broadcast %cst_23 : f32 to vector<8x128xf32>
    %85 = arith.addf %84, %83 : vector<8x128xf32>
    %86 = arith.divf %84, %85 : vector<8x128xf32>
    %87 = vector.extract_strided_slice %80 {offsets = [0, 128], sizes = [8, 128], strides = [1, 1]} : vector<8x512xf32> to vector<8x128xf32>
    %88 = arith.negf %87 : vector<8x128xf32>
    %89 = math.exp %88 : vector<8x128xf32>
    %cst_24 = arith.constant 1.000000e+00 : f32
    %90 = vector.broadcast %cst_24 : f32 to vector<8x128xf32>
    %91 = arith.addf %90, %89 : vector<8x128xf32>
    %92 = arith.divf %90, %91 : vector<8x128xf32>
    %93 = vector.extract_strided_slice %80 {offsets = [0, 256], sizes = [8, 128], strides = [1, 1]} : vector<8x512xf32> to vector<8x128xf32>
    %94 = math.tanh %93 : vector<8x128xf32>
    %95 = vector.extract_strided_slice %80 {offsets = [0, 384], sizes = [8, 128], strides = [1, 1]} : vector<8x512xf32> to vector<8x128xf32>
    %96 = arith.negf %95 : vector<8x128xf32>
    %97 = math.exp %96 : vector<8x128xf32>
    %cst_25 = arith.constant 1.000000e+00 : f32
    %98 = vector.broadcast %cst_25 : f32 to vector<8x128xf32>
    %99 = arith.addf %98, %97 : vector<8x128xf32>
    %100 = arith.divf %98, %99 : vector<8x128xf32>
    %101 = arith.mulf %92, %69 : vector<8x128xf32>
    %102 = arith.mulf %86, %94 : vector<8x128xf32>
    %103 = arith.addf %101, %102 : vector<8x128xf32>
    %104 = math.tanh %103 : vector<8x128xf32>
    %105 = arith.mulf %100, %104 : vector<8x128xf32>
    %106 = arith.index_cast %75 : i32 to index
    %c0_26 = arith.constant 0 : index
    %107 = vector.load %arg10[%106, %c0_26] : memref<64x128xf32, #tpu.memory_space<vmem>>, vector<8x128xf32>
    tpu.vector_store %arg10[%106, %c0_26], %105 {strides = array<i32>} : memref<64x128xf32, #tpu.memory_space<vmem>>, vector<8x128xf32>,
    %c3_i32 = arith.constant 3 : i32
    %c8_i32_27 = arith.constant 8 : i32
    %108 = arith.muli %c3_i32, %c8_i32_27 : i32
    %109 = tpu.assume_multiple %108, 8 : i32
    %110 = arith.index_cast %109 : i32 to index
    %c0_28 = arith.constant 0 : index
    %111 = vector.load %arg0[%110, %c0_28] : memref<64x512xf32, #tpu.memory_space<vmem>>, vector<8x512xf32>
    %112 = arith.truncf %105 : vector<8x128xf32> to vector<8x128xbf16>
    %cst_29 = arith.constant dense<0.000000e+00> : vector<8x512xf32>
    %113 = tpu.matmul %112, %1, %cst_29 {dimension_numbers = #tpu.dot_dimension_numbers<[1], [0], [0], [1], [0, 0, 1, 1], [], []>} : vector<8x128xbf16>, vector<128x512xbf16>, vector<8x512xf32> -> vector<8x512xf32>
    %114 = arith.addf %111, %113 : vector<8x512xf32>
    %115 = vector.extract_strided_slice %114 {offsets = [0, 0], sizes = [8, 128], strides = [1, 1]} : vector<8x512xf32> to vector<8x128xf32>
    %116 = arith.negf %115 : vector<8x128xf32>
    %117 = math.exp %116 : vector<8x128xf32>
    %cst_30 = arith.constant 1.000000e+00 : f32
    %118 = vector.broadcast %cst_30 : f32 to vector<8x128xf32>
    %119 = arith.addf %118, %117 : vector<8x128xf32>
    %120 = arith.divf %118, %119 : vector<8x128xf32>
    %121 = vector.extract_strided_slice %114 {offsets = [0, 128], sizes = [8, 128], strides = [1, 1]} : vector<8x512xf32> to vector<8x128xf32>
    %122 = arith.negf %121 : vector<8x128xf32>
    %123 = math.exp %122 : vector<8x128xf32>
    %cst_31 = arith.constant 1.000000e+00 : f32
    %124 = vector.broadcast %cst_31 : f32 to vector<8x128xf32>
    %125 = arith.addf %124, %123 : vector<8x128xf32>
    %126 = arith.divf %124, %125 : vector<8x128xf32>
    %127 = vector.extract_strided_slice %114 {offsets = [0, 256], sizes = [8, 128], strides = [1, 1]} : vector<8x512xf32> to vector<8x128xf32>
    %128 = math.tanh %127 : vector<8x128xf32>
    %129 = vector.extract_strided_slice %114 {offsets = [0, 384], sizes = [8, 128], strides = [1, 1]} : vector<8x512xf32> to vector<8x128xf32>
    %130 = arith.negf %129 : vector<8x128xf32>
    %131 = math.exp %130 : vector<8x128xf32>
    %cst_32 = arith.constant 1.000000e+00 : f32
    %132 = vector.broadcast %cst_32 : f32 to vector<8x128xf32>
    %133 = arith.addf %132, %131 : vector<8x128xf32>
    %134 = arith.divf %132, %133 : vector<8x128xf32>
    %135 = arith.mulf %126, %103 : vector<8x128xf32>
    %136 = arith.mulf %120, %128 : vector<8x128xf32>
    %137 = arith.addf %135, %136 : vector<8x128xf32>
    %138 = math.tanh %137 : vector<8x128xf32>
    %139 = arith.mulf %134, %138 : vector<8x128xf32>
    %140 = arith.index_cast %109 : i32 to index
    %c0_33 = arith.constant 0 : index
    %141 = vector.load %arg10[%140, %c0_33] : memref<64x128xf32, #tpu.memory_space<vmem>>, vector<8x128xf32>
    tpu.vector_store %arg10[%140, %c0_33], %139 {strides = array<i32>} : memref<64x128xf32, #tpu.memory_space<vmem>>, vector<8x128xf32>,
    %c4_i32 = arith.constant 4 : i32
    %c8_i32_34 = arith.constant 8 : i32
    %142 = arith.muli %c4_i32, %c8_i32_34 : i32
    %143 = tpu.assume_multiple %142, 8 : i32
    %144 = arith.index_cast %143 : i32 to index
    %c0_35 = arith.constant 0 : index
    %145 = vector.load %arg0[%144, %c0_35] : memref<64x512xf32, #tpu.memory_space<vmem>>, vector<8x512xf32>
    %146 = arith.truncf %139 : vector<8x128xf32> to vector<8x128xbf16>
    %cst_36 = arith.constant dense<0.000000e+00> : vector<8x512xf32>
    %147 = tpu.matmul %146, %1, %cst_36 {dimension_numbers = #tpu.dot_dimension_numbers<[1], [0], [0], [1], [0, 0, 1, 1], [], []>} : vector<8x128xbf16>, vector<128x512xbf16>, vector<8x512xf32> -> vector<8x512xf32>
    %148 = arith.addf %145, %147 : vector<8x512xf32>
    %149 = vector.extract_strided_slice %148 {offsets = [0, 0], sizes = [8, 128], strides = [1, 1]} : vector<8x512xf32> to vector<8x128xf32>
    %150 = arith.negf %149 : vector<8x128xf32>
    %151 = math.exp %150 : vector<8x128xf32>
    %cst_37 = arith.constant 1.000000e+00 : f32
    %152 = vector.broadcast %cst_37 : f32 to vector<8x128xf32>
    %153 = arith.addf %152, %151 : vector<8x128xf32>
    %154 = arith.divf %152, %153 : vector<8x128xf32>
    %155 = vector.extract_strided_slice %148 {offsets = [0, 128], sizes = [8, 128], strides = [1, 1]} : vector<8x512xf32> to vector<8x128xf32>
    %156 = arith.negf %155 : vector<8x128xf32>
    %157 = math.exp %156 : vector<8x128xf32>
    %cst_38 = arith.constant 1.000000e+00 : f32
    %158 = vector.broadcast %cst_38 : f32 to vector<8x128xf32>
    %159 = arith.addf %158, %157 : vector<8x128xf32>
    %160 = arith.divf %158, %159 : vector<8x128xf32>
    %161 = vector.extract_strided_slice %148 {offsets = [0, 256], sizes = [8, 128], strides = [1, 1]} : vector<8x512xf32> to vector<8x128xf32>
    %162 = math.tanh %161 : vector<8x128xf32>
    %163 = vector.extract_strided_slice %148 {offsets = [0, 384], sizes = [8, 128], strides = [1, 1]} : vector<8x512xf32> to vector<8x128xf32>
    %164 = arith.negf %163 : vector<8x128xf32>
    %165 = math.exp %164 : vector<8x128xf32>
    %cst_39 = arith.constant 1.000000e+00 : f32
    %166 = vector.broadcast %cst_39 : f32 to vector<8x128xf32>
    %167 = arith.addf %166, %165 : vector<8x128xf32>
    %168 = arith.divf %166, %167 : vector<8x128xf32>
    %169 = arith.mulf %160, %137 : vector<8x128xf32>
    %170 = arith.mulf %154, %162 : vector<8x128xf32>
    %171 = arith.addf %169, %170 : vector<8x128xf32>
    %172 = math.tanh %171 : vector<8x128xf32>
    %173 = arith.mulf %168, %172 : vector<8x128xf32>
    %174 = arith.index_cast %143 : i32 to index
    %c0_40 = arith.constant 0 : index
    %175 = vector.load %arg10[%174, %c0_40] : memref<64x128xf32, #tpu.memory_space<vmem>>, vector<8x128xf32>
    tpu.vector_store %arg10[%174, %c0_40], %173 {strides = array<i32>} : memref<64x128xf32, #tpu.memory_space<vmem>>, vector<8x128xf32>,
    %c5_i32 = arith.constant 5 : i32
    %c8_i32_41 = arith.constant 8 : i32
    %176 = arith.muli %c5_i32, %c8_i32_41 : i32
    %177 = tpu.assume_multiple %176, 8 : i32
    %178 = arith.index_cast %177 : i32 to index
    %c0_42 = arith.constant 0 : index
    %179 = vector.load %arg0[%178, %c0_42] : memref<64x512xf32, #tpu.memory_space<vmem>>, vector<8x512xf32>
    %180 = arith.truncf %173 : vector<8x128xf32> to vector<8x128xbf16>
    %cst_43 = arith.constant dense<0.000000e+00> : vector<8x512xf32>
    %181 = tpu.matmul %180, %1, %cst_43 {dimension_numbers = #tpu.dot_dimension_numbers<[1], [0], [0], [1], [0, 0, 1, 1], [], []>} : vector<8x128xbf16>, vector<128x512xbf16>, vector<8x512xf32> -> vector<8x512xf32>
    %182 = arith.addf %179, %181 : vector<8x512xf32>
    %183 = vector.extract_strided_slice %182 {offsets = [0, 0], sizes = [8, 128], strides = [1, 1]} : vector<8x512xf32> to vector<8x128xf32>
    %184 = arith.negf %183 : vector<8x128xf32>
    %185 = math.exp %184 : vector<8x128xf32>
    %cst_44 = arith.constant 1.000000e+00 : f32
    %186 = vector.broadcast %cst_44 : f32 to vector<8x128xf32>
    %187 = arith.addf %186, %185 : vector<8x128xf32>
    %188 = arith.divf %186, %187 : vector<8x128xf32>
    %189 = vector.extract_strided_slice %182 {offsets = [0, 128], sizes = [8, 128], strides = [1, 1]} : vector<8x512xf32> to vector<8x128xf32>
    %190 = arith.negf %189 : vector<8x128xf32>
    %191 = math.exp %190 : vector<8x128xf32>
    %cst_45 = arith.constant 1.000000e+00 : f32
    %192 = vector.broadcast %cst_45 : f32 to vector<8x128xf32>
    %193 = arith.addf %192, %191 : vector<8x128xf32>
    %194 = arith.divf %192, %193 : vector<8x128xf32>
    %195 = vector.extract_strided_slice %182 {offsets = [0, 256], sizes = [8, 128], strides = [1, 1]} : vector<8x512xf32> to vector<8x128xf32>
    %196 = math.tanh %195 : vector<8x128xf32>
    %197 = vector.extract_strided_slice %182 {offsets = [0, 384], sizes = [8, 128], strides = [1, 1]} : vector<8x512xf32> to vector<8x128xf32>
    %198 = arith.negf %197 : vector<8x128xf32>
    %199 = math.exp %198 : vector<8x128xf32>
    %cst_46 = arith.constant 1.000000e+00 : f32
    %200 = vector.broadcast %cst_46 : f32 to vector<8x128xf32>
    %201 = arith.addf %200, %199 : vector<8x128xf32>
    %202 = arith.divf %200, %201 : vector<8x128xf32>
    %203 = arith.mulf %194, %171 : vector<8x128xf32>
    %204 = arith.mulf %188, %196 : vector<8x128xf32>
    %205 = arith.addf %203, %204 : vector<8x128xf32>
    %206 = math.tanh %205 : vector<8x128xf32>
    %207 = arith.mulf %202, %206 : vector<8x128xf32>
    %208 = arith.index_cast %177 : i32 to index
    %c0_47 = arith.constant 0 : index
    %209 = vector.load %arg10[%208, %c0_47] : memref<64x128xf32, #tpu.memory_space<vmem>>, vector<8x128xf32>
    tpu.vector_store %arg10[%208, %c0_47], %207 {strides = array<i32>} : memref<64x128xf32, #tpu.memory_space<vmem>>, vector<8x128xf32>,
    %c6_i32 = arith.constant 6 : i32
    %c8_i32_48 = arith.constant 8 : i32
    %210 = arith.muli %c6_i32, %c8_i32_48 : i32
    %211 = tpu.assume_multiple %210, 8 : i32
    %212 = arith.index_cast %211 : i32 to index
    %c0_49 = arith.constant 0 : index
    %213 = vector.load %arg0[%212, %c0_49] : memref<64x512xf32, #tpu.memory_space<vmem>>, vector<8x512xf32>
    %214 = arith.truncf %207 : vector<8x128xf32> to vector<8x128xbf16>
    %cst_50 = arith.constant dense<0.000000e+00> : vector<8x512xf32>
    %215 = tpu.matmul %214, %1, %cst_50 {dimension_numbers = #tpu.dot_dimension_numbers<[1], [0], [0], [1], [0, 0, 1, 1], [], []>} : vector<8x128xbf16>, vector<128x512xbf16>, vector<8x512xf32> -> vector<8x512xf32>
    %216 = arith.addf %213, %215 : vector<8x512xf32>
    %217 = vector.extract_strided_slice %216 {offsets = [0, 0], sizes = [8, 128], strides = [1, 1]} : vector<8x512xf32> to vector<8x128xf32>
    %218 = arith.negf %217 : vector<8x128xf32>
    %219 = math.exp %218 : vector<8x128xf32>
    %cst_51 = arith.constant 1.000000e+00 : f32
    %220 = vector.broadcast %cst_51 : f32 to vector<8x128xf32>
    %221 = arith.addf %220, %219 : vector<8x128xf32>
    %222 = arith.divf %220, %221 : vector<8x128xf32>
    %223 = vector.extract_strided_slice %216 {offsets = [0, 128], sizes = [8, 128], strides = [1, 1]} : vector<8x512xf32> to vector<8x128xf32>
    %224 = arith.negf %223 : vector<8x128xf32>
    %225 = math.exp %224 : vector<8x128xf32>
    %cst_52 = arith.constant 1.000000e+00 : f32
    %226 = vector.broadcast %cst_52 : f32 to vector<8x128xf32>
    %227 = arith.addf %226, %225 : vector<8x128xf32>
    %228 = arith.divf %226, %227 : vector<8x128xf32>
    %229 = vector.extract_strided_slice %216 {offsets = [0, 256], sizes = [8, 128], strides = [1, 1]} : vector<8x512xf32> to vector<8x128xf32>
    %230 = math.tanh %229 : vector<8x128xf32>
    %231 = vector.extract_strided_slice %216 {offsets = [0, 384], sizes = [8, 128], strides = [1, 1]} : vector<8x512xf32> to vector<8x128xf32>
    %232 = arith.negf %231 : vector<8x128xf32>
    %233 = math.exp %232 : vector<8x128xf32>
    %cst_53 = arith.constant 1.000000e+00 : f32
    %234 = vector.broadcast %cst_53 : f32 to vector<8x128xf32>
    %235 = arith.addf %234, %233 : vector<8x128xf32>
    %236 = arith.divf %234, %235 : vector<8x128xf32>
    %237 = arith.mulf %228, %205 : vector<8x128xf32>
    %238 = arith.mulf %222, %230 : vector<8x128xf32>
    %239 = arith.addf %237, %238 : vector<8x128xf32>
    %240 = math.tanh %239 : vector<8x128xf32>
    %241 = arith.mulf %236, %240 : vector<8x128xf32>
    %242 = arith.index_cast %211 : i32 to index
    %c0_54 = arith.constant 0 : index
    %243 = vector.load %arg10[%242, %c0_54] : memref<64x128xf32, #tpu.memory_space<vmem>>, vector<8x128xf32>
    tpu.vector_store %arg10[%242, %c0_54], %241 {strides = array<i32>} : memref<64x128xf32, #tpu.memory_space<vmem>>, vector<8x128xf32>,
    %c7_i32 = arith.constant 7 : i32
    %c8_i32_55 = arith.constant 8 : i32
    %244 = arith.muli %c7_i32, %c8_i32_55 : i32
    %245 = tpu.assume_multiple %244, 8 : i32
    %246 = arith.index_cast %245 : i32 to index
    %c0_56 = arith.constant 0 : index
    %247 = vector.load %arg0[%246, %c0_56] : memref<64x512xf32, #tpu.memory_space<vmem>>, vector<8x512xf32>
    %248 = arith.truncf %241 : vector<8x128xf32> to vector<8x128xbf16>
    %cst_57 = arith.constant dense<0.000000e+00> : vector<8x512xf32>
    %249 = tpu.matmul %248, %1, %cst_57 {dimension_numbers = #tpu.dot_dimension_numbers<[1], [0], [0], [1], [0, 0, 1, 1], [], []>} : vector<8x128xbf16>, vector<128x512xbf16>, vector<8x512xf32> -> vector<8x512xf32>
    %250 = arith.addf %247, %249 : vector<8x512xf32>
    %251 = vector.extract_strided_slice %250 {offsets = [0, 0], sizes = [8, 128], strides = [1, 1]} : vector<8x512xf32> to vector<8x128xf32>
    %252 = arith.negf %251 : vector<8x128xf32>
    %253 = math.exp %252 : vector<8x128xf32>
    %cst_58 = arith.constant 1.000000e+00 : f32
    %254 = vector.broadcast %cst_58 : f32 to vector<8x128xf32>
    %255 = arith.addf %254, %253 : vector<8x128xf32>
    %256 = arith.divf %254, %255 : vector<8x128xf32>
    %257 = vector.extract_strided_slice %250 {offsets = [0, 128], sizes = [8, 128], strides = [1, 1]} : vector<8x512xf32> to vector<8x128xf32>
    %258 = arith.negf %257 : vector<8x128xf32>
    %259 = math.exp %258 : vector<8x128xf32>
    %cst_59 = arith.constant 1.000000e+00 : f32
    %260 = vector.broadcast %cst_59 : f32 to vector<8x128xf32>
    %261 = arith.addf %260, %259 : vector<8x128xf32>
    %262 = arith.divf %260, %261 : vector<8x128xf32>
    %263 = vector.extract_strided_slice %250 {offsets = [0, 256], sizes = [8, 128], strides = [1, 1]} : vector<8x512xf32> to vector<8x128xf32>
    %264 = math.tanh %263 : vector<8x128xf32>
    %265 = vector.extract_strided_slice %250 {offsets = [0, 384], sizes = [8, 128], strides = [1, 1]} : vector<8x512xf32> to vector<8x128xf32>
    %266 = arith.negf %265 : vector<8x128xf32>
    %267 = math.exp %266 : vector<8x128xf32>
    %cst_60 = arith.constant 1.000000e+00 : f32
    %268 = vector.broadcast %cst_60 : f32 to vector<8x128xf32>
    %269 = arith.addf %268, %267 : vector<8x128xf32>
    %270 = arith.divf %268, %269 : vector<8x128xf32>
    %271 = arith.mulf %262, %239 : vector<8x128xf32>
    %272 = arith.mulf %256, %264 : vector<8x128xf32>
    %273 = arith.addf %271, %272 : vector<8x128xf32>
    %274 = math.tanh %273 : vector<8x128xf32>
    %275 = arith.mulf %270, %274 : vector<8x128xf32>
    %276 = arith.index_cast %245 : i32 to index
    %c0_61 = arith.constant 0 : index
    %277 = vector.load %arg10[%276, %c0_61] : memref<64x128xf32, #tpu.memory_space<vmem>>, vector<8x128xf32>
    tpu.vector_store %arg10[%276, %c0_61], %275 {strides = array<i32>} : memref<64x128xf32, #tpu.memory_space<vmem>>, vector<8x128xf32>,
    %c8_i32_62 = arith.constant 8 : i32
    %c0_63 = arith.constant 0 : index
    %c0_64 = arith.constant 0 : index
    %c0_65 = arith.constant 0 : index
    %278 = vector.load %arg7[%c0_63, %c0_64, %c0_65] : memref<2x8x128xf32, #tpu.memory_space<vmem>>, vector<1x8x128xf32>
    %279 = vector.shape_cast %278 : vector<1x8x128xf32> to vector<8x128xf32>
    %280 = vector.shape_cast %275 : vector<8x128xf32> to vector<1x8x128xf32>
    tpu.vector_store %arg7[%c0_63, %c0_64, %c0_65], %280 {strides = array<i32>} : memref<2x8x128xf32, #tpu.memory_space<vmem>>, vector<1x8x128xf32>,
    %c0_66 = arith.constant 0 : index
    %c0_67 = arith.constant 0 : index
    %c0_68 = arith.constant 0 : index
    %281 = vector.load %arg8[%c0_66, %c0_67, %c0_68] : memref<2x8x128xf32, #tpu.memory_space<vmem>>, vector<1x8x128xf32>
    %282 = vector.shape_cast %281 : vector<1x8x128xf32> to vector<8x128xf32>
    %283 = vector.shape_cast %273 : vector<8x128xf32> to vector<1x8x128xf32>
    tpu.vector_store %arg8[%c0_66, %c0_67, %c0_68], %283 {strides = array<i32>} : memref<2x8x128xf32, #tpu.memory_space<vmem>>, vector<1x8x128xf32>,
    %c0_69 = arith.constant 0 : index
    %c0_70 = arith.constant 0 : index
    %284 = vector.load %arg10[%c0_69, %c0_70] : memref<64x128xf32, #tpu.memory_space<vmem>>, vector<64x128xf32>
    %285 = arith.truncf %284 : vector<64x128xf32> to vector<64x128xbf16>
    %c0_71 = arith.constant 0 : index
    %c0_72 = arith.constant 0 : index
    %c0_73 = arith.constant 0 : index
    %286 = vector.load %arg4[%c0_71, %c0_72, %c0_73] : memref<1x128x512xbf16, #tpu.memory_space<vmem>>, vector<1x128x512xbf16>
    %287 = vector.shape_cast %286 : vector<1x128x512xbf16> to vector<128x512xbf16>
    %cst_74 = arith.constant dense<0.000000e+00> : vector<64x512xf32>
    %288 = tpu.matmul %285, %287, %cst_74 {dimension_numbers = #tpu.dot_dimension_numbers<[1], [0], [0], [1], [0, 0, 1, 1], [], []>} : vector<64x128xbf16>, vector<128x512xbf16>, vector<64x512xf32> -> vector<64x512xf32>
    %c0_75 = arith.constant 0 : index
    %c0_76 = arith.constant 0 : index
    %c0_77 = arith.constant 0 : index
    %289 = vector.load %arg5[%c0_75, %c0_76, %c0_77] : memref<1x1x512xf32, #tpu.memory_space<vmem>>, vector<1x1x512xf32>
    %290 = vector.shape_cast %289 : vector<1x1x512xf32> to vector<1x512xf32>
    %291 = vector.broadcast %290 : vector<1x512xf32> to vector<64x512xf32>
    %292 = arith.addf %288, %291 : vector<64x512xf32>
    %c0_78 = arith.constant 0 : index
    %c0_79 = arith.constant 0 : index
    %293 = vector.load %arg9[%c0_78, %c0_79] : memref<64x512xf32, #tpu.memory_space<vmem>>, vector<64x512xf32>
    tpu.vector_store %arg9[%c0_78, %c0_79], %292 {strides = array<i32>} : memref<64x512xf32, #tpu.memory_space<vmem>>, vector<64x512xf32>,
    %c1 = arith.constant 1 : index
    %c0_80 = arith.constant 0 : index
    %c0_81 = arith.constant 0 : index
    %294 = vector.load %arg3[%c1, %c0_80, %c0_81] : memref<2x128x512xbf16, #tpu.memory_space<vmem>>, vector<1x128x512xbf16>
    %295 = vector.shape_cast %294 : vector<1x128x512xbf16> to vector<128x512xbf16>
    %c1_82 = arith.constant 1 : index
    %c0_83 = arith.constant 0 : index
    %c0_84 = arith.constant 0 : index
    %296 = vector.load %arg1[%c1_82, %c0_83, %c0_84] : memref<2x8x128xf32, #tpu.memory_space<vmem>>, vector<1x8x128xf32>
    %297 = vector.shape_cast %296 : vector<1x8x128xf32> to vector<8x128xf32>
    %c1_85 = arith.constant 1 : index
    %c0_86 = arith.constant 0 : index
    %c0_87 = arith.constant 0 : index
    %298 = vector.load %arg2[%c1_85, %c0_86, %c0_87] : memref<2x8x128xf32, #tpu.memory_space<vmem>>, vector<1x8x128xf32>
    %299 = vector.shape_cast %298 : vector<1x8x128xf32> to vector<8x128xf32>
    %c0_i32_88 = arith.constant 0 : i32
    %c8_i32_89 = arith.constant 8 : i32
    %300 = arith.muli %c0_i32_88, %c8_i32_89 : i32
    %301 = tpu.assume_multiple %300, 8 : i32
    %302 = arith.index_cast %301 : i32 to index
    %c0_90 = arith.constant 0 : index
    %303 = vector.load %arg9[%302, %c0_90] : memref<64x512xf32, #tpu.memory_space<vmem>>, vector<8x512xf32>
    %304 = arith.truncf %297 : vector<8x128xf32> to vector<8x128xbf16>
    %cst_91 = arith.constant dense<0.000000e+00> : vector<8x512xf32>
    %305 = tpu.matmul %304, %295, %cst_91 {dimension_numbers = #tpu.dot_dimension_numbers<[1], [0], [0], [1], [0, 0, 1, 1], [], []>} : vector<8x128xbf16>, vector<128x512xbf16>, vector<8x512xf32> -> vector<8x512xf32>
    %306 = arith.addf %303, %305 : vector<8x512xf32>
    %307 = vector.extract_strided_slice %306 {offsets = [0, 0], sizes = [8, 128], strides = [1, 1]} : vector<8x512xf32> to vector<8x128xf32>
    %308 = arith.negf %307 : vector<8x128xf32>
    %309 = math.exp %308 : vector<8x128xf32>
    %cst_92 = arith.constant 1.000000e+00 : f32
    %310 = vector.broadcast %cst_92 : f32 to vector<8x128xf32>
    %311 = arith.addf %310, %309 : vector<8x128xf32>
    %312 = arith.divf %310, %311 : vector<8x128xf32>
    %313 = vector.extract_strided_slice %306 {offsets = [0, 128], sizes = [8, 128], strides = [1, 1]} : vector<8x512xf32> to vector<8x128xf32>
    %314 = arith.negf %313 : vector<8x128xf32>
    %315 = math.exp %314 : vector<8x128xf32>
    %cst_93 = arith.constant 1.000000e+00 : f32
    %316 = vector.broadcast %cst_93 : f32 to vector<8x128xf32>
    %317 = arith.addf %316, %315 : vector<8x128xf32>
    %318 = arith.divf %316, %317 : vector<8x128xf32>
    %319 = vector.extract_strided_slice %306 {offsets = [0, 256], sizes = [8, 128], strides = [1, 1]} : vector<8x512xf32> to vector<8x128xf32>
    %320 = math.tanh %319 : vector<8x128xf32>
    %321 = vector.extract_strided_slice %306 {offsets = [0, 384], sizes = [8, 128], strides = [1, 1]} : vector<8x512xf32> to vector<8x128xf32>
    %322 = arith.negf %321 : vector<8x128xf32>
    %323 = math.exp %322 : vector<8x128xf32>
    %cst_94 = arith.constant 1.000000e+00 : f32
    %324 = vector.broadcast %cst_94 : f32 to vector<8x128xf32>
    %325 = arith.addf %324, %323 : vector<8x128xf32>
    %326 = arith.divf %324, %325 : vector<8x128xf32>
    %327 = arith.mulf %318, %299 : vector<8x128xf32>
    %328 = arith.mulf %312, %320 : vector<8x128xf32>
    %329 = arith.addf %327, %328 : vector<8x128xf32>
    %330 = math.tanh %329 : vector<8x128xf32>
    %331 = arith.mulf %326, %330 : vector<8x128xf32>
    %332 = arith.index_cast %301 : i32 to index
    %c0_95 = arith.constant 0 : index
    %333 = vector.load %arg6[%332, %c0_95] : memref<64x128xf32, #tpu.memory_space<vmem>>, vector<8x128xf32>
    tpu.vector_store %arg6[%332, %c0_95], %331 {strides = array<i32>} : memref<64x128xf32, #tpu.memory_space<vmem>>, vector<8x128xf32>,
    %c1_i32_96 = arith.constant 1 : i32
    %c8_i32_97 = arith.constant 8 : i32
    %334 = arith.muli %c1_i32_96, %c8_i32_97 : i32
    %335 = tpu.assume_multiple %334, 8 : i32
    %336 = arith.index_cast %335 : i32 to index
    %c0_98 = arith.constant 0 : index
    %337 = vector.load %arg9[%336, %c0_98] : memref<64x512xf32, #tpu.memory_space<vmem>>, vector<8x512xf32>
    %338 = arith.truncf %331 : vector<8x128xf32> to vector<8x128xbf16>
    %cst_99 = arith.constant dense<0.000000e+00> : vector<8x512xf32>
    %339 = tpu.matmul %338, %295, %cst_99 {dimension_numbers = #tpu.dot_dimension_numbers<[1], [0], [0], [1], [0, 0, 1, 1], [], []>} : vector<8x128xbf16>, vector<128x512xbf16>, vector<8x512xf32> -> vector<8x512xf32>
    %340 = arith.addf %337, %339 : vector<8x512xf32>
    %341 = vector.extract_strided_slice %340 {offsets = [0, 0], sizes = [8, 128], strides = [1, 1]} : vector<8x512xf32> to vector<8x128xf32>
    %342 = arith.negf %341 : vector<8x128xf32>
    %343 = math.exp %342 : vector<8x128xf32>
    %cst_100 = arith.constant 1.000000e+00 : f32
    %344 = vector.broadcast %cst_100 : f32 to vector<8x128xf32>
    %345 = arith.addf %344, %343 : vector<8x128xf32>
    %346 = arith.divf %344, %345 : vector<8x128xf32>
    %347 = vector.extract_strided_slice %340 {offsets = [0, 128], sizes = [8, 128], strides = [1, 1]} : vector<8x512xf32> to vector<8x128xf32>
    %348 = arith.negf %347 : vector<8x128xf32>
    %349 = math.exp %348 : vector<8x128xf32>
    %cst_101 = arith.constant 1.000000e+00 : f32
    %350 = vector.broadcast %cst_101 : f32 to vector<8x128xf32>
    %351 = arith.addf %350, %349 : vector<8x128xf32>
    %352 = arith.divf %350, %351 : vector<8x128xf32>
    %353 = vector.extract_strided_slice %340 {offsets = [0, 256], sizes = [8, 128], strides = [1, 1]} : vector<8x512xf32> to vector<8x128xf32>
    %354 = math.tanh %353 : vector<8x128xf32>
    %355 = vector.extract_strided_slice %340 {offsets = [0, 384], sizes = [8, 128], strides = [1, 1]} : vector<8x512xf32> to vector<8x128xf32>
    %356 = arith.negf %355 : vector<8x128xf32>
    %357 = math.exp %356 : vector<8x128xf32>
    %cst_102 = arith.constant 1.000000e+00 : f32
    %358 = vector.broadcast %cst_102 : f32 to vector<8x128xf32>
    %359 = arith.addf %358, %357 : vector<8x128xf32>
    %360 = arith.divf %358, %359 : vector<8x128xf32>
    %361 = arith.mulf %352, %329 : vector<8x128xf32>
    %362 = arith.mulf %346, %354 : vector<8x128xf32>
    %363 = arith.addf %361, %362 : vector<8x128xf32>
    %364 = math.tanh %363 : vector<8x128xf32>
    %365 = arith.mulf %360, %364 : vector<8x128xf32>
    %366 = arith.index_cast %335 : i32 to index
    %c0_103 = arith.constant 0 : index
    %367 = vector.load %arg6[%366, %c0_103] : memref<64x128xf32, #tpu.memory_space<vmem>>, vector<8x128xf32>
    tpu.vector_store %arg6[%366, %c0_103], %365 {strides = array<i32>} : memref<64x128xf32, #tpu.memory_space<vmem>>, vector<8x128xf32>,
    %c2_i32_104 = arith.constant 2 : i32
    %c8_i32_105 = arith.constant 8 : i32
    %368 = arith.muli %c2_i32_104, %c8_i32_105 : i32
    %369 = tpu.assume_multiple %368, 8 : i32
    %370 = arith.index_cast %369 : i32 to index
    %c0_106 = arith.constant 0 : index
    %371 = vector.load %arg9[%370, %c0_106] : memref<64x512xf32, #tpu.memory_space<vmem>>, vector<8x512xf32>
    %372 = arith.truncf %365 : vector<8x128xf32> to vector<8x128xbf16>
    %cst_107 = arith.constant dense<0.000000e+00> : vector<8x512xf32>
    %373 = tpu.matmul %372, %295, %cst_107 {dimension_numbers = #tpu.dot_dimension_numbers<[1], [0], [0], [1], [0, 0, 1, 1], [], []>} : vector<8x128xbf16>, vector<128x512xbf16>, vector<8x512xf32> -> vector<8x512xf32>
    %374 = arith.addf %371, %373 : vector<8x512xf32>
    %375 = vector.extract_strided_slice %374 {offsets = [0, 0], sizes = [8, 128], strides = [1, 1]} : vector<8x512xf32> to vector<8x128xf32>
    %376 = arith.negf %375 : vector<8x128xf32>
    %377 = math.exp %376 : vector<8x128xf32>
    %cst_108 = arith.constant 1.000000e+00 : f32
    %378 = vector.broadcast %cst_108 : f32 to vector<8x128xf32>
    %379 = arith.addf %378, %377 : vector<8x128xf32>
    %380 = arith.divf %378, %379 : vector<8x128xf32>
    %381 = vector.extract_strided_slice %374 {offsets = [0, 128], sizes = [8, 128], strides = [1, 1]} : vector<8x512xf32> to vector<8x128xf32>
    %382 = arith.negf %381 : vector<8x128xf32>
    %383 = math.exp %382 : vector<8x128xf32>
    %cst_109 = arith.constant 1.000000e+00 : f32
    %384 = vector.broadcast %cst_109 : f32 to vector<8x128xf32>
    %385 = arith.addf %384, %383 : vector<8x128xf32>
    %386 = arith.divf %384, %385 : vector<8x128xf32>
    %387 = vector.extract_strided_slice %374 {offsets = [0, 256], sizes = [8, 128], strides = [1, 1]} : vector<8x512xf32> to vector<8x128xf32>
    %388 = math.tanh %387 : vector<8x128xf32>
    %389 = vector.extract_strided_slice %374 {offsets = [0, 384], sizes = [8, 128], strides = [1, 1]} : vector<8x512xf32> to vector<8x128xf32>
    %390 = arith.negf %389 : vector<8x128xf32>
    %391 = math.exp %390 : vector<8x128xf32>
    %cst_110 = arith.constant 1.000000e+00 : f32
    %392 = vector.broadcast %cst_110 : f32 to vector<8x128xf32>
    %393 = arith.addf %392, %391 : vector<8x128xf32>
    %394 = arith.divf %392, %393 : vector<8x128xf32>
    %395 = arith.mulf %386, %363 : vector<8x128xf32>
    %396 = arith.mulf %380, %388 : vector<8x128xf32>
    %397 = arith.addf %395, %396 : vector<8x128xf32>
    %398 = math.tanh %397 : vector<8x128xf32>
    %399 = arith.mulf %394, %398 : vector<8x128xf32>
    %400 = arith.index_cast %369 : i32 to index
    %c0_111 = arith.constant 0 : index
    %401 = vector.load %arg6[%400, %c0_111] : memref<64x128xf32, #tpu.memory_space<vmem>>, vector<8x128xf32>
    tpu.vector_store %arg6[%400, %c0_111], %399 {strides = array<i32>} : memref<64x128xf32, #tpu.memory_space<vmem>>, vector<8x128xf32>,
    %c3_i32_112 = arith.constant 3 : i32
    %c8_i32_113 = arith.constant 8 : i32
    %402 = arith.muli %c3_i32_112, %c8_i32_113 : i32
    %403 = tpu.assume_multiple %402, 8 : i32
    %404 = arith.index_cast %403 : i32 to index
    %c0_114 = arith.constant 0 : index
    %405 = vector.load %arg9[%404, %c0_114] : memref<64x512xf32, #tpu.memory_space<vmem>>, vector<8x512xf32>
    %406 = arith.truncf %399 : vector<8x128xf32> to vector<8x128xbf16>
    %cst_115 = arith.constant dense<0.000000e+00> : vector<8x512xf32>
    %407 = tpu.matmul %406, %295, %cst_115 {dimension_numbers = #tpu.dot_dimension_numbers<[1], [0], [0], [1], [0, 0, 1, 1], [], []>} : vector<8x128xbf16>, vector<128x512xbf16>, vector<8x512xf32> -> vector<8x512xf32>
    %408 = arith.addf %405, %407 : vector<8x512xf32>
    %409 = vector.extract_strided_slice %408 {offsets = [0, 0], sizes = [8, 128], strides = [1, 1]} : vector<8x512xf32> to vector<8x128xf32>
    %410 = arith.negf %409 : vector<8x128xf32>
    %411 = math.exp %410 : vector<8x128xf32>
    %cst_116 = arith.constant 1.000000e+00 : f32
    %412 = vector.broadcast %cst_116 : f32 to vector<8x128xf32>
    %413 = arith.addf %412, %411 : vector<8x128xf32>
    %414 = arith.divf %412, %413 : vector<8x128xf32>
    %415 = vector.extract_strided_slice %408 {offsets = [0, 128], sizes = [8, 128], strides = [1, 1]} : vector<8x512xf32> to vector<8x128xf32>
    %416 = arith.negf %415 : vector<8x128xf32>
    %417 = math.exp %416 : vector<8x128xf32>
    %cst_117 = arith.constant 1.000000e+00 : f32
    %418 = vector.broadcast %cst_117 : f32 to vector<8x128xf32>
    %419 = arith.addf %418, %417 : vector<8x128xf32>
    %420 = arith.divf %418, %419 : vector<8x128xf32>
    %421 = vector.extract_strided_slice %408 {offsets = [0, 256], sizes = [8, 128], strides = [1, 1]} : vector<8x512xf32> to vector<8x128xf32>
    %422 = math.tanh %421 : vector<8x128xf32>
    %423 = vector.extract_strided_slice %408 {offsets = [0, 384], sizes = [8, 128], strides = [1, 1]} : vector<8x512xf32> to vector<8x128xf32>
    %424 = arith.negf %423 : vector<8x128xf32>
    %425 = math.exp %424 : vector<8x128xf32>
    %cst_118 = arith.constant 1.000000e+00 : f32
    %426 = vector.broadcast %cst_118 : f32 to vector<8x128xf32>
    %427 = arith.addf %426, %425 : vector<8x128xf32>
    %428 = arith.divf %426, %427 : vector<8x128xf32>
    %429 = arith.mulf %420, %397 : vector<8x128xf32>
    %430 = arith.mulf %414, %422 : vector<8x128xf32>
    %431 = arith.addf %429, %430 : vector<8x128xf32>
    %432 = math.tanh %431 : vector<8x128xf32>
    %433 = arith.mulf %428, %432 : vector<8x128xf32>
    %434 = arith.index_cast %403 : i32 to index
    %c0_119 = arith.constant 0 : index
    %435 = vector.load %arg6[%434, %c0_119] : memref<64x128xf32, #tpu.memory_space<vmem>>, vector<8x128xf32>
    tpu.vector_store %arg6[%434, %c0_119], %433 {strides = array<i32>} : memref<64x128xf32, #tpu.memory_space<vmem>>, vector<8x128xf32>,
    %c4_i32_120 = arith.constant 4 : i32
    %c8_i32_121 = arith.constant 8 : i32
    %436 = arith.muli %c4_i32_120, %c8_i32_121 : i32
    %437 = tpu.assume_multiple %436, 8 : i32
    %438 = arith.index_cast %437 : i32 to index
    %c0_122 = arith.constant 0 : index
    %439 = vector.load %arg9[%438, %c0_122] : memref<64x512xf32, #tpu.memory_space<vmem>>, vector<8x512xf32>
    %440 = arith.truncf %433 : vector<8x128xf32> to vector<8x128xbf16>
    %cst_123 = arith.constant dense<0.000000e+00> : vector<8x512xf32>
    %441 = tpu.matmul %440, %295, %cst_123 {dimension_numbers = #tpu.dot_dimension_numbers<[1], [0], [0], [1], [0, 0, 1, 1], [], []>} : vector<8x128xbf16>, vector<128x512xbf16>, vector<8x512xf32> -> vector<8x512xf32>
    %442 = arith.addf %439, %441 : vector<8x512xf32>
    %443 = vector.extract_strided_slice %442 {offsets = [0, 0], sizes = [8, 128], strides = [1, 1]} : vector<8x512xf32> to vector<8x128xf32>
    %444 = arith.negf %443 : vector<8x128xf32>
    %445 = math.exp %444 : vector<8x128xf32>
    %cst_124 = arith.constant 1.000000e+00 : f32
    %446 = vector.broadcast %cst_124 : f32 to vector<8x128xf32>
    %447 = arith.addf %446, %445 : vector<8x128xf32>
    %448 = arith.divf %446, %447 : vector<8x128xf32>
    %449 = vector.extract_strided_slice %442 {offsets = [0, 128], sizes = [8, 128], strides = [1, 1]} : vector<8x512xf32> to vector<8x128xf32>
    %450 = arith.negf %449 : vector<8x128xf32>
    %451 = math.exp %450 : vector<8x128xf32>
    %cst_125 = arith.constant 1.000000e+00 : f32
    %452 = vector.broadcast %cst_125 : f32 to vector<8x128xf32>
    %453 = arith.addf %452, %451 : vector<8x128xf32>
    %454 = arith.divf %452, %453 : vector<8x128xf32>
    %455 = vector.extract_strided_slice %442 {offsets = [0, 256], sizes = [8, 128], strides = [1, 1]} : vector<8x512xf32> to vector<8x128xf32>
    %456 = math.tanh %455 : vector<8x128xf32>
    %457 = vector.extract_strided_slice %442 {offsets = [0, 384], sizes = [8, 128], strides = [1, 1]} : vector<8x512xf32> to vector<8x128xf32>
    %458 = arith.negf %457 : vector<8x128xf32>
    %459 = math.exp %458 : vector<8x128xf32>
    %cst_126 = arith.constant 1.000000e+00 : f32
    %460 = vector.broadcast %cst_126 : f32 to vector<8x128xf32>
    %461 = arith.addf %460, %459 : vector<8x128xf32>
    %462 = arith.divf %460, %461 : vector<8x128xf32>
    %463 = arith.mulf %454, %431 : vector<8x128xf32>
    %464 = arith.mulf %448, %456 : vector<8x128xf32>
    %465 = arith.addf %463, %464 : vector<8x128xf32>
    %466 = math.tanh %465 : vector<8x128xf32>
    %467 = arith.mulf %462, %466 : vector<8x128xf32>
    %468 = arith.index_cast %437 : i32 to index
    %c0_127 = arith.constant 0 : index
    %469 = vector.load %arg6[%468, %c0_127] : memref<64x128xf32, #tpu.memory_space<vmem>>, vector<8x128xf32>
    tpu.vector_store %arg6[%468, %c0_127], %467 {strides = array<i32>} : memref<64x128xf32, #tpu.memory_space<vmem>>, vector<8x128xf32>,
    %c5_i32_128 = arith.constant 5 : i32
    %c8_i32_129 = arith.constant 8 : i32
    %470 = arith.muli %c5_i32_128, %c8_i32_129 : i32
    %471 = tpu.assume_multiple %470, 8 : i32
    %472 = arith.index_cast %471 : i32 to index
    %c0_130 = arith.constant 0 : index
    %473 = vector.load %arg9[%472, %c0_130] : memref<64x512xf32, #tpu.memory_space<vmem>>, vector<8x512xf32>
    %474 = arith.truncf %467 : vector<8x128xf32> to vector<8x128xbf16>
    %cst_131 = arith.constant dense<0.000000e+00> : vector<8x512xf32>
    %475 = tpu.matmul %474, %295, %cst_131 {dimension_numbers = #tpu.dot_dimension_numbers<[1], [0], [0], [1], [0, 0, 1, 1], [], []>} : vector<8x128xbf16>, vector<128x512xbf16>, vector<8x512xf32> -> vector<8x512xf32>
    %476 = arith.addf %473, %475 : vector<8x512xf32>
    %477 = vector.extract_strided_slice %476 {offsets = [0, 0], sizes = [8, 128], strides = [1, 1]} : vector<8x512xf32> to vector<8x128xf32>
    %478 = arith.negf %477 : vector<8x128xf32>
    %479 = math.exp %478 : vector<8x128xf32>
    %cst_132 = arith.constant 1.000000e+00 : f32
    %480 = vector.broadcast %cst_132 : f32 to vector<8x128xf32>
    %481 = arith.addf %480, %479 : vector<8x128xf32>
    %482 = arith.divf %480, %481 : vector<8x128xf32>
    %483 = vector.extract_strided_slice %476 {offsets = [0, 128], sizes = [8, 128], strides = [1, 1]} : vector<8x512xf32> to vector<8x128xf32>
    %484 = arith.negf %483 : vector<8x128xf32>
    %485 = math.exp %484 : vector<8x128xf32>
    %cst_133 = arith.constant 1.000000e+00 : f32
    %486 = vector.broadcast %cst_133 : f32 to vector<8x128xf32>
    %487 = arith.addf %486, %485 : vector<8x128xf32>
    %488 = arith.divf %486, %487 : vector<8x128xf32>
    %489 = vector.extract_strided_slice %476 {offsets = [0, 256], sizes = [8, 128], strides = [1, 1]} : vector<8x512xf32> to vector<8x128xf32>
    %490 = math.tanh %489 : vector<8x128xf32>
    %491 = vector.extract_strided_slice %476 {offsets = [0, 384], sizes = [8, 128], strides = [1, 1]} : vector<8x512xf32> to vector<8x128xf32>
    %492 = arith.negf %491 : vector<8x128xf32>
    %493 = math.exp %492 : vector<8x128xf32>
    %cst_134 = arith.constant 1.000000e+00 : f32
    %494 = vector.broadcast %cst_134 : f32 to vector<8x128xf32>
    %495 = arith.addf %494, %493 : vector<8x128xf32>
    %496 = arith.divf %494, %495 : vector<8x128xf32>
    %497 = arith.mulf %488, %465 : vector<8x128xf32>
    %498 = arith.mulf %482, %490 : vector<8x128xf32>
    %499 = arith.addf %497, %498 : vector<8x128xf32>
    %500 = math.tanh %499 : vector<8x128xf32>
    %501 = arith.mulf %496, %500 : vector<8x128xf32>
    %502 = arith.index_cast %471 : i32 to index
    %c0_135 = arith.constant 0 : index
    %503 = vector.load %arg6[%502, %c0_135] : memref<64x128xf32, #tpu.memory_space<vmem>>, vector<8x128xf32>
    tpu.vector_store %arg6[%502, %c0_135], %501 {strides = array<i32>} : memref<64x128xf32, #tpu.memory_space<vmem>>, vector<8x128xf32>,
    %c6_i32_136 = arith.constant 6 : i32
    %c8_i32_137 = arith.constant 8 : i32
    %504 = arith.muli %c6_i32_136, %c8_i32_137 : i32
    %505 = tpu.assume_multiple %504, 8 : i32
    %506 = arith.index_cast %505 : i32 to index
    %c0_138 = arith.constant 0 : index
    %507 = vector.load %arg9[%506, %c0_138] : memref<64x512xf32, #tpu.memory_space<vmem>>, vector<8x512xf32>
    %508 = arith.truncf %501 : vector<8x128xf32> to vector<8x128xbf16>
    %cst_139 = arith.constant dense<0.000000e+00> : vector<8x512xf32>
    %509 = tpu.matmul %508, %295, %cst_139 {dimension_numbers = #tpu.dot_dimension_numbers<[1], [0], [0], [1], [0, 0, 1, 1], [], []>} : vector<8x128xbf16>, vector<128x512xbf16>, vector<8x512xf32> -> vector<8x512xf32>
    %510 = arith.addf %507, %509 : vector<8x512xf32>
    %511 = vector.extract_strided_slice %510 {offsets = [0, 0], sizes = [8, 128], strides = [1, 1]} : vector<8x512xf32> to vector<8x128xf32>
    %512 = arith.negf %511 : vector<8x128xf32>
    %513 = math.exp %512 : vector<8x128xf32>
    %cst_140 = arith.constant 1.000000e+00 : f32
    %514 = vector.broadcast %cst_140 : f32 to vector<8x128xf32>
    %515 = arith.addf %514, %513 : vector<8x128xf32>
    %516 = arith.divf %514, %515 : vector<8x128xf32>
    %517 = vector.extract_strided_slice %510 {offsets = [0, 128], sizes = [8, 128], strides = [1, 1]} : vector<8x512xf32> to vector<8x128xf32>
    %518 = arith.negf %517 : vector<8x128xf32>
    %519 = math.exp %518 : vector<8x128xf32>
    %cst_141 = arith.constant 1.000000e+00 : f32
    %520 = vector.broadcast %cst_141 : f32 to vector<8x128xf32>
    %521 = arith.addf %520, %519 : vector<8x128xf32>
    %522 = arith.divf %520, %521 : vector<8x128xf32>
    %523 = vector.extract_strided_slice %510 {offsets = [0, 256], sizes = [8, 128], strides = [1, 1]} : vector<8x512xf32> to vector<8x128xf32>
    %524 = math.tanh %523 : vector<8x128xf32>
    %525 = vector.extract_strided_slice %510 {offsets = [0, 384], sizes = [8, 128], strides = [1, 1]} : vector<8x512xf32> to vector<8x128xf32>
    %526 = arith.negf %525 : vector<8x128xf32>
    %527 = math.exp %526 : vector<8x128xf32>
    %cst_142 = arith.constant 1.000000e+00 : f32
    %528 = vector.broadcast %cst_142 : f32 to vector<8x128xf32>
    %529 = arith.addf %528, %527 : vector<8x128xf32>
    %530 = arith.divf %528, %529 : vector<8x128xf32>
    %531 = arith.mulf %522, %499 : vector<8x128xf32>
    %532 = arith.mulf %516, %524 : vector<8x128xf32>
    %533 = arith.addf %531, %532 : vector<8x128xf32>
    %534 = math.tanh %533 : vector<8x128xf32>
    %535 = arith.mulf %530, %534 : vector<8x128xf32>
    %536 = arith.index_cast %505 : i32 to index
    %c0_143 = arith.constant 0 : index
    %537 = vector.load %arg6[%536, %c0_143] : memref<64x128xf32, #tpu.memory_space<vmem>>, vector<8x128xf32>
    tpu.vector_store %arg6[%536, %c0_143], %535 {strides = array<i32>} : memref<64x128xf32, #tpu.memory_space<vmem>>, vector<8x128xf32>,
    %c7_i32_144 = arith.constant 7 : i32
    %c8_i32_145 = arith.constant 8 : i32
    %538 = arith.muli %c7_i32_144, %c8_i32_145 : i32
    %539 = tpu.assume_multiple %538, 8 : i32
    %540 = arith.index_cast %539 : i32 to index
    %c0_146 = arith.constant 0 : index
    %541 = vector.load %arg9[%540, %c0_146] : memref<64x512xf32, #tpu.memory_space<vmem>>, vector<8x512xf32>
    %542 = arith.truncf %535 : vector<8x128xf32> to vector<8x128xbf16>
    %cst_147 = arith.constant dense<0.000000e+00> : vector<8x512xf32>
    %543 = tpu.matmul %542, %295, %cst_147 {dimension_numbers = #tpu.dot_dimension_numbers<[1], [0], [0], [1], [0, 0, 1, 1], [], []>} : vector<8x128xbf16>, vector<128x512xbf16>, vector<8x512xf32> -> vector<8x512xf32>
    %544 = arith.addf %541, %543 : vector<8x512xf32>
    %545 = vector.extract_strided_slice %544 {offsets = [0, 0], sizes = [8, 128], strides = [1, 1]} : vector<8x512xf32> to vector<8x128xf32>
    %546 = arith.negf %545 : vector<8x128xf32>
    %547 = math.exp %546 : vector<8x128xf32>
    %cst_148 = arith.constant 1.000000e+00 : f32
    %548 = vector.broadcast %cst_148 : f32 to vector<8x128xf32>
    %549 = arith.addf %548, %547 : vector<8x128xf32>
    %550 = arith.divf %548, %549 : vector<8x128xf32>
    %551 = vector.extract_strided_slice %544 {offsets = [0, 128], sizes = [8, 128], strides = [1, 1]} : vector<8x512xf32> to vector<8x128xf32>
    %552 = arith.negf %551 : vector<8x128xf32>
    %553 = math.exp %552 : vector<8x128xf32>
    %cst_149 = arith.constant 1.000000e+00 : f32
    %554 = vector.broadcast %cst_149 : f32 to vector<8x128xf32>
    %555 = arith.addf %554, %553 : vector<8x128xf32>
    %556 = arith.divf %554, %555 : vector<8x128xf32>
    %557 = vector.extract_strided_slice %544 {offsets = [0, 256], sizes = [8, 128], strides = [1, 1]} : vector<8x512xf32> to vector<8x128xf32>
    %558 = math.tanh %557 : vector<8x128xf32>
    %559 = vector.extract_strided_slice %544 {offsets = [0, 384], sizes = [8, 128], strides = [1, 1]} : vector<8x512xf32> to vector<8x128xf32>
    %560 = arith.negf %559 : vector<8x128xf32>
    %561 = math.exp %560 : vector<8x128xf32>
    %cst_150 = arith.constant 1.000000e+00 : f32
    %562 = vector.broadcast %cst_150 : f32 to vector<8x128xf32>
    %563 = arith.addf %562, %561 : vector<8x128xf32>
    %564 = arith.divf %562, %563 : vector<8x128xf32>
    %565 = arith.mulf %556, %533 : vector<8x128xf32>
    %566 = arith.mulf %550, %558 : vector<8x128xf32>
    %567 = arith.addf %565, %566 : vector<8x128xf32>
    %568 = math.tanh %567 : vector<8x128xf32>
    %569 = arith.mulf %564, %568 : vector<8x128xf32>
    %570 = arith.index_cast %539 : i32 to index
    %c0_151 = arith.constant 0 : index
    %571 = vector.load %arg6[%570, %c0_151] : memref<64x128xf32, #tpu.memory_space<vmem>>, vector<8x128xf32>
    tpu.vector_store %arg6[%570, %c0_151], %569 {strides = array<i32>} : memref<64x128xf32, #tpu.memory_space<vmem>>, vector<8x128xf32>,
    %c8_i32_152 = arith.constant 8 : i32
    %c1_153 = arith.constant 1 : index
    %c0_154 = arith.constant 0 : index
    %c0_155 = arith.constant 0 : index
    %572 = vector.load %arg7[%c1_153, %c0_154, %c0_155] : memref<2x8x128xf32, #tpu.memory_space<vmem>>, vector<1x8x128xf32>
    %573 = vector.shape_cast %572 : vector<1x8x128xf32> to vector<8x128xf32>
    %574 = vector.shape_cast %569 : vector<8x128xf32> to vector<1x8x128xf32>
    tpu.vector_store %arg7[%c1_153, %c0_154, %c0_155], %574 {strides = array<i32>} : memref<2x8x128xf32, #tpu.memory_space<vmem>>, vector<1x8x128xf32>,
    %c1_156 = arith.constant 1 : index
    %c0_157 = arith.constant 0 : index
    %c0_158 = arith.constant 0 : index
    %575 = vector.load %arg8[%c1_156, %c0_157, %c0_158] : memref<2x8x128xf32, #tpu.memory_space<vmem>>, vector<1x8x128xf32>
    %576 = vector.shape_cast %575 : vector<1x8x128xf32> to vector<8x128xf32>
    %577 = vector.shape_cast %567 : vector<8x128xf32> to vector<1x8x128xf32>
    tpu.vector_store %arg8[%c1_156, %c0_157, %c0_158], %577 {strides = array<i32>} : memref<2x8x128xf32, #tpu.memory_space<vmem>>, vector<1x8x128xf32>,
    return
  }
}

</mosaic_0001>

<bundles_post_ra>
// kernel: original_rnn_model_forward.5
= control target key start
LH: loop header
LB: loop body
LE: loop exit
PB: predicated region body
PF: predicated region fallthrough
CT: control target
= control target key end

     0   :  { %s523_s0 = inlined_call_operand.vmem [shape: bf16[64,128], index: 0, kind: input, shape index: {}]   ;;  %s524_s1 = inlined_call_operand.vmem [shape: bf16[128,256], index: 1, kind: input, shape index: {}]   ;;  %s525_s2 = inlined_call_operand.vmem [shape: f32[1,256], index: 2, kind: input, shape index: {}]   ;;  %s526_s3 = inlined_call_operand.hbm [shape: f32[64,256], index: 3, kind: output, shape index: {}]  }
   0x1   :  { %v315_v0 = vld [vmem:[%s524_s1 + $0x70] sm:$0xf]  ;;  %v340_v1 = vld [vmem:[%s524_s1 + $0x74] sm:$0xf0]  ;;  %v339_v2 = vld [vmem:[%s524_s1 + $0x74] sm:$0xf] }
   0x2   :  { %v316_v3 = vor.u32 %v340_v1, %v315_v0  ;;  %v317_v4 = vld [vmem:[%s524_s1 + $0x78] sm:$0xf0]  ;;  %v307_v5 = vld [vmem:[%s524_s1 + $0x60] sm:$0xf]  ;;  %v338_v6 = vld [vmem:[%s524_s1 + $0x64] sm:$0xf0] }
   0x3   :  { %v320_v7 = vor.u32 %v339_v2, %v317_v4  ;;  %v337_v8 = vld [vmem:[%s524_s1 + $0x64] sm:$0xf]  ;;  %v309_v9 = vld [vmem:[%s524_s1 + $0x68] sm:$0xf0]  ;;  %v308_v10 = vor.u32 %v338_v6, %v307_v5  ;;  %v299_v12 = vld [vmem:[%s524_s1 + $0x50] sm:$0xf] }
   0x4   :  { %149 = vmatpush.bf16.msra.mxu0 %v316_v3  ;;  %341 = vmatpush.bf16.msra.mxu2 %v316_v3  ;;  %v312_v11 = vor.u32 %v337_v8, %v309_v9  ;;  %v336_v13 = vld [vmem:[%s524_s1 + $0x54] sm:$0xf0]  ;;  %v335_v14 = vld [vmem:[%s524_s1 + $0x54] sm:$0xf]  ;;  %v301_v15 = vld [vmem:[%s524_s1 + $0x58] sm:$0xf0] }
   0x5   :  { %178 = vmatpush.bf16.msra.mxu1 %v320_v7  ;;  %349 = vmatpush.bf16.msra.mxu3 %v320_v7  ;;  %v300_v16 = vor.u32 %v336_v13, %v299_v12  ;;  %v304_v17 = vor.u32 %v335_v14, %v301_v15  ;;  %v291_v18 = vld [vmem:[%s524_s1 + $0x40] sm:$0xf]  ;;  %v334_v19 = vld [vmem:[%s524_s1 + $0x44] sm:$0xf0]  ;;  %v333_v20 = vld [vmem:[%s524_s1 + $0x44] sm:$0xf] }
   0x6   :  { %v293_v21 = vld [vmem:[%s524_s1 + $0x48] sm:$0xf0]  ;;  %v292_v22 = vor.u32 %v334_v19, %v291_v18 }
   0x8   :  { %150 = vmatpush.bf16.msra.mxu0 %v308_v10  ;;  %342 = vmatpush.bf16.msra.mxu2 %v308_v10 }
   0x9   :  { %179 = vmatpush.bf16.msra.mxu1 %v312_v11  ;;  %350 = vmatpush.bf16.msra.mxu3 %v312_v11 }
   0xc   :  { %151 = vmatpush.bf16.msra.mxu0 %v300_v16  ;;  %343 = vmatpush.bf16.msra.mxu2 %v300_v16 }
   0xd   :  { %8 = vsyncpa [#allocation3], 0  ;;  %180 = vmatpush.bf16.msra.mxu1 %v304_v17  ;;  %351 = vmatpush.bf16.msra.mxu3 %v304_v17  ;;  %v296_v23 = vor.u32 %v333_v20, %v293_v21  ;;  %v283_v24 = vld [vmem:[%s524_s1 + $0x30] sm:$0xf]  ;;  %v332_v25 = vld [vmem:[%s524_s1 + $0x34] sm:$0xf0] }
   0xe   :  { %v331_v26 = vld [vmem:[%s524_s1 + $0x34] sm:$0xf]  ;;  %v285_v27 = vld [vmem:[%s524_s1 + $0x38] sm:$0xf0]  ;;  %v284_v28 = vor.u32 %v332_v25, %v283_v24  ;;  %v275_v30 = vld [vmem:[%s524_s1 + $0x20] sm:$0xf] }
   0xf   :  { %v288_v29 = vor.u32 %v331_v26, %v285_v27  ;;  %v330_v31 = vld [vmem:[%s524_s1 + $0x24] sm:$0xf0]  ;;  %v329_v32 = vld [vmem:[%s524_s1 + $0x24] sm:$0xf]  ;;  %v277_v33 = vld [vmem:[%s524_s1 + $0x28] sm:$0xf0] }
  0x10   :  { %152 = vmatpush.bf16.msra.mxu0 %v292_v22  ;;  %344 = vmatpush.bf16.msra.mxu2 %v292_v22  ;;  %v276_v34 = vor.u32 %v330_v31, %v275_v30  ;;  %v280_v35 = vor.u32 %v329_v32, %v277_v33  ;;  %v267_v36 = vld [vmem:[%s524_s1 + $0x10] sm:$0xf]  ;;  %v328_v37 = vld [vmem:[%s524_s1 + $0x14] sm:$0xf0]  ;;  %v327_v38 = vld [vmem:[%s524_s1 + $0x14] sm:$0xf] }
  0x11   :  { %181 = vmatpush.bf16.msra.mxu1 %v296_v23  ;;  %352 = vmatpush.bf16.msra.mxu3 %v296_v23  ;;  %v269_v39 = vld [vmem:[%s524_s1 + $0x18] sm:$0xf0]  ;;  %v268_v40 = vor.u32 %v328_v37, %v267_v36  ;;  %v259_v42 = vld [vmem:[%s524_s1] sm:$0xf]  ;;  %v326_v43 = vld [vmem:[%s524_s1 + $0x4] sm:$0xf0] }
  0x12   :  { %v272_v41 = vor.u32 %v327_v38, %v269_v39  ;;  %v325_v44 = vld [vmem:[%s524_s1 + $0x4] sm:$0xf]  ;;  %v261_v45 = vld [vmem:[%s524_s1 + $0x8] sm:$0xf0]  ;;  %v260_v46 = vor.u32 %v326_v43, %v259_v42  ;;  %v323_v49 = vld [vmem:[%s523_s0 + $0x10] sm:$0xff]  ;;  %s229_s6 = sshll.u32 %s526_s3, 4  ;;  %s230_s6 = int_to_ptr.hbm [resolvable:$true] %s229_s6 }
  0x13   :  { %v264_v47 = vor.u32 %v325_v44, %v261_v45  ;;  %v321_v48 = vld [vmem:[%s523_s0] sm:$0xff]  ;;  %v322_v50 = vld [vmem:[%s523_s0 + $0x8] sm:$0xff]  ;;  %v324_v51 = vld [vmem:[%s523_s0 + $0x18] sm:$0xff]  ;;  %s386_s0 = smov [#allocation2]   ;;  %s387_s7 = smov 256  }
  0x14   :  { %153 = vmatpush.bf16.msra.mxu0 %v284_v28  ;;  %345 = vmatpush.bf16.msra.mxu2 %v284_v28  ;;  %v39_v52 = vld [vmem:[%s525_s2] sm:$0x3]  ;;  %s227_s2 = sshll.u32 %s386_s0, 4  ;;  %s388_s8 = smov 16   ;;  %s228_s2 = int_to_ptr.vmem [resolvable:$true] %s227_s2 }
  0x15   :  { %182 = vmatpush.bf16.msra.mxu1 %v288_v29  ;;  %353 = vmatpush.bf16.msra.mxu3 %v288_v29  ;;  %v41_v53 = vperm.slane %v39_v52, 0  ;;  %v42_v54 = vperm.slane %v39_v52, 1 }
  0x18   :  { %154 = vmatpush.bf16.msra.mxu0 %v276_v34  ;;  %346 = vmatpush.bf16.msra.mxu2 %v276_v34 }
  0x19   :  { %183 = vmatpush.bf16.msra.mxu1 %v280_v35  ;;  %354 = vmatpush.bf16.msra.mxu3 %v280_v35 }
  0x1c   :  { %155 = vmatpush.bf16.msra.mxu0 %v268_v40  ;;  %347 = vmatpush.bf16.msra.mxu2 %v268_v40 }
  0x1d   :  { %184 = vmatpush.bf16.msra.mxu1 %v272_v41  ;;  %355 = vmatpush.bf16.msra.mxu3 %v272_v41 }
  0x20   :  { %156 = vmatpush.bf16.msra.mxu0 %v260_v46  ;;  %348 = vmatpush.bf16.msra.mxu2 %v260_v46 }
  0x21   :  { %185 = vmatpush.bf16.msra.mxu1 %v264_v47  ;;  %356 = vmatpush.bf16.msra.mxu3 %v264_v47 }
  0x23   :  { %157 = vmatmul.bf16.vlgmr.msra.gmra.mxu0 %v321_v48  ;;  %167 = vmatmul.bf16.vlgmr.msra.gmra.mxu2 %v323_v49 }
  0x24   :  { %186 = vmatmul.bf16.vlgmr.msra.gmra.mxu1 %v321_v48  ;;  %196 = vmatmul.bf16.vlgmr.msra.gmra.mxu3 %v323_v49 }
  0x33   :  { %162 = vmatmul.bf16.gmra.mxu0 %v322_v50  ;;  %172 = vmatmul.bf16.gmra.mxu2 %v324_v51 }
  0x34   :  { %191 = vmatmul.bf16.gmra.mxu1 %v322_v50  ;;  %201 = vmatmul.bf16.gmra.mxu3 %v324_v51 }
  0xa0   :  { %v158_v55 = vpop.f32.mrf.mxu0 }
  0xa1   :  { %v159_v56 = vadd.f32 %v158_v55, %v41_v53  ;;  %v187_v57 = vpop.f32.mrf.mxu1 }
  0xa2   :  { %v188_v58 = vadd.f32 %v187_v57, %v42_v54 }
  0xa3   :  { %207 = vst [vmem:[#allocation2] sm:$0xff] %v159_v56 }
  0xa4   :  { %208 = vst [vmem:[#allocation2 + $0x8] sm:$0xff] %v188_v58 }
  0xa6   :  { %v168_v59 = vpop.f32.mrf.mxu2 }
  0xa7   :  { %v169_v60 = vadd.f32 %v168_v59, %v41_v53  ;;  %v197_v61 = vpop.f32.mrf.mxu3 }
  0xa8   :  { %v198_v62 = vadd.f32 %v197_v61, %v42_v54  ;;  %v160_v63 = vpop.f32.mrf.mxu0 }
  0xa9   :  { %215 = vst [vmem:[#allocation2 + $0x40] sm:$0xff] %v169_v60  ;;  %v161_v0 = vadd.f32 %v160_v63, %v41_v53  ;;  %v189_v1 = vpop.f32.mrf.mxu1 }
  0xaa   :  { %216 = vst [vmem:[#allocation2 + $0x48] sm:$0xff] %v198_v62  ;;  %v190_v2 = vadd.f32 %v189_v1, %v42_v54 }
  0xab   :  { %209 = vst [vmem:[#allocation2 + $0x10] sm:$0xff] %v161_v0 }
  0xac   :  { %210 = vst [vmem:[#allocation2 + $0x18] sm:$0xff] %v190_v2 }
  0xae   :  { %v170_v3 = vpop.f32.mrf.mxu2 }
  0xaf   :  { %v171_v4 = vadd.f32 %v170_v3, %v41_v53  ;;  %v199_v5 = vpop.f32.mrf.mxu3 }
  0xb0   :  { %v200_v6 = vadd.f32 %v199_v5, %v42_v54  ;;  %v163_v7 = vpop.f32.mrf.mxu0 }
  0xb1   :  { %217 = vst [vmem:[#allocation2 + $0x50] sm:$0xff] %v171_v4  ;;  %v164_v8 = vadd.f32 %v163_v7, %v41_v53  ;;  %v192_v9 = vpop.f32.mrf.mxu1 }
  0xb2   :  { %218 = vst [vmem:[#allocation2 + $0x58] sm:$0xff] %v200_v6  ;;  %v193_v10 = vadd.f32 %v192_v9, %v42_v54 }
  0xb3   :  { %211 = vst [vmem:[#allocation2 + $0x20] sm:$0xff] %v164_v8 }
  0xb4   :  { %212 = vst [vmem:[#allocation2 + $0x28] sm:$0xff] %v193_v10 }
  0xb6   :  { %v173_v11 = vpop.f32.mrf.mxu2 }
  0xb7   :  { %v174_v12 = vadd.f32 %v173_v11, %v41_v53  ;;  %v202_v13 = vpop.f32.mrf.mxu3 }
  0xb8   :  { %v203_v14 = vadd.f32 %v202_v13, %v42_v54  ;;  %v165_v15 = vpop.f32.mrf.mxu0 }
  0xb9   :  { %219 = vst [vmem:[#allocation2 + $0x60] sm:$0xff] %v174_v12  ;;  %v166_v16 = vadd.f32 %v165_v15, %v41_v53  ;;  %v194_v17 = vpop.f32.mrf.mxu1 }
  0xba   :  { %220 = vst [vmem:[#allocation2 + $0x68] sm:$0xff] %v203_v14  ;;  %v195_v18 = vadd.f32 %v194_v17, %v42_v54 }
  0xbb   :  { %213 = vst [vmem:[#allocation2 + $0x30] sm:$0xff] %v166_v16 }
  0xbc   :  { %214 = vst [vmem:[#allocation2 + $0x38] sm:$0xff] %v195_v18 }
  0xbe   :  { %v175_v19 = vpop.f32.mrf.mxu2 }
  0xbf   :  { %v176_v20 = vadd.f32 %v175_v19, %v41_v53  ;;  %v204_v21 = vpop.f32.mrf.mxu3 }
  0xc0   :  { %v205_v22 = vadd.f32 %v204_v21, %v42_v54 }
  0xc1   :  { %221 = vst [vmem:[#allocation2 + $0x70] sm:$0xff] %v176_v20 }
  0xc2   :  { %222 = vst [vmem:[#allocation2 + $0x78] sm:$0xff] %v205_v22 }
  0xc3   :  { %235 = dma.vmem_to_hbm [thread:$0]  %s228_s2, 2048, %s230_s6, [#allocation3], %s387_s7, %s387_s7, %s388_s8  }
  0xc4   :  { %384 = dma.done.wait [#allocation3], 2048  }
  0xc5   :  { %385 = vsyncadd [#allocation3], 4294965248 }
  0xc6   :  { %240 = vsyncpa [#allocation3], 1 }

// kernel: original_rnn_model_forward.3
= control target key start
LH: loop header
LB: loop body
LE: loop exit
PB: predicated region body
PF: predicated region fallthrough
CT: control target
= control target key end

     0   :  { %s943_s1 = inlined_call_operand.vmem [shape: bf16[128,512], index: 1, kind: input, shape index: {}]   ;;  %s944_s0 = inlined_call_operand.vmem [shape: bf16[64,128], index: 0, kind: input, shape index: {}]   ;;  %s945_s2 = inlined_call_operand.vmem [shape: f32[1,512], index: 2, kind: input, shape index: {}]   ;;  %s946_s3 = inlined_call_operand.vmem [shape: f32[64,512], index: 3, kind: output, shape index: {}]  }
   0x1   :  { %v530_v0 = vld [vmem:[%s943_s1 + $0xe0] sm:$0xf]  ;;  %v578_v1 = vld [vmem:[%s943_s1 + $0xec] sm:$0xf0]  ;;  %v576_v2 = vld [vmem:[%s943_s1 + $0xe4] sm:$0xf] }
   0x2   :  { %v531_v3 = vor.u32 %v578_v1, %v530_v0  ;;  %v532_v4 = vld [vmem:[%s943_s1 + $0xf0] sm:$0xf0]  ;;  %v538_v5 = vld [vmem:[%s943_s1 + $0xe8] sm:$0xf]  ;;  %v579_v6 = vld [vmem:[%s943_s1 + $0xf4] sm:$0xf0] }
   0x3   :  { %v535_v7 = vor.u32 %v576_v2, %v532_v4  ;;  %v539_v8 = vor.u32 %v579_v6, %v538_v5  ;;  %v577_v9 = vld [vmem:[%s943_s1 + $0xec] sm:$0xf]  ;;  %v540_v10 = vld [vmem:[%s943_s1 + $0xf8] sm:$0xf0]  ;;  %v514_v11 = vld [vmem:[%s943_s1 + $0xc0] sm:$0xf] }
   0x4   :  { %248 = vmatpush.bf16.msra.mxu0 %v531_v3  ;;  %v543_v12 = vor.u32 %v577_v9, %v540_v10  ;;  %v574_v13 = vld [vmem:[%s943_s1 + $0xcc] sm:$0xf0]  ;;  %v572_v14 = vld [vmem:[%s943_s1 + $0xc4] sm:$0xf]  ;;  %v516_v15 = vld [vmem:[%s943_s1 + $0xd0] sm:$0xf0] }
   0x5   :  { %277 = vmatpush.bf16.msra.mxu1 %v535_v7  ;;  %306 = vmatpush.bf16.msra.mxu2 %v539_v8  ;;  %v515_v16 = vor.u32 %v574_v13, %v514_v11  ;;  %v519_v17 = vor.u32 %v572_v14, %v516_v15  ;;  %v522_v18 = vld [vmem:[%s943_s1 + $0xc8] sm:$0xf]  ;;  %v575_v19 = vld [vmem:[%s943_s1 + $0xd4] sm:$0xf0]  ;;  %v573_v20 = vld [vmem:[%s943_s1 + $0xcc] sm:$0xf] }
   0x6   :  { %335 = vmatpush.bf16.msra.mxu3 %v543_v12  ;;  %v523_v21 = vor.u32 %v575_v19, %v522_v18  ;;  %v524_v22 = vld [vmem:[%s943_s1 + $0xd8] sm:$0xf0]  ;;  %v498_v23 = vld [vmem:[%s943_s1 + $0xa0] sm:$0xf]  ;;  %v570_v24 = vld [vmem:[%s943_s1 + $0xac] sm:$0xf0] }
   0x7   :  { %v527_v25 = vor.u32 %v573_v20, %v524_v22  ;;  %v568_v26 = vld [vmem:[%s943_s1 + $0xa4] sm:$0xf]  ;;  %v500_v27 = vld [vmem:[%s943_s1 + $0xb0] sm:$0xf0]  ;;  %v506_v28 = vld [vmem:[%s943_s1 + $0xa8] sm:$0xf]  ;;  %v499_v29 = vor.u32 %v570_v24, %v498_v23 }
   0x8   :  { %249 = vmatpush.bf16.msra.mxu0 %v515_v16  ;;  %v571_v30 = vld [vmem:[%s943_s1 + $0xb4] sm:$0xf0]  ;;  %v569_v31 = vld [vmem:[%s943_s1 + $0xac] sm:$0xf]  ;;  %v508_v32 = vld [vmem:[%s943_s1 + $0xb8] sm:$0xf0]  ;;  %v503_v33 = vor.u32 %v568_v26, %v500_v27 }
   0x9   :  { %278 = vmatpush.bf16.msra.mxu1 %v519_v17  ;;  %307 = vmatpush.bf16.msra.mxu2 %v523_v21  ;;  %v507_v34 = vor.u32 %v571_v30, %v506_v28  ;;  %v482_v35 = vld [vmem:[%s943_s1 + $0x80] sm:$0xf]  ;;  %v566_v36 = vld [vmem:[%s943_s1 + $0x8c] sm:$0xf0]  ;;  %v564_v37 = vld [vmem:[%s943_s1 + $0x84] sm:$0xf]  ;;  %v511_v38 = vor.u32 %v569_v31, %v508_v32 }
   0xa   :  { %336 = vmatpush.bf16.msra.mxu3 %v527_v25  ;;  %v484_v39 = vld [vmem:[%s943_s1 + $0x90] sm:$0xf0]  ;;  %v490_v40 = vld [vmem:[%s943_s1 + $0x88] sm:$0xf]  ;;  %v567_v41 = vld [vmem:[%s943_s1 + $0x94] sm:$0xf0]  ;;  %v483_v44 = vor.u32 %v566_v36, %v482_v35 }
   0xb   :  { %v565_v42 = vld [vmem:[%s943_s1 + $0x8c] sm:$0xf]  ;;  %v492_v43 = vld [vmem:[%s943_s1 + $0x98] sm:$0xf0]  ;;  %v487_v45 = vor.u32 %v564_v37, %v484_v39  ;;  %v491_v46 = vor.u32 %v567_v41, %v490_v40  ;;  %v466_v47 = vld [vmem:[%s943_s1 + $0x60] sm:$0xf] }
   0xc   :  { %250 = vmatpush.bf16.msra.mxu0 %v499_v29  ;;  %v562_v48 = vld [vmem:[%s943_s1 + $0x6c] sm:$0xf0]  ;;  %v560_v49 = vld [vmem:[%s943_s1 + $0x64] sm:$0xf]  ;;  %v495_v50 = vor.u32 %v565_v42, %v492_v43  ;;  %v468_v51 = vld [vmem:[%s943_s1 + $0x70] sm:$0xf0] }
   0xd   :  { %279 = vmatpush.bf16.msra.mxu1 %v503_v33  ;;  %308 = vmatpush.bf16.msra.mxu2 %v507_v34  ;;  %v474_v52 = vld [vmem:[%s943_s1 + $0x68] sm:$0xf]  ;;  %v563_v53 = vld [vmem:[%s943_s1 + $0x74] sm:$0xf0]  ;;  %v561_v54 = vld [vmem:[%s943_s1 + $0x6c] sm:$0xf]  ;;  %v467_v56 = vor.u32 %v562_v48, %v466_v47  ;;  %v471_v57 = vor.u32 %v560_v49, %v468_v51 }
   0xe   :  { %337 = vmatpush.bf16.msra.mxu3 %v511_v38  ;;  %v476_v55 = vld [vmem:[%s943_s1 + $0x78] sm:$0xf0]  ;;  %v475_v58 = vor.u32 %v563_v53, %v474_v52  ;;  %v450_v59 = vld [vmem:[%s943_s1 + $0x40] sm:$0xf]  ;;  %v558_v60 = vld [vmem:[%s943_s1 + $0x4c] sm:$0xf0] }
   0xf   :  { %v556_v61 = vld [vmem:[%s943_s1 + $0x44] sm:$0xf]  ;;  %v479_v62 = vor.u32 %v561_v54, %v476_v55  ;;  %v452_v63 = vld [vmem:[%s943_s1 + $0x50] sm:$0xf0]  ;;  %v458_v0 = vld [vmem:[%s943_s1 + $0x48] sm:$0xf]  ;;  %v451_v4 = vor.u32 %v558_v60, %v450_v59 }
  0x10   :  { %251 = vmatpush.bf16.msra.mxu0 %v483_v44  ;;  %v559_v1 = vld [vmem:[%s943_s1 + $0x54] sm:$0xf0]  ;;  %v557_v2 = vld [vmem:[%s943_s1 + $0x4c] sm:$0xf]  ;;  %v460_v3 = vld [vmem:[%s943_s1 + $0x58] sm:$0xf0]  ;;  %v455_v5 = vor.u32 %v556_v61, %v452_v63 }
  0x11   :  { %280 = vmatpush.bf16.msra.mxu1 %v487_v45  ;;  %309 = vmatpush.bf16.msra.mxu2 %v491_v46  ;;  %v459_v6 = vor.u32 %v559_v1, %v458_v0  ;;  %v434_v7 = vld [vmem:[%s943_s1 + $0x20] sm:$0xf]  ;;  %v554_v8 = vld [vmem:[%s943_s1 + $0x2c] sm:$0xf0]  ;;  %v552_v9 = vld [vmem:[%s943_s1 + $0x24] sm:$0xf]  ;;  %v463_v10 = vor.u32 %v557_v2, %v460_v3 }
  0x12   :  { %338 = vmatpush.bf16.msra.mxu3 %v495_v50  ;;  %v436_v11 = vld [vmem:[%s943_s1 + $0x30] sm:$0xf0]  ;;  %v442_v12 = vld [vmem:[%s943_s1 + $0x28] sm:$0xf]  ;;  %v555_v13 = vld [vmem:[%s943_s1 + $0x34] sm:$0xf0]  ;;  %v435_v16 = vor.u32 %v554_v8, %v434_v7 }
  0x13   :  { %v553_v14 = vld [vmem:[%s943_s1 + $0x2c] sm:$0xf]  ;;  %v444_v15 = vld [vmem:[%s943_s1 + $0x38] sm:$0xf0]  ;;  %v439_v17 = vor.u32 %v552_v9, %v436_v11  ;;  %v443_v18 = vor.u32 %v555_v13, %v442_v12  ;;  %v418_v19 = vld [vmem:[%s943_s1] sm:$0xf] }
  0x14   :  { %252 = vmatpush.bf16.msra.mxu0 %v467_v56  ;;  %v550_v20 = vld [vmem:[%s943_s1 + $0xc] sm:$0xf0]  ;;  %v548_v21 = vld [vmem:[%s943_s1 + $0x4] sm:$0xf]  ;;  %v447_v22 = vor.u32 %v553_v14, %v444_v15  ;;  %v420_v23 = vld [vmem:[%s943_s1 + $0x10] sm:$0xf0] }
  0x15   :  { %281 = vmatpush.bf16.msra.mxu1 %v471_v57  ;;  %310 = vmatpush.bf16.msra.mxu2 %v475_v58  ;;  %v426_v24 = vld [vmem:[%s943_s1 + $0x8] sm:$0xf]  ;;  %v551_v25 = vld [vmem:[%s943_s1 + $0x14] sm:$0xf0]  ;;  %v549_v26 = vld [vmem:[%s943_s1 + $0xc] sm:$0xf]  ;;  %v419_v28 = vor.u32 %v550_v20, %v418_v19  ;;  %v423_v29 = vor.u32 %v548_v21, %v420_v23 }
  0x16   :  { %339 = vmatpush.bf16.msra.mxu3 %v479_v62  ;;  %v428_v27 = vld [vmem:[%s943_s1 + $0x18] sm:$0xf0]  ;;  %v427_v30 = vor.u32 %v551_v25, %v426_v24  ;;  %v544_v32 = vld [vmem:[%s944_s0] sm:$0xff]  ;;  %v545_v33 = vld [vmem:[%s944_s0 + $0x8] sm:$0xff] }
  0x17   :  { %v431_v31 = vor.u32 %v549_v26, %v428_v27  ;;  %v546_v34 = vld [vmem:[%s944_s0 + $0x10] sm:$0xff]  ;;  %v547_v35 = vld [vmem:[%s944_s0 + $0x18] sm:$0xff]  ;;  %v54_v36 = vld [vmem:[%s945_s2] sm:$0xf] }
  0x18   :  { %253 = vmatpush.bf16.msra.mxu0 %v451_v4  ;;  %v807_v37 = vperm.slane %v54_v36, 0  ;;  %v809_v38 = vperm.slane %v54_v36, 1  ;;  %v819_v43 = vperm.slane %v54_v36, 2  ;;  %v821_v44 = vperm.slane %v54_v36, 3 }
  0x19   :  { %282 = vmatpush.bf16.msra.mxu1 %v455_v5  ;;  %311 = vmatpush.bf16.msra.mxu2 %v459_v6 }
  0x1a   :  { %340 = vmatpush.bf16.msra.mxu3 %v463_v10 }
  0x1c   :  { %254 = vmatpush.bf16.msra.mxu0 %v435_v16 }
  0x1d   :  { %283 = vmatpush.bf16.msra.mxu1 %v439_v17  ;;  %312 = vmatpush.bf16.msra.mxu2 %v443_v18 }
  0x1e   :  { %341 = vmatpush.bf16.msra.mxu3 %v447_v22 }
  0x20   :  { %255 = vmatpush.bf16.msra.mxu0 %v419_v28 }
  0x21   :  { %284 = vmatpush.bf16.msra.mxu1 %v423_v29  ;;  %313 = vmatpush.bf16.msra.mxu2 %v427_v30 }
  0x22   :  { %342 = vmatpush.bf16.msra.mxu3 %v431_v31 }
  0x23   :  { %256 = vmatmul.bf16.vlgmr.msra.gmra.mxu0 %v544_v32 }
  0x24   :  { %285 = vmatmul.bf16.vlgmr.msra.gmra.mxu1 %v544_v32  ;;  %314 = vmatmul.bf16.vlgmr.msra.gmra.mxu2 %v544_v32 }
  0x25   :  { %343 = vmatmul.bf16.vlgmr.msra.gmra.mxu3 %v544_v32 }
  0x33   :  { %261 = vmatmul.bf16.gmra.mxu0 %v545_v33 }
  0x34   :  { %290 = vmatmul.bf16.gmra.mxu1 %v545_v33  ;;  %319 = vmatmul.bf16.gmra.mxu2 %v545_v33 }
  0x35   :  { %348 = vmatmul.bf16.gmra.mxu3 %v545_v33 }
  0x43   :  { %266 = vmatmul.bf16.gmra.mxu0 %v546_v34 }
  0x44   :  { %295 = vmatmul.bf16.gmra.mxu1 %v546_v34  ;;  %324 = vmatmul.bf16.gmra.mxu2 %v546_v34 }
  0x45   :  { %353 = vmatmul.bf16.gmra.mxu3 %v546_v34 }
  0x53   :  { %271 = vmatmul.bf16.gmra.mxu0 %v547_v35 }
  0x54   :  { %300 = vmatmul.bf16.gmra.mxu1 %v547_v35  ;;  %329 = vmatmul.bf16.gmra.mxu2 %v547_v35 }
  0x55   :  { %358 = vmatmul.bf16.gmra.mxu3 %v547_v35 }
  0xa0   :  { %v257_v39 = vpop.f32.mrf.mxu0 }
  0xa1   :  { %v258_v40 = vadd.f32 %v257_v39, %v807_v37  ;;  %v286_v41 = vpop.f32.mrf.mxu1 }
  0xa2   :  { %v287_v42 = vadd.f32 %v286_v41, %v809_v38 }
  0xa3   :  { %364 = vst [vmem:[%s946_s3] sm:$0xff] %v258_v40 }
  0xa4   :  { %365 = vst [vmem:[%s946_s3 + $0x8] sm:$0xff] %v287_v42 }
  0xa7   :  { %v315_v45 = vpop.f32.mrf.mxu2 }
  0xa8   :  { %v316_v46 = vadd.f32 %v315_v45, %v819_v43  ;;  %v344_v47 = vpop.f32.mrf.mxu3  ;;  %v259_v48 = vpop.f32.mrf.mxu0 }
  0xa9   :  { %v345_v49 = vadd.f32 %v344_v47, %v821_v44  ;;  %v260_v50 = vadd.f32 %v259_v48, %v807_v37  ;;  %v288_v51 = vpop.f32.mrf.mxu1 }
  0xaa   :  { %366 = vst [vmem:[%s946_s3 + $0x10] sm:$0xff] %v316_v46  ;;  %v289_v52 = vadd.f32 %v288_v51, %v809_v38 }
  0xab   :  { %367 = vst [vmem:[%s946_s3 + $0x18] sm:$0xff] %v345_v49 }
  0xac   :  { %368 = vst [vmem:[%s946_s3 + $0x20] sm:$0xff] %v260_v50 }
  0xad   :  { %369 = vst [vmem:[%s946_s3 + $0x28] sm:$0xff] %v289_v52 }
  0xaf   :  { %v317_v53 = vpop.f32.mrf.mxu2 }
  0xb0   :  { %v318_v54 = vadd.f32 %v317_v53, %v819_v43  ;;  %v346_v55 = vpop.f32.mrf.mxu3  ;;  %v262_v56 = vpop.f32.mrf.mxu0 }
  0xb1   :  { %v347_v57 = vadd.f32 %v346_v55, %v821_v44  ;;  %v263_v58 = vadd.f32 %v262_v56, %v807_v37  ;;  %v291_v59 = vpop.f32.mrf.mxu1 }
  0xb2   :  { %370 = vst [vmem:[%s946_s3 + $0x30] sm:$0xff] %v318_v54  ;;  %v292_v60 = vadd.f32 %v291_v59, %v809_v38 }
  0xb3   :  { %371 = vst [vmem:[%s946_s3 + $0x38] sm:$0xff] %v347_v57 }
  0xb4   :  { %372 = vst [vmem:[%s946_s3 + $0x40] sm:$0xff] %v263_v58 }
  0xb5   :  { %373 = vst [vmem:[%s946_s3 + $0x48] sm:$0xff] %v292_v60 }
  0xb7   :  { %v320_v61 = vpop.f32.mrf.mxu2 }
  0xb8   :  { %v321_v62 = vadd.f32 %v320_v61, %v819_v43  ;;  %v349_v63 = vpop.f32.mrf.mxu3  ;;  %v264_v0 = vpop.f32.mrf.mxu0 }
  0xb9   :  { %v350_v1 = vadd.f32 %v349_v63, %v821_v44  ;;  %v265_v2 = vadd.f32 %v264_v0, %v807_v37  ;;  %v293_v3 = vpop.f32.mrf.mxu1 }
  0xba   :  { %374 = vst [vmem:[%s946_s3 + $0x50] sm:$0xff] %v321_v62  ;;  %v294_v4 = vadd.f32 %v293_v3, %v809_v38 }
  0xbb   :  { %375 = vst [vmem:[%s946_s3 + $0x58] sm:$0xff] %v350_v1 }
  0xbc   :  { %376 = vst [vmem:[%s946_s3 + $0x60] sm:$0xff] %v265_v2 }
  0xbd   :  { %377 = vst [vmem:[%s946_s3 + $0x68] sm:$0xff] %v294_v4 }
  0xbf   :  { %v322_v5 = vpop.f32.mrf.mxu2 }
  0xc0   :  { %v323_v6 = vadd.f32 %v322_v5, %v819_v43  ;;  %v351_v7 = vpop.f32.mrf.mxu3  ;;  %v267_v8 = vpop.f32.mrf.mxu0 }
  0xc1   :  { %v352_v9 = vadd.f32 %v351_v7, %v821_v44  ;;  %v268_v10 = vadd.f32 %v267_v8, %v807_v37  ;;  %v296_v11 = vpop.f32.mrf.mxu1 }
  0xc2   :  { %378 = vst [vmem:[%s946_s3 + $0x70] sm:$0xff] %v323_v6  ;;  %v297_v12 = vadd.f32 %v296_v11, %v809_v38 }
  0xc3   :  { %379 = vst [vmem:[%s946_s3 + $0x78] sm:$0xff] %v352_v9 }
  0xc4   :  { %380 = vst [vmem:[%s946_s3 + $0x80] sm:$0xff] %v268_v10 }
  0xc5   :  { %381 = vst [vmem:[%s946_s3 + $0x88] sm:$0xff] %v297_v12 }
  0xc7   :  { %v325_v13 = vpop.f32.mrf.mxu2 }
  0xc8   :  { %v326_v14 = vadd.f32 %v325_v13, %v819_v43  ;;  %v354_v15 = vpop.f32.mrf.mxu3  ;;  %v269_v16 = vpop.f32.mrf.mxu0 }
  0xc9   :  { %v355_v17 = vadd.f32 %v354_v15, %v821_v44  ;;  %v270_v18 = vadd.f32 %v269_v16, %v807_v37  ;;  %v298_v19 = vpop.f32.mrf.mxu1 }
  0xca   :  { %382 = vst [vmem:[%s946_s3 + $0x90] sm:$0xff] %v326_v14  ;;  %v299_v20 = vadd.f32 %v298_v19, %v809_v38 }
  0xcb   :  { %383 = vst [vmem:[%s946_s3 + $0x98] sm:$0xff] %v355_v17 }
  0xcc   :  { %384 = vst [vmem:[%s946_s3 + $0xa0] sm:$0xff] %v270_v18 }
  0xcd   :  { %385 = vst [vmem:[%s946_s3 + $0xa8] sm:$0xff] %v299_v20 }
  0xcf   :  { %v327_v21 = vpop.f32.mrf.mxu2 }
  0xd0   :  { %v328_v22 = vadd.f32 %v327_v21, %v819_v43  ;;  %v356_v23 = vpop.f32.mrf.mxu3  ;;  %v272_v24 = vpop.f32.mrf.mxu0 }
  0xd1   :  { %v357_v25 = vadd.f32 %v356_v23, %v821_v44  ;;  %v273_v26 = vadd.f32 %v272_v24, %v807_v37  ;;  %v301_v27 = vpop.f32.mrf.mxu1 }
  0xd2   :  { %386 = vst [vmem:[%s946_s3 + $0xb0] sm:$0xff] %v328_v22  ;;  %v302_v28 = vadd.f32 %v301_v27, %v809_v38 }
  0xd3   :  { %387 = vst [vmem:[%s946_s3 + $0xb8] sm:$0xff] %v357_v25 }
  0xd4   :  { %388 = vst [vmem:[%s946_s3 + $0xc0] sm:$0xff] %v273_v26 }
  0xd5   :  { %389 = vst [vmem:[%s946_s3 + $0xc8] sm:$0xff] %v302_v28 }
  0xd7   :  { %v330_v29 = vpop.f32.mrf.mxu2 }
  0xd8   :  { %v331_v30 = vadd.f32 %v330_v29, %v819_v43  ;;  %v359_v31 = vpop.f32.mrf.mxu3  ;;  %v274_v32 = vpop.f32.mrf.mxu0 }
  0xd9   :  { %v360_v33 = vadd.f32 %v359_v31, %v821_v44  ;;  %v275_v34 = vadd.f32 %v274_v32, %v807_v37  ;;  %v303_v35 = vpop.f32.mrf.mxu1 }
  0xda   :  { %390 = vst [vmem:[%s946_s3 + $0xd0] sm:$0xff] %v331_v30  ;;  %v304_v36 = vadd.f32 %v303_v35, %v809_v38 }
  0xdb   :  { %391 = vst [vmem:[%s946_s3 + $0xd8] sm:$0xff] %v360_v33 }
  0xdc   :  { %392 = vst [vmem:[%s946_s3 + $0xe0] sm:$0xff] %v275_v34 }
  0xdd   :  { %393 = vst [vmem:[%s946_s3 + $0xe8] sm:$0xff] %v304_v36 }
  0xdf   :  { %v332_v37 = vpop.f32.mrf.mxu2 }
  0xe0   :  { %v333_v39 = vadd.f32 %v332_v37, %v819_v43  ;;  %v361_v40 = vpop.f32.mrf.mxu3 }
  0xe1   :  { %v362_v41 = vadd.f32 %v361_v40, %v821_v44 }
  0xe2   :  { %394 = vst [vmem:[%s946_s3 + $0xf0] sm:$0xff] %v333_v39 }
  0xe3   :  { %395 = vst [vmem:[%s946_s3 + $0xf8] sm:$0xff] %v362_v41 }

// kernel: original_rnn_model_forward.4
= control target key start
LH: loop header
LB: loop body
LE: loop exit
PB: predicated region body
PF: predicated region fallthrough
CT: control target
= control target key end

     0   :  { %14 = vsyncpa [#allocation5], 0  ;;  %s5006_s0 = inlined_call_operand.vmem [shape: f32[64,512], index: 0, kind: input, shape index: {}]   ;;  %s5007_s1 = inlined_call_operand.vmem [shape: f32[2,8,128], index: 1, kind: input, shape index: {}]   ;;  %s5008_s2 = inlined_call_operand.vmem [shape: f32[2,8,128], index: 2, kind: input, shape index: {}]   ;;  %s5009_s3 = inlined_call_operand.hbm [shape: bf16[2,128,512], index: 3, kind: input, shape index: {}]   ;;  %s5010_s4 = inlined_call_operand.hbm [shape: bf16[1,128,512], index: 4, kind: input, shape index: {}]   ;;  %s5011_s5 = inlined_call_operand.vmem [shape: f32[1,1,512], index: 5, kind: input, shape index: {}]   ;;  %s5012_s6 = inlined_call_operand.vmem [shape: f32[64,128], index: 6, kind: output, shape index: {0}]   ;;  %s5013_s7 = inlined_call_operand.hbm [shape: f32[2,8,128], index: 7, kind: output, shape index: {1}]   ;;  %s5014_s8 = inlined_call_operand.hbm [shape: f32[2,8,128], index: 8, kind: output, shape index: {2}]  }
   0x1   :  { %15 = vsyncpa [#allocation8], 0 }
   0x2   :  { %16 = vsyncpa [#allocation6], 0 }
   0x3   :  { %17 = vsyncpa [#allocation11], 0  ;;  %s28_s29 = sshll.u32 %s5009_s3, 4  ;;  %s3862_s30 = smov [#allocation4]   ;;  %s29_s29 = int_to_ptr.hbm [resolvable:$true] %s28_s29 }
   0x4   :  { %s30_s9 = sshll.u32 %s3862_s30, 4  ;;  %s41_s12 = sshll.u32 %s5010_s4, 4  ;;  %s31_s9 = int_to_ptr.vmem [resolvable:$true] %s30_s9  ;;  %s42_s12 = int_to_ptr.hbm [resolvable:$true] %s41_s12 }
   0x5   :  { %s3863_s13 = smov 256   ;;  %s3864_s14 = smov 16  }
   0x6   :  { %36 = dma.hbm_to_vmem [thread:$0]  %s29_s29, 8192, %s31_s9, [#allocation5], %s3863_s13, %s3863_s13, %s3864_s14  }
   0x7   :  { %s3865_s15 = smov [#allocation7]  }
   0x8   :  { %s43_s16 = sshll.u32 %s3865_s15, 4  ;;  %s44_s16 = int_to_ptr.vmem [resolvable:$true] %s43_s16 }
   0x9   :  { %49 = dma.hbm_to_vmem [thread:$0]  %s42_s12, 4096, %s44_s16, [#allocation8], %s3863_s13, %s3863_s13, %s3864_s14  }
   0xa   :  { %3854 = dma.done.wait [#allocation5], 8192  }
   0xb   :  { %3855 = vsyncadd [#allocation5], 4294959104 }
   0xc   :  { %3856 = dma.done.wait [#allocation8], 4096  }
   0xd   :  { %3857 = vsyncadd [#allocation8], 4294963200  ;;  %v3043_v0 = vld [vmem:[#allocation4 + $0xe0] sm:$0xf]  ;;  %v3428_v1 = vld [vmem:[#allocation4 + $0xec] sm:$0xf0] }
   0xe   :  { %v3426_v2 = vld [vmem:[#allocation4 + $0xe4] sm:$0xf]  ;;  %v3921_v3 = vor.u32 %v3428_v1, %v3043_v0  ;;  %v3045_v4 = vld [vmem:[#allocation4 + $0xf0] sm:$0xf0]  ;;  %v3427_v5 = vld [vmem:[#allocation4 + $0xec] sm:$0xf] }
   0xf   :  { %v3053_v6 = vld [vmem:[#allocation4 + $0xf8] sm:$0xf0]  ;;  %v3923_v7 = vor.u32 %v3426_v2, %v3045_v4  ;;  %v3027_v9 = vld [vmem:[#allocation4 + $0xc0] sm:$0xf]  ;;  %v3424_v10 = vld [vmem:[#allocation4 + $0xcc] sm:$0xf0] }
  0x10   :  { %v3925_v8 = vor.u32 %v3427_v5, %v3053_v6  ;;  %v3422_v11 = vld [vmem:[#allocation4 + $0xc4] sm:$0xf]  ;;  %262 = vmatpush.bf16.msra.mxu0 %v3921_v3  ;;  %v3928_v12 = vor.u32 %v3424_v10, %v3027_v9  ;;  %v3029_v13 = vld [vmem:[#allocation4 + $0xd0] sm:$0xf0]  ;;  %v3423_v14 = vld [vmem:[#allocation4 + $0xcc] sm:$0xf] }
  0x11   :  { %v3037_v15 = vld [vmem:[#allocation4 + $0xd8] sm:$0xf0]  ;;  %275 = vmatpush.bf16.msra.mxu1 %v3923_v7  ;;  %v3932_v16 = vor.u32 %v3422_v11, %v3029_v13  ;;  %v3051_v18 = vld [vmem:[#allocation4 + $0xe8] sm:$0xf]  ;;  %v3429_v19 = vld [vmem:[#allocation4 + $0xf4] sm:$0xf0] }
  0x12   :  { %301 = vmatpush.bf16.msra.mxu3 %v3925_v8  ;;  %v3934_v17 = vor.u32 %v3423_v14, %v3037_v15  ;;  %v3011_v20 = vld [vmem:[#allocation4 + $0xa0] sm:$0xf]  ;;  %v3936_v21 = vor.u32 %v3429_v19, %v3051_v18  ;;  %v3420_v22 = vld [vmem:[#allocation4 + $0xac] sm:$0xf0]  ;;  %v3418_v23 = vld [vmem:[#allocation4 + $0xa4] sm:$0xf] }
  0x13   :  { %v3013_v24 = vld [vmem:[#allocation4 + $0xb0] sm:$0xf0]  ;;  %v3419_v25 = vld [vmem:[#allocation4 + $0xac] sm:$0xf]  ;;  %v3021_v26 = vld [vmem:[#allocation4 + $0xb8] sm:$0xf0]  ;;  %v3940_v28 = vor.u32 %v3420_v22, %v3011_v20 }
  0x14   :  { %v3035_v27 = vld [vmem:[#allocation4 + $0xc8] sm:$0xf]  ;;  %263 = vmatpush.bf16.msra.mxu0 %v3928_v12  ;;  %288 = vmatpush.bf16.msra.mxu2 %v3936_v21  ;;  %v3425_v29 = vld [vmem:[#allocation4 + $0xd4] sm:$0xf0]  ;;  %v2995_v30 = vld [vmem:[#allocation4 + $0x80] sm:$0xf]  ;;  %v3944_v32 = vor.u32 %v3418_v23, %v3013_v24  ;;  %v3946_v33 = vor.u32 %v3419_v25, %v3021_v26 }
  0x15   :  { %v3416_v31 = vld [vmem:[#allocation4 + $0x8c] sm:$0xf0]  ;;  %276 = vmatpush.bf16.msra.mxu1 %v3932_v16  ;;  %v3948_v34 = vor.u32 %v3425_v29, %v3035_v27  ;;  %v3414_v35 = vld [vmem:[#allocation4 + $0x84] sm:$0xf]  ;;  %v2997_v36 = vld [vmem:[#allocation4 + $0x90] sm:$0xf0] }
  0x16   :  { %302 = vmatpush.bf16.msra.mxu3 %v3934_v17  ;;  %v3415_v37 = vld [vmem:[#allocation4 + $0x8c] sm:$0xf]  ;;  %v3005_v38 = vld [vmem:[#allocation4 + $0x98] sm:$0xf0]  ;;  %v3019_v39 = vld [vmem:[#allocation4 + $0xa8] sm:$0xf]  ;;  %v3952_v41 = vor.u32 %v3416_v31, %v2995_v30  ;;  %v3958_v45 = vor.u32 %v3414_v35, %v2997_v36 }
  0x17   :  { %v3421_v40 = vld [vmem:[#allocation4 + $0xb4] sm:$0xf0]  ;;  %v2979_v43 = vld [vmem:[#allocation4 + $0x60] sm:$0xf]  ;;  %v3412_v44 = vld [vmem:[#allocation4 + $0x6c] sm:$0xf0]  ;;  %v3960_v46 = vor.u32 %v3415_v37, %v3005_v38 }
  0x18   :  { %264 = vmatpush.bf16.msra.mxu0 %v3940_v28  ;;  %289 = vmatpush.bf16.msra.mxu2 %v3948_v34  ;;  %v3954_v42 = vor.u32 %v3421_v40, %v3019_v39  ;;  %v3410_v47 = vld [vmem:[#allocation4 + $0x64] sm:$0xf]  ;;  %v3003_v48 = vld [vmem:[#allocation4 + $0x88] sm:$0xf]  ;;  %v3417_v49 = vld [vmem:[#allocation4 + $0x94] sm:$0xf0]  ;;  %v3964_v53 = vor.u32 %v3412_v44, %v2979_v43 }
  0x19   :  { %277 = vmatpush.bf16.msra.mxu1 %v3944_v32  ;;  %v2981_v50 = vld [vmem:[#allocation4 + $0x70] sm:$0xf0]  ;;  %v3411_v51 = vld [vmem:[#allocation4 + $0x6c] sm:$0xf]  ;;  %v2989_v52 = vld [vmem:[#allocation4 + $0x78] sm:$0xf0]  ;;  %v3966_v54 = vor.u32 %v3417_v49, %v3003_v48 }
  0x1a   :  { %303 = vmatpush.bf16.msra.mxu3 %v3946_v33  ;;  %v2963_v55 = vld [vmem:[#allocation4 + $0x40] sm:$0xf]  ;;  %v3408_v56 = vld [vmem:[#allocation4 + $0x4c] sm:$0xf0]  ;;  %v3970_v57 = vor.u32 %v3410_v47, %v2981_v50  ;;  %v3972_v58 = vor.u32 %v3411_v51, %v2989_v52  ;;  %v3406_v59 = vld [vmem:[#allocation4 + $0x44] sm:$0xf] }
  0x1b   :  { %v2987_v60 = vld [vmem:[#allocation4 + $0x68] sm:$0xf]  ;;  %v3413_v61 = vld [vmem:[#allocation4 + $0x74] sm:$0xf0]  ;;  %v2965_v62 = vld [vmem:[#allocation4 + $0x50] sm:$0xf0]  ;;  %v3976_v1 = vor.u32 %v3408_v56, %v2963_v55 }
  0x1c   :  { %265 = vmatpush.bf16.msra.mxu0 %v3952_v41  ;;  %290 = vmatpush.bf16.msra.mxu2 %v3954_v42  ;;  %v3407_v63 = vld [vmem:[#allocation4 + $0x4c] sm:$0xf]  ;;  %v2973_v0 = vld [vmem:[#allocation4 + $0x58] sm:$0xf0]  ;;  %v3978_v2 = vor.u32 %v3413_v61, %v2987_v60  ;;  %v2947_v4 = vld [vmem:[#allocation4 + $0x20] sm:$0xf]  ;;  %v3982_v6 = vor.u32 %v3406_v59, %v2965_v62 }
  0x1d   :  { %278 = vmatpush.bf16.msra.mxu1 %v3958_v45  ;;  %v3404_v5 = vld [vmem:[#allocation4 + $0x2c] sm:$0xf0]  ;;  %v3984_v9 = vor.u32 %v3407_v63, %v2973_v0  ;;  %v3402_v10 = vld [vmem:[#allocation4 + $0x24] sm:$0xf]  ;;  %v2971_v11 = vld [vmem:[#allocation4 + $0x48] sm:$0xf] }
  0x1e   :  { %304 = vmatpush.bf16.msra.mxu3 %v3960_v46  ;;  %v3409_v13 = vld [vmem:[#allocation4 + $0x54] sm:$0xf0]  ;;  %v2949_v14 = vld [vmem:[#allocation4 + $0x30] sm:$0xf0]  ;;  %v3403_v15 = vld [vmem:[#allocation4 + $0x2c] sm:$0xf]  ;;  %v3988_v19 = vor.u32 %v3404_v5, %v2947_v4 }
  0x1f   :  { %v2957_v18 = vld [vmem:[#allocation4 + $0x38] sm:$0xf0]  ;;  %v3990_v20 = vor.u32 %v3409_v13, %v2971_v11  ;;  %v2931_v22 = vld [vmem:[#allocation4] sm:$0xf]  ;;  %v3400_v23 = vld [vmem:[#allocation4 + $0xc] sm:$0xf0]  ;;  %v3994_v24 = vor.u32 %v3402_v10, %v2949_v14 }
  0x20   :  { %266 = vmatpush.bf16.msra.mxu0 %v3964_v53  ;;  %291 = vmatpush.bf16.msra.mxu2 %v3966_v54  ;;  %v3996_v25 = vor.u32 %v3403_v15, %v2957_v18  ;;  %v3398_v26 = vld [vmem:[#allocation4 + $0x4] sm:$0xf]  ;;  %v2955_v27 = vld [vmem:[#allocation4 + $0x28] sm:$0xf]  ;;  %v3405_v29 = vld [vmem:[#allocation4 + $0x34] sm:$0xf0]  ;;  %v4000_v36 = vor.u32 %v3400_v23, %v2931_v22 }
  0x21   :  { %279 = vmatpush.bf16.msra.mxu1 %v3970_v57  ;;  %v2933_v30 = vld [vmem:[#allocation4 + $0x10] sm:$0xf0]  ;;  %v3399_v31 = vld [vmem:[#allocation4 + $0xc] sm:$0xf]  ;;  %v2941_v35 = vld [vmem:[#allocation4 + $0x18] sm:$0xf0]  ;;  %v4005_v38 = vor.u32 %v3405_v29, %v2955_v27 }
  0x22   :  { %305 = vmatpush.bf16.msra.mxu3 %v3972_v58  ;;  %v92_v37 = vld [vmem:[%s5007_s1] sm:$0xff]  ;;  %v4009_v39 = vor.u32 %v3398_v26, %v2933_v30  ;;  %v4011_v40 = vor.u32 %v3399_v31, %v2941_v35  ;;  %v2939_v43 = vld [vmem:[#allocation4 + $0x8] sm:$0xf]  ;;  %v3401_v44 = vld [vmem:[#allocation4 + $0x14] sm:$0xf0]  ;;  %s3866_s27 = smov [#allocation10]  }
  0x23   :  { %v101_v47 = vpack.c.bf16 %v92_v37, %v92_v37  ;;  %v4017_v48 = vor.u32 %v3401_v44, %v2939_v43  ;;  %v97_v49 = vld [vmem:[%s5006_s0] sm:$0xff]  ;;  %v98_v50 = vld [vmem:[%s5006_s0 + $0x8] sm:$0xff]  ;;  %v100_v61 = vld [vmem:[%s5006_s0 + $0x18] sm:$0xff]  ;;  %s2892_s28 = sshll.u32 %s3866_s27, 4  ;;  %s2894_s9 = sshll.u32 %s5014_s8, 4  ;;  %s2893_s28 = int_to_ptr.vmem [resolvable:$true] %s2892_s28  ;;  %s2895_s9 = int_to_ptr.hbm [resolvable:$true] %s2894_s9 }
  0x24   :  { %267 = vmatpush.bf16.msra.mxu0 %v3976_v1  ;;  %292 = vmatpush.bf16.msra.mxu2 %v3978_v2  ;;  %v99_v18 = vld [vmem:[%s5006_s0 + $0x10] sm:$0xff]  ;;  %s3867_s10 = smov 128   ;;  %s3868_s11 = smov 8  }
  0x25   :  { %280 = vmatpush.bf16.msra.mxu1 %v3982_v6  ;;  %s3869_s8 = smov [#allocation9]  }
  0x26   :  { %306 = vmatpush.bf16.msra.mxu3 %v3984_v9  ;;  %s2879_s12 = sshll.u32 %s3869_s8, 4  ;;  %s2880_s12 = int_to_ptr.vmem [resolvable:$true] %s2879_s12 }
  0x28   :  { %268 = vmatpush.bf16.msra.mxu0 %v3988_v19  ;;  %293 = vmatpush.bf16.msra.mxu2 %v3990_v20 }
  0x29   :  { %281 = vmatpush.bf16.msra.mxu1 %v3994_v24 }
  0x2a   :  { %307 = vmatpush.bf16.msra.mxu3 %v3996_v25 }
  0x2c   :  { %269 = vmatpush.bf16.msra.mxu0 %v4000_v36  ;;  %294 = vmatpush.bf16.msra.mxu2 %v4005_v38 }
  0x2d   :  { %282 = vmatpush.bf16.msra.mxu1 %v4009_v39 }
  0x2e   :  { %308 = vmatpush.bf16.msra.mxu3 %v4011_v40 }
  0x2f   :  { %270 = vmatmul.bf16.vlgmr.msra.gmra.mxu0 %v101_v47 }
  0x30   :  { %390 = vmatpush.bf16.msrb.mxu0 %v3921_v3  ;;  %283 = vmatmul.bf16.vlgmr.msra.gmra.mxu1 %v101_v47 }
  0x31   :  { %403 = vmatpush.bf16.msrb.mxu1 %v3923_v7  ;;  %309 = vmatmul.bf16.vlgmr.msra.gmra.mxu3 %v101_v47 }
  0x32   :  { %429 = vmatpush.bf16.msrb.mxu3 %v3925_v8  ;;  %295 = vmatpush.bf16.msra.mxu2 %v4017_v48 }
  0x34   :  { %391 = vmatpush.bf16.msrb.mxu0 %v3928_v12 }
  0x35   :  { %404 = vmatpush.bf16.msrb.mxu1 %v3932_v16  ;;  %296 = vmatmul.bf16.vlgmr.msra.gmra.mxu2 %v101_v47 }
  0x36   :  { %416 = vmatpush.bf16.msrb.mxu2 %v3936_v21  ;;  %430 = vmatpush.bf16.msrb.mxu3 %v3934_v17 }
  0x38   :  { %392 = vmatpush.bf16.msrb.mxu0 %v3940_v28 }
  0x39   :  { %405 = vmatpush.bf16.msrb.mxu1 %v3944_v32 }
  0x3a   :  { %417 = vmatpush.bf16.msrb.mxu2 %v3948_v34  ;;  %431 = vmatpush.bf16.msrb.mxu3 %v3946_v33 }
  0x3c   :  { %393 = vmatpush.bf16.msrb.mxu0 %v3952_v41 }
  0x3d   :  { %406 = vmatpush.bf16.msrb.mxu1 %v3958_v45 }
  0x3e   :  { %418 = vmatpush.bf16.msrb.mxu2 %v3954_v42  ;;  %432 = vmatpush.bf16.msrb.mxu3 %v3960_v46 }
  0x40   :  { %394 = vmatpush.bf16.msrb.mxu0 %v3964_v53 }
  0x41   :  { %407 = vmatpush.bf16.msrb.mxu1 %v3970_v57 }
  0x42   :  { %419 = vmatpush.bf16.msrb.mxu2 %v3966_v54  ;;  %433 = vmatpush.bf16.msrb.mxu3 %v3972_v58 }
  0x44   :  { %395 = vmatpush.bf16.msrb.mxu0 %v3976_v1 }
  0x45   :  { %408 = vmatpush.bf16.msrb.mxu1 %v3982_v6 }
  0x46   :  { %420 = vmatpush.bf16.msrb.mxu2 %v3978_v2  ;;  %434 = vmatpush.bf16.msrb.mxu3 %v3984_v9 }
  0x48   :  { %396 = vmatpush.bf16.msrb.mxu0 %v3988_v19 }
  0x49   :  { %409 = vmatpush.bf16.msrb.mxu1 %v3994_v24 }
  0x4a   :  { %421 = vmatpush.bf16.msrb.mxu2 %v3990_v20  ;;  %435 = vmatpush.bf16.msrb.mxu3 %v3996_v25 }
  0x4c   :  { %397 = vmatpush.bf16.msrb.mxu0 %v4000_v36 }
  0x4d   :  { %410 = vmatpush.bf16.msrb.mxu1 %v4009_v39 }
  0x4e   :  { %422 = vmatpush.bf16.msrb.mxu2 %v4005_v38  ;;  %436 = vmatpush.bf16.msrb.mxu3 %v4011_v40 }
  0x50   :  { %519 = vmatpush.bf16.msra.mxu0 %v3921_v3 }
  0x51   :  { %532 = vmatpush.bf16.msra.mxu1 %v3923_v7 }
  0x52   :  { %558 = vmatpush.bf16.msra.mxu3 %v3925_v8  ;;  %423 = vmatpush.bf16.msrb.mxu2 %v4017_v48 }
  0x54   :  { %520 = vmatpush.bf16.msra.mxu0 %v3928_v12 }
  0x55   :  { %533 = vmatpush.bf16.msra.mxu1 %v3932_v16 }
  0x56   :  { %545 = vmatpush.bf16.msra.mxu2 %v3936_v21  ;;  %559 = vmatpush.bf16.msra.mxu3 %v3934_v17 }
  0x58   :  { %521 = vmatpush.bf16.msra.mxu0 %v3940_v28 }
  0x59   :  { %534 = vmatpush.bf16.msra.mxu1 %v3944_v32 }
  0x5a   :  { %546 = vmatpush.bf16.msra.mxu2 %v3948_v34  ;;  %560 = vmatpush.bf16.msra.mxu3 %v3946_v33 }
  0x5c   :  { %522 = vmatpush.bf16.msra.mxu0 %v3952_v41 }
  0x5d   :  { %535 = vmatpush.bf16.msra.mxu1 %v3958_v45 }
  0x5e   :  { %547 = vmatpush.bf16.msra.mxu2 %v3954_v42  ;;  %561 = vmatpush.bf16.msra.mxu3 %v3960_v46 }
  0x60   :  { %523 = vmatpush.bf16.msra.mxu0 %v3964_v53 }
  0x61   :  { %536 = vmatpush.bf16.msra.mxu1 %v3970_v57 }
  0x62   :  { %548 = vmatpush.bf16.msra.mxu2 %v3966_v54  ;;  %562 = vmatpush.bf16.msra.mxu3 %v3972_v58 }
  0x64   :  { %524 = vmatpush.bf16.msra.mxu0 %v3976_v1 }
  0x65   :  { %537 = vmatpush.bf16.msra.mxu1 %v3982_v6 }
  0x66   :  { %549 = vmatpush.bf16.msra.mxu2 %v3978_v2  ;;  %563 = vmatpush.bf16.msra.mxu3 %v3984_v9 }
  0x68   :  { %525 = vmatpush.bf16.msra.mxu0 %v3988_v19 }
  0x69   :  { %538 = vmatpush.bf16.msra.mxu1 %v3994_v24 }
  0x6a   :  { %550 = vmatpush.bf16.msra.mxu2 %v3990_v20  ;;  %564 = vmatpush.bf16.msra.mxu3 %v3996_v25 }
  0x6c   :  { %526 = vmatpush.bf16.msra.mxu0 %v4000_v36 }
  0x6d   :  { %539 = vmatpush.bf16.msra.mxu1 %v4009_v39 }
  0x6e   :  { %551 = vmatpush.bf16.msra.mxu2 %v4005_v38  ;;  %565 = vmatpush.bf16.msra.mxu3 %v4011_v40 }
  0x72   :  { %552 = vmatpush.bf16.msra.mxu2 %v4017_v48 }
  0xac   :  { %v271_v51 = vpop.f32.mrf.mxu0 }
  0xad   :  { %v314_v52 = vadd.f32 %v271_v51, %v97_v49  ;;  %v284_v55 = vpop.f32.mrf.mxu1 }
  0xae   :  { %v315_v56 = vadd.f32 %v284_v55, %v98_v50 }
  0xaf   :  { %v3057_v59 = vmul.f32 -1.442695, %v314_v52 }
  0xb0   :  { %v3058_v60 = vmul.f32 -1.442695, %v315_v56 }
  0xb1   :  { %3502 = vpow2.f32 %v3057_v59 }
  0xb2   :  { %3504 = vpow2.f32 %v3058_v60 }
  0xb4   :  { %v310_v62 = vpop.f32.mrf.mxu3  ;;  %v273_v0 = vpop.f32.mrf.mxu0 }
  0xb5   :  { %v317_v63 = vadd.f32 %v310_v62, %v100_v61  ;;  %v286_v4 = vpop.f32.mrf.mxu1 }
  0xb6   :  { %v93_v4 = vld [vmem:[%s5008_s2] sm:$0xff] }
  0xb7   :  { %v3059_v5 = vmul.f32 -1.442695, %v317_v63  ;;  %v3503_v10 = vpop.eup %3502 }
  0xb8   :  { %v297_v11 = vpop.f32.mrf.mxu2  ;;  %v3505_v13 = vpop.eup %3504  ;;  %v321_v14 = vadd.f32 1.0, %v3503_v10 }
  0xb9   :  { %3506 = vpow2.f32 %v3059_v5  ;;  %v340_v15 = vadd.f32 1.0, %v3505_v13  ;;  %v316_v26 = vadd.f32 %v297_v11, %v99_v18 }
  0xba   :  { %3508 = vrcp.f32 %v321_v14  ;;  %v333_v47 = vand.u32 2147483648, %v321_v14  ;;  %v331_v51 = vand.u32 2147483647, %v321_v14  ;;  %vm327_vm2 = vweird.f32 %v321_v14 }
  0xbb   :  { %3510 = vrcp.f32 %v340_v15  ;;  %v352_v49 = vand.u32 2147483648, %v340_v15  ;;  %v350_v55 = vand.u32 2147483647, %v340_v15  ;;  %vm346_vm3 = vweird.f32 %v340_v15 }
  0xbc   :  { %v312_v22 = vpop.f32.mrf.mxu3  ;;  %v334_v62 = vor.u32 1.1754944e-38, %v333_v47  ;;  %vm332_vm6 = vcmp.eq.f32.partialorder %v331_v51, 8.507059e+37 }
  0xbd   :  { %v353_v0 = vor.u32 1.1754944e-38, %v352_v49  ;;  %vm351_vm7 = vcmp.eq.f32.partialorder %v350_v55, 8.507059e+37  ;;  %v3061_v49 = vld [vmem:[%s5006_s0 + $0x28] sm:$0xff] }
  0xbf   :  { %v3507_v23 = vpop.eup %3506 }
  0xc0   :  { %v360_v27 = vadd.f32 1.0, %v3507_v23  ;;  %v299_v29 = vpop.f32.mrf.mxu2  ;;  %v3509_v30 = vpop.eup %3508 }
  0xc1   :  { %v3511_v31 = vpop.eup %3510  ;;  %v323_v35 = vmul.f32 %v3509_v30, %v321_v14  ;;  %vm328_vm0 = vweird.f32 %v3509_v30 }
  0xc2   :  { %3512 = vrcp.f32 %v360_v27  ;;  %v342_v37 = vmul.f32 %v3511_v31, %v340_v15  ;;  %vm347_vm1 = vweird.f32 %v3511_v31  ;;  %vm329_vm4 = vmor %vm327_vm2, %vm328_vm0  ;;  %v372_v29 = vand.u32 2147483648, %v360_v27 }
  0xc3   :  { %3514 = vtanh.f32 %v316_v26  ;;  %v324_v43 = vsub.f32 1.0, %v323_v35  ;;  %vm348_vm5 = vmor %vm346_vm3, %vm347_vm1  ;;  %vm366_vm9 = vweird.f32 %v360_v27  ;;  %v370_v35 = vand.u32 2147483647, %v360_v27 }
  0xc4   :  { %v343_v44 = vsub.f32 1.0, %v342_v37  ;;  %v373_v37 = vor.u32 1.1754944e-38, %v372_v29 }
  0xc5   :  { %v325_v50 = vmul.f32 %v3509_v30, %v324_v43  ;;  %vm371_vm11 = vcmp.eq.f32.partialorder %v370_v35, 8.507059e+37 }
  0xc6   :  { %v344_v52 = vmul.f32 %v3511_v31, %v343_v44 }
  0xc7   :  { %v326_v59 = vadd.f32 %v3509_v30, %v325_v50 }
  0xc8   :  { %v3513_v56 = vpop.eup %3512  ;;  %v345_v63 = vadd.f32 %v3511_v31, %v344_v52 }
  0xc9   :  { %v3515_v60 = vpop.eup %3514  ;;  %v362_v61 = vmul.f32 %v3513_v56, %v360_v27  ;;  %v330_v5 = vsel %vm329_vm4, %v3509_v30, %v326_v59  ;;  %vm367_vm8 = vweird.f32 %v3513_v56  ;;  %v3060_v27 = vld [vmem:[%s5006_s0 + $0x20] sm:$0xff] }
  0xca   :  { %v335_v11 = vsel %vm332_vm6, %v334_v62, %v330_v5  ;;  %v349_v13 = vsel %vm348_vm5, %v3511_v31, %v345_v63  ;;  %vm368_vm10 = vmor %vm366_vm9, %vm367_vm8 }
  0xcb   :  { %v363_v10 = vsub.f32 1.0, %v362_v61  ;;  %v354_v18 = vsel %vm351_vm7, %v353_v0, %v349_v13  ;;  %v377_v14 = vmul.f32 %v3515_v60, %v335_v11  ;;  %v3063_v60 = vld [vmem:[%s5006_s0 + $0x38] sm:$0xff] }
  0xcc   :  { %v376_v15 = vmul.f32 %v354_v18, %v93_v4 }
  0xcd   :  { %v364_v22 = vmul.f32 %v3513_v56, %v363_v10 }
  0xce   :  { %v4099_v23 = vadd.f32 %v377_v14, %v376_v15  ;;  %v3062_v15 = vld [vmem:[%s5006_s0 + $0x30] sm:$0xff] }
  0xcf   :  { %v365_v26 = vadd.f32 %v3513_v56, %v364_v22 }
  0xd0   :  { %3516 = vtanh.f32 %v4099_v23 }
  0xd1   :  { %v369_v30 = vsel %vm368_vm10, %v3513_v56, %v365_v26 }
  0xd2   :  { %v374_v31 = vsel %vm371_vm11, %v373_v37, %v369_v30 }
  0xd6   :  { %v3517_v43 = vpop.eup %3516 }
  0xd7   :  { %v4102_v44 = vmul.f32 %v3517_v43, %v374_v31 }
  0xd9   :  { %v389_v47 = vpack.c.bf16 %v4102_v44, %v4102_v44 }
  0xdb   :  { %398 = vmatmul.bf16.vlgmr.msrb.gmra.mxu0 %v389_v47  ;;  %411 = vmatmul.bf16.vlgmr.msrb.gmra.mxu1 %v389_v47 }
  0xdc   :  { %424 = vmatmul.bf16.vlgmr.msrb.gmra.mxu2 %v389_v47  ;;  %437 = vmatmul.bf16.vlgmr.msrb.gmra.mxu3 %v389_v47 }
  0xdd   :  { %648 = vmatpush.bf16.msrb.mxu0 %v3921_v3  ;;  %661 = vmatpush.bf16.msrb.mxu1 %v3923_v7 }
  0xde   :  { %674 = vmatpush.bf16.msrb.mxu2 %v3936_v21  ;;  %687 = vmatpush.bf16.msrb.mxu3 %v3925_v8 }
  0xe1   :  { %649 = vmatpush.bf16.msrb.mxu0 %v3928_v12  ;;  %662 = vmatpush.bf16.msrb.mxu1 %v3932_v16 }
  0xe2   :  { %675 = vmatpush.bf16.msrb.mxu2 %v3948_v34  ;;  %688 = vmatpush.bf16.msrb.mxu3 %v3934_v17 }
  0xe5   :  { %650 = vmatpush.bf16.msrb.mxu0 %v3940_v28  ;;  %663 = vmatpush.bf16.msrb.mxu1 %v3944_v32 }
  0xe6   :  { %676 = vmatpush.bf16.msrb.mxu2 %v3954_v42  ;;  %689 = vmatpush.bf16.msrb.mxu3 %v3946_v33 }
  0xe9   :  { %651 = vmatpush.bf16.msrb.mxu0 %v3952_v41  ;;  %664 = vmatpush.bf16.msrb.mxu1 %v3958_v45 }
  0xea   :  { %677 = vmatpush.bf16.msrb.mxu2 %v3966_v54  ;;  %690 = vmatpush.bf16.msrb.mxu3 %v3960_v46 }
  0xed   :  { %652 = vmatpush.bf16.msrb.mxu0 %v3964_v53  ;;  %665 = vmatpush.bf16.msrb.mxu1 %v3970_v57 }
  0xee   :  { %678 = vmatpush.bf16.msrb.mxu2 %v3978_v2  ;;  %691 = vmatpush.bf16.msrb.mxu3 %v3972_v58 }
  0xf1   :  { %653 = vmatpush.bf16.msrb.mxu0 %v3976_v1  ;;  %666 = vmatpush.bf16.msrb.mxu1 %v3982_v6 }
  0xf2   :  { %679 = vmatpush.bf16.msrb.mxu2 %v3990_v20  ;;  %692 = vmatpush.bf16.msrb.mxu3 %v3984_v9 }
  0xf5   :  { %654 = vmatpush.bf16.msrb.mxu0 %v3988_v19  ;;  %667 = vmatpush.bf16.msrb.mxu1 %v3994_v24 }
  0xf6   :  { %680 = vmatpush.bf16.msrb.mxu2 %v4005_v38  ;;  %693 = vmatpush.bf16.msrb.mxu3 %v3996_v25 }
  0xf9   :  { %655 = vmatpush.bf16.msrb.mxu0 %v4000_v36  ;;  %668 = vmatpush.bf16.msrb.mxu1 %v4009_v39 }
  0xfa   :  { %681 = vmatpush.bf16.msrb.mxu2 %v4017_v48  ;;  %694 = vmatpush.bf16.msrb.mxu3 %v4011_v40 }
 0x158   :  { %v399_v50 = vpop.f32.mrf.mxu0  ;;  %v412_v51 = vpop.f32.mrf.mxu1 }
 0x159   :  { %v442_v52 = vadd.f32 %v3060_v27, %v399_v50  ;;  %v443_v55 = vadd.f32 %v3061_v49, %v412_v51 }
 0x15b   :  { %v3064_v56 = vmul.f32 -1.442695, %v442_v52  ;;  %v3065_v59 = vmul.f32 -1.442695, %v443_v55 }
 0x15d   :  { %3518 = vpow2.f32 %v3064_v56 }
 0x15e   :  { %3520 = vpow2.f32 %v3065_v59 }
 0x15f   :  { %v425_v61 = vpop.f32.mrf.mxu2  ;;  %v438_v62 = vpop.f32.mrf.mxu3 }
 0x160   :  { %v445_v63 = vadd.f32 %v3063_v60, %v438_v62  ;;  %v401_v0 = vpop.f32.mrf.mxu0  ;;  %v414_v4 = vpop.f32.mrf.mxu1  ;;  %v444_v30 = vadd.f32 %v3062_v15, %v425_v61 }
 0x162   :  { %v3066_v5 = vmul.f32 -1.442695, %v445_v63 }
 0x163   :  { %v3519_v10 = vpop.eup %3518 }
 0x164   :  { %v3521_v11 = vpop.eup %3520  ;;  %v449_v13 = vadd.f32 1.0, %v3519_v10  ;;  %3522 = vpow2.f32 %v3066_v5 }
 0x165   :  { %v468_v18 = vadd.f32 1.0, %v3521_v11 }
 0x166   :  { %3524 = vrcp.f32 %v449_v13  ;;  %v461_v49 = vand.u32 2147483648, %v449_v13  ;;  %v459_v52 = vand.u32 2147483647, %v449_v13  ;;  %vm455_vm14 = vweird.f32 %v449_v13 }
 0x167   :  { %3526 = vrcp.f32 %v468_v18  ;;  %v427_v14 = vpop.f32.mrf.mxu2  ;;  %v440_v22 = vpop.f32.mrf.mxu3  ;;  %v480_v50 = vand.u32 2147483648, %v468_v18  ;;  %v478_v56 = vand.u32 2147483647, %v468_v18  ;;  %vm474_vm15 = vweird.f32 %v468_v18 }
 0x168   :  { %v462_v61 = vor.u32 1.1754944e-38, %v461_v49  ;;  %vm460_vm2 = vcmp.eq.f32.partialorder %v459_v52, 8.507059e+37 }
 0x169   :  { %v481_v0 = vor.u32 1.1754944e-38, %v480_v50  ;;  %vm479_vm3 = vcmp.eq.f32.partialorder %v478_v56, 8.507059e+37  ;;  %v3068_v50 = vld [vmem:[%s5006_s0 + $0x48] sm:$0xff] }
 0x16a   :  { %v3523_v26 = vpop.eup %3522 }
 0x16b   :  { %v488_v29 = vadd.f32 1.0, %v3523_v26 }
 0x16c   :  { %v3525_v35 = vpop.eup %3524 }
 0x16d   :  { %v3527_v37 = vpop.eup %3526  ;;  %v451_v43 = vmul.f32 %v3525_v35, %v449_v13  ;;  %3528 = vrcp.f32 %v488_v29  ;;  %vm456_vm12 = vweird.f32 %v3525_v35  ;;  %vm494_vm5 = vweird.f32 %v488_v29 }
 0x16e   :  { %v470_v31 = vmul.f32 %v3527_v37, %v468_v18  ;;  %3530 = vtanh.f32 %v444_v30  ;;  %vm475_vm13 = vweird.f32 %v3527_v37  ;;  %vm457_vm0 = vmor %vm455_vm14, %vm456_vm12 }
 0x16f   :  { %v452_v47 = vsub.f32 1.0, %v451_v43  ;;  %vm476_vm1 = vmor %vm474_vm15, %vm475_vm13  ;;  %v500_v43 = vand.u32 2147483648, %v488_v29 }
 0x170   :  { %v471_v27 = vsub.f32 1.0, %v470_v31 }
 0x171   :  { %v453_v51 = vmul.f32 %v3525_v35, %v452_v47  ;;  %v501_v47 = vor.u32 1.1754944e-38, %v500_v43 }
 0x172   :  { %v472_v55 = vmul.f32 %v3527_v37, %v471_v27 }
 0x173   :  { %v3529_v59 = vpop.eup %3528  ;;  %v454_v60 = vadd.f32 %v3525_v35, %v453_v51 }
 0x174   :  { %v473_v62 = vadd.f32 %v3527_v37, %v472_v55  ;;  %v490_v63 = vmul.f32 %v3529_v59, %v488_v29  ;;  %v3531_v5 = vpop.eup %3530  ;;  %vm495_vm4 = vweird.f32 %v3529_v59 }
 0x175   :  { %v458_v4 = vsel %vm457_vm0, %v3525_v35, %v454_v60  ;;  %v498_v35 = vand.u32 2147483647, %v488_v29  ;;  %vm496_vm6 = vmor %vm494_vm5, %vm495_vm4  ;;  %v3067_v29 = vld [vmem:[%s5006_s0 + $0x40] sm:$0xff] }
 0x176   :  { %v463_v10 = vsel %vm460_vm2, %v462_v61, %v458_v4  ;;  %v477_v11 = vsel %vm476_vm1, %v3527_v37, %v473_v62  ;;  %v491_v14 = vsub.f32 1.0, %v490_v63  ;;  %v3070_v61 = vld [vmem:[%s5006_s0 + $0x58] sm:$0xff] }
 0x177   :  { %v482_v22 = vsel %vm479_vm3, %v481_v0, %v477_v11  ;;  %v505_v15 = vmul.f32 %v3531_v5, %v463_v10  ;;  %vm499_vm7 = vcmp.eq.f32.partialorder %v498_v35, 8.507059e+37 }
 0x178   :  { %v504_v26 = vmul.f32 %v482_v22, %v4099_v23  ;;  %v492_v30 = vmul.f32 %v3529_v59, %v491_v14 }
 0x17a   :  { %v4151_v13 = vadd.f32 %v505_v15, %v504_v26  ;;  %v493_v18 = vadd.f32 %v3529_v59, %v492_v30 }
 0x17c   :  { %3532 = vtanh.f32 %v4151_v13  ;;  %v497_v31 = vsel %vm496_vm6, %v3529_v59, %v493_v18  ;;  %v3069_v18 = vld [vmem:[%s5006_s0 + $0x50] sm:$0xff] }
 0x17d   :  { %v502_v27 = vsel %vm499_vm7, %v501_v47, %v497_v31 }
 0x182   :  { %v3533_v37 = vpop.eup %3532 }
 0x183   :  { %v4154_v49 = vmul.f32 %v3533_v37, %v502_v27 }
 0x185   :  { %v518_v23 = vpack.c.bf16 %v4154_v49, %v4154_v49 }
 0x187   :  { %527 = vmatmul.bf16.vlgmr.msra.gmra.mxu0 %v518_v23  ;;  %540 = vmatmul.bf16.vlgmr.msra.gmra.mxu1 %v518_v23 }
 0x188   :  { %553 = vmatmul.bf16.vlgmr.msra.gmra.mxu2 %v518_v23  ;;  %566 = vmatmul.bf16.vlgmr.msra.gmra.mxu3 %v518_v23 }
 0x189   :  { %777 = vmatpush.bf16.msra.mxu0 %v3921_v3  ;;  %790 = vmatpush.bf16.msra.mxu1 %v3923_v7 }
 0x18a   :  { %803 = vmatpush.bf16.msra.mxu2 %v3936_v21  ;;  %816 = vmatpush.bf16.msra.mxu3 %v3925_v8 }
 0x18d   :  { %778 = vmatpush.bf16.msra.mxu0 %v3928_v12  ;;  %791 = vmatpush.bf16.msra.mxu1 %v3932_v16 }
 0x18e   :  { %804 = vmatpush.bf16.msra.mxu2 %v3948_v34  ;;  %817 = vmatpush.bf16.msra.mxu3 %v3934_v17 }
 0x191   :  { %779 = vmatpush.bf16.msra.mxu0 %v3940_v28  ;;  %792 = vmatpush.bf16.msra.mxu1 %v3944_v32 }
 0x192   :  { %805 = vmatpush.bf16.msra.mxu2 %v3954_v42  ;;  %818 = vmatpush.bf16.msra.mxu3 %v3946_v33 }
 0x195   :  { %780 = vmatpush.bf16.msra.mxu0 %v3952_v41  ;;  %793 = vmatpush.bf16.msra.mxu1 %v3958_v45 }
 0x196   :  { %806 = vmatpush.bf16.msra.mxu2 %v3966_v54  ;;  %819 = vmatpush.bf16.msra.mxu3 %v3960_v46 }
 0x199   :  { %781 = vmatpush.bf16.msra.mxu0 %v3964_v53  ;;  %794 = vmatpush.bf16.msra.mxu1 %v3970_v57 }
 0x19a   :  { %807 = vmatpush.bf16.msra.mxu2 %v3978_v2  ;;  %820 = vmatpush.bf16.msra.mxu3 %v3972_v58 }
 0x19d   :  { %782 = vmatpush.bf16.msra.mxu0 %v3976_v1  ;;  %795 = vmatpush.bf16.msra.mxu1 %v3982_v6 }
 0x19e   :  { %808 = vmatpush.bf16.msra.mxu2 %v3990_v20  ;;  %821 = vmatpush.bf16.msra.mxu3 %v3984_v9 }
 0x1a1   :  { %783 = vmatpush.bf16.msra.mxu0 %v3988_v19  ;;  %796 = vmatpush.bf16.msra.mxu1 %v3994_v24 }
 0x1a2   :  { %809 = vmatpush.bf16.msra.mxu2 %v4005_v38  ;;  %822 = vmatpush.bf16.msra.mxu3 %v3996_v25 }
 0x1a5   :  { %784 = vmatpush.bf16.msra.mxu0 %v4000_v36  ;;  %797 = vmatpush.bf16.msra.mxu1 %v4009_v39 }
 0x1a6   :  { %810 = vmatpush.bf16.msra.mxu2 %v4017_v48  ;;  %823 = vmatpush.bf16.msra.mxu3 %v4011_v40 }
 0x204   :  { %v528_v51 = vpop.f32.mrf.mxu0  ;;  %v541_v52 = vpop.f32.mrf.mxu1 }
 0x205   :  { %v571_v55 = vadd.f32 %v3067_v29, %v528_v51  ;;  %v572_v56 = vadd.f32 %v3068_v50, %v541_v52 }
 0x207   :  { %v3071_v59 = vmul.f32 -1.442695, %v571_v55  ;;  %v3072_v60 = vmul.f32 -1.442695, %v572_v56 }
 0x209   :  { %3534 = vpow2.f32 %v3071_v59 }
 0x20a   :  { %3536 = vpow2.f32 %v3072_v60 }
 0x20b   :  { %v554_v62 = vpop.f32.mrf.mxu2  ;;  %v567_v63 = vpop.f32.mrf.mxu3 }
 0x20c   :  { %v574_v0 = vadd.f32 %v3070_v61, %v567_v63  ;;  %v530_v4 = vpop.f32.mrf.mxu0  ;;  %v543_v5 = vpop.f32.mrf.mxu1  ;;  %v573_v47 = vadd.f32 %v3069_v18, %v554_v62 }
 0x20e   :  { %v3073_v10 = vmul.f32 -1.442695, %v574_v0 }
 0x20f   :  { %v3535_v11 = vpop.eup %3534 }
 0x210   :  { %v3537_v14 = vpop.eup %3536  ;;  %v578_v22 = vadd.f32 1.0, %v3535_v11  ;;  %3538 = vpow2.f32 %v3073_v10 }
 0x211   :  { %v597_v15 = vadd.f32 1.0, %v3537_v14 }
 0x212   :  { %3540 = vrcp.f32 %v578_v22  ;;  %v590_v51 = vand.u32 2147483648, %v578_v22  ;;  %v588_v56 = vand.u32 2147483647, %v578_v22  ;;  %vm584_vm10 = vweird.f32 %v578_v22 }
 0x213   :  { %3542 = vrcp.f32 %v597_v15  ;;  %v556_v26 = vpop.f32.mrf.mxu2  ;;  %v569_v30 = vpop.f32.mrf.mxu3  ;;  %v609_v52 = vand.u32 2147483648, %v597_v15  ;;  %v607_v60 = vand.u32 2147483647, %v597_v15  ;;  %vm603_vm11 = vweird.f32 %v597_v15 }
 0x214   :  { %v591_v62 = vor.u32 1.1754944e-38, %v590_v51  ;;  %vm589_vm14 = vcmp.eq.f32.partialorder %v588_v56, 8.507059e+37 }
 0x215   :  { %v610_v5 = vor.u32 1.1754944e-38, %v609_v52  ;;  %vm608_vm15 = vcmp.eq.f32.partialorder %v607_v60, 8.507059e+37 }
 0x216   :  { %v3539_v43 = vpop.eup %3538 }
 0x217   :  { %v617_v35 = vadd.f32 1.0, %v3539_v43 }
 0x218   :  { %v3541_v31 = vpop.eup %3540 }
 0x219   :  { %v3543_v37 = vpop.eup %3542  ;;  %v580_v27 = vmul.f32 %v3541_v31, %v578_v22  ;;  %3544 = vrcp.f32 %v617_v35  ;;  %vm585_vm8 = vweird.f32 %v3541_v31  ;;  %vm623_vm1 = vweird.f32 %v617_v35 }
 0x21a   :  { %v599_v23 = vmul.f32 %v3543_v37, %v597_v15  ;;  %3546 = vtanh.f32 %v573_v47  ;;  %vm604_vm9 = vweird.f32 %v3543_v37  ;;  %vm586_vm12 = vmor %vm584_vm10, %vm585_vm8 }
 0x21b   :  { %v581_v29 = vsub.f32 1.0, %v580_v27  ;;  %vm605_vm13 = vmor %vm603_vm11, %vm604_vm9 }
 0x21c   :  { %v600_v50 = vsub.f32 1.0, %v599_v23  ;;  %v629_v23 = vand.u32 2147483648, %v617_v35 }
 0x21d   :  { %v582_v55 = vmul.f32 %v3541_v31, %v581_v29 }
 0x21e   :  { %v601_v59 = vmul.f32 %v3543_v37, %v600_v50  ;;  %v630_v50 = vor.u32 1.1754944e-38, %v629_v23  ;;  %v3076_v23 = vld [vmem:[%s5006_s0 + $0x70] sm:$0xff] }
 0x21f   :  { %v3545_v61 = vpop.eup %3544  ;;  %v583_v63 = vadd.f32 %v3541_v31, %v582_v55  ;;  %v3075_v55 = vld [vmem:[%s5006_s0 + $0x68] sm:$0xff] }
 0x220   :  { %v602_v0 = vadd.f32 %v3543_v37, %v601_v59  ;;  %v619_v4 = vmul.f32 %v3545_v61, %v617_v35  ;;  %v3547_v11 = vpop.eup %3546  ;;  %vm624_vm0 = vweird.f32 %v3545_v61 }
 0x221   :  { %v587_v10 = vsel %vm586_vm12, %v3541_v31, %v583_v63  ;;  %v627_v31 = vand.u32 2147483647, %v617_v35  ;;  %vm625_vm2 = vmor %vm623_vm1, %vm624_vm0  ;;  %v3074_v35 = vld [vmem:[%s5006_s0 + $0x60] sm:$0xff] }
 0x222   :  { %v592_v14 = vsel %vm589_vm14, %v591_v62, %v587_v10  ;;  %v606_v26 = vsel %vm605_vm13, %v3543_v37, %v602_v0  ;;  %v620_v30 = vsub.f32 1.0, %v619_v4  ;;  %v3077_v0 = vld [vmem:[%s5006_s0 + $0x78] sm:$0xff] }
 0x223   :  { %v611_v18 = vsel %vm608_vm15, %v610_v5, %v606_v26  ;;  %v634_v43 = vmul.f32 %v3547_v11, %v592_v14  ;;  %vm628_vm3 = vcmp.eq.f32.partialorder %v627_v31, 8.507059e+37 }
 0x224   :  { %v633_v47 = vmul.f32 %v611_v18, %v4151_v13  ;;  %v621_v27 = vmul.f32 %v3545_v61, %v620_v30 }
 0x226   :  { %v4203_v22 = vadd.f32 %v634_v43, %v633_v47  ;;  %v622_v15 = vadd.f32 %v3545_v61, %v621_v27 }
 0x228   :  { %3548 = vtanh.f32 %v4203_v22  ;;  %v626_v29 = vsel %vm625_vm2, %v3545_v61, %v622_v15 }
 0x229   :  { %v631_v51 = vsel %vm628_vm3, %v630_v50, %v626_v29 }
 0x22e   :  { %v3549_v37 = vpop.eup %3548 }
 0x22f   :  { %v4206_v52 = vmul.f32 %v3549_v37, %v631_v51 }
 0x231   :  { %v647_v13 = vpack.c.bf16 %v4206_v52, %v4206_v52 }
 0x233   :  { %656 = vmatmul.bf16.vlgmr.msrb.gmra.mxu0 %v647_v13  ;;  %669 = vmatmul.bf16.vlgmr.msrb.gmra.mxu1 %v647_v13 }
 0x234   :  { %682 = vmatmul.bf16.vlgmr.msrb.gmra.mxu2 %v647_v13  ;;  %695 = vmatmul.bf16.vlgmr.msrb.gmra.mxu3 %v647_v13 }
 0x235   :  { %906 = vmatpush.bf16.msrb.mxu0 %v3921_v3  ;;  %919 = vmatpush.bf16.msrb.mxu1 %v3923_v7 }
 0x236   :  { %932 = vmatpush.bf16.msrb.mxu2 %v3936_v21  ;;  %945 = vmatpush.bf16.msrb.mxu3 %v3925_v8 }
 0x239   :  { %907 = vmatpush.bf16.msrb.mxu0 %v3928_v12  ;;  %920 = vmatpush.bf16.msrb.mxu1 %v3932_v16 }
 0x23a   :  { %933 = vmatpush.bf16.msrb.mxu2 %v3948_v34  ;;  %946 = vmatpush.bf16.msrb.mxu3 %v3934_v17 }
 0x23d   :  { %908 = vmatpush.bf16.msrb.mxu0 %v3940_v28  ;;  %921 = vmatpush.bf16.msrb.mxu1 %v3944_v32 }
 0x23e   :  { %934 = vmatpush.bf16.msrb.mxu2 %v3954_v42  ;;  %947 = vmatpush.bf16.msrb.mxu3 %v3946_v33 }
 0x241   :  { %909 = vmatpush.bf16.msrb.mxu0 %v3952_v41  ;;  %922 = vmatpush.bf16.msrb.mxu1 %v3958_v45 }
 0x242   :  { %935 = vmatpush.bf16.msrb.mxu2 %v3966_v54  ;;  %948 = vmatpush.bf16.msrb.mxu3 %v3960_v46 }
 0x245   :  { %910 = vmatpush.bf16.msrb.mxu0 %v3964_v53  ;;  %923 = vmatpush.bf16.msrb.mxu1 %v3970_v57 }
 0x246   :  { %936 = vmatpush.bf16.msrb.mxu2 %v3978_v2  ;;  %949 = vmatpush.bf16.msrb.mxu3 %v3972_v58 }
 0x249   :  { %911 = vmatpush.bf16.msrb.mxu0 %v3976_v1  ;;  %924 = vmatpush.bf16.msrb.mxu1 %v3982_v6 }
 0x24a   :  { %937 = vmatpush.bf16.msrb.mxu2 %v3990_v20  ;;  %950 = vmatpush.bf16.msrb.mxu3 %v3984_v9 }
 0x24d   :  { %912 = vmatpush.bf16.msrb.mxu0 %v3988_v19  ;;  %925 = vmatpush.bf16.msrb.mxu1 %v3994_v24 }
 0x24e   :  { %938 = vmatpush.bf16.msrb.mxu2 %v4005_v38  ;;  %951 = vmatpush.bf16.msrb.mxu3 %v3996_v25 }
 0x251   :  { %913 = vmatpush.bf16.msrb.mxu0 %v4000_v36  ;;  %926 = vmatpush.bf16.msrb.mxu1 %v4009_v39 }
 0x252   :  { %939 = vmatpush.bf16.msrb.mxu2 %v4017_v48  ;;  %952 = vmatpush.bf16.msrb.mxu3 %v4011_v40 }
 0x2b0   :  { %v657_v56 = vpop.f32.mrf.mxu0  ;;  %v670_v59 = vpop.f32.mrf.mxu1 }
 0x2b1   :  { %v700_v60 = vadd.f32 %v3074_v35, %v657_v56  ;;  %v701_v61 = vadd.f32 %v3075_v55, %v670_v59 }
 0x2b3   :  { %v3078_v63 = vmul.f32 -1.442695, %v700_v60  ;;  %v3079_v62 = vmul.f32 -1.442695, %v701_v61 }
 0x2b5   :  { %3550 = vpow2.f32 %v3078_v63 }
 0x2b6   :  { %3552 = vpow2.f32 %v3079_v62 }
 0x2b7   :  { %v683_v4 = vpop.f32.mrf.mxu2  ;;  %v696_v5 = vpop.f32.mrf.mxu3 }
 0x2b8   :  { %v703_v10 = vadd.f32 %v3077_v0, %v696_v5  ;;  %v659_v11 = vpop.f32.mrf.mxu0  ;;  %v672_v14 = vpop.f32.mrf.mxu1  ;;  %v702_v37 = vadd.f32 %v3076_v23, %v683_v4 }
 0x2ba   :  { %v3080_v26 = vmul.f32 -1.442695, %v703_v10 }
 0x2bb   :  { %v3551_v30 = vpop.eup %3550 }
 0x2bc   :  { %v3553_v18 = vpop.eup %3552  ;;  %v707_v43 = vadd.f32 1.0, %v3551_v30  ;;  %3554 = vpow2.f32 %v3080_v26 }
 0x2bd   :  { %v726_v47 = vadd.f32 1.0, %v3553_v18 }
 0x2be   :  { %3556 = vrcp.f32 %v707_v43  ;;  %v719_v59 = vand.u32 2147483648, %v707_v43  ;;  %v717_v63 = vand.u32 2147483647, %v707_v43  ;;  %vm713_vm6 = vweird.f32 %v707_v43 }
 0x2bf   :  { %3558 = vrcp.f32 %v726_v47  ;;  %v685_v27 = vpop.f32.mrf.mxu2  ;;  %v698_v15 = vpop.f32.mrf.mxu3  ;;  %v738_v60 = vand.u32 2147483648, %v726_v47  ;;  %v736_v0 = vand.u32 2147483647, %v726_v47  ;;  %vm732_vm7 = vweird.f32 %v726_v47 }
 0x2c0   :  { %v720_v4 = vor.u32 1.1754944e-38, %v719_v59  ;;  %vm718_vm10 = vcmp.eq.f32.partialorder %v717_v63, 8.507059e+37  ;;  %v3082_v63 = vld [vmem:[%s5006_s0 + $0x88] sm:$0xff] }
 0x2c1   :  { %v739_v26 = vor.u32 1.1754944e-38, %v738_v60  ;;  %vm737_vm11 = vcmp.eq.f32.partialorder %v736_v0, 8.507059e+37 }
 0x2c2   :  { %v3555_v31 = vpop.eup %3554 }
 0x2c3   :  { %v746_v29 = vadd.f32 1.0, %v3555_v31 }
 0x2c4   :  { %v3557_v50 = vpop.eup %3556 }
 0x2c5   :  { %v3559_v51 = vpop.eup %3558  ;;  %v709_v13 = vmul.f32 %v3557_v50, %v707_v43  ;;  %3560 = vrcp.f32 %v746_v29  ;;  %vm714_vm4 = vweird.f32 %v3557_v50  ;;  %vm752_vm13 = vweird.f32 %v746_v29 }
 0x2c6   :  { %v728_v35 = vmul.f32 %v3559_v51, %v726_v47  ;;  %3562 = vtanh.f32 %v702_v37  ;;  %vm733_vm5 = vweird.f32 %v3559_v51  ;;  %vm715_vm8 = vmor %vm713_vm6, %vm714_vm4 }
 0x2c7   :  { %v710_v55 = vsub.f32 1.0, %v709_v13  ;;  %vm734_vm9 = vmor %vm732_vm7, %vm733_vm5 }
 0x2c8   :  { %v729_v56 = vsub.f32 1.0, %v728_v35 }
 0x2c9   :  { %v711_v61 = vmul.f32 %v3557_v50, %v710_v55  ;;  %v758_v55 = vand.u32 2147483648, %v746_v29 }
 0x2ca   :  { %v730_v62 = vmul.f32 %v3559_v51, %v729_v56 }
 0x2cb   :  { %v3561_v5 = vpop.eup %3560  ;;  %v712_v10 = vadd.f32 %v3557_v50, %v711_v61  ;;  %v759_v59 = vor.u32 1.1754944e-38, %v758_v55 }
 0x2cc   :  { %v731_v11 = vadd.f32 %v3559_v51, %v730_v62  ;;  %v748_v14 = vmul.f32 %v3561_v5, %v746_v29  ;;  %v3563_v18 = vpop.eup %3562  ;;  %vm753_vm12 = vweird.f32 %v3561_v5 }
 0x2cd   :  { %v716_v30 = vsel %vm715_vm8, %v3557_v50, %v712_v10  ;;  %v756_v50 = vand.u32 2147483647, %v746_v29  ;;  %vm754_vm14 = vmor %vm752_vm13, %vm753_vm12  ;;  %v3081_v29 = vld [vmem:[%s5006_s0 + $0x80] sm:$0xff] }
 0x2ce   :  { %v721_v27 = vsel %vm718_vm10, %v720_v4, %v716_v30  ;;  %v735_v15 = vsel %vm734_vm9, %v3559_v51, %v731_v11  ;;  %v749_v23 = vsub.f32 1.0, %v748_v14  ;;  %v3084_v14 = vld [vmem:[%s5006_s0 + $0x98] sm:$0xff] }
 0x2cf   :  { %v740_v31 = vsel %vm737_vm11, %v739_v26, %v735_v15  ;;  %v763_v37 = vmul.f32 %v3563_v18, %v721_v27  ;;  %vm757_vm15 = vcmp.eq.f32.partialorder %v756_v50, 8.507059e+37  ;;  %v3083_v50 = vld [vmem:[%s5006_s0 + $0x90] sm:$0xff] }
 0x2d0   :  { %v762_v13 = vmul.f32 %v740_v31, %v4203_v22  ;;  %v750_v35 = vmul.f32 %v3561_v5, %v749_v23 }
 0x2d2   :  { %v4255_v43 = vadd.f32 %v763_v37, %v762_v13  ;;  %v751_v47 = vadd.f32 %v3561_v5, %v750_v35 }
 0x2d4   :  { %3564 = vtanh.f32 %v4255_v43  ;;  %v755_v56 = vsel %vm754_vm14, %v3561_v5, %v751_v47 }
 0x2d5   :  { %v760_v60 = vsel %vm757_vm15, %v759_v59, %v755_v56 }
 0x2da   :  { %v3565_v51 = vpop.eup %3564 }
 0x2db   :  { %v4258_v61 = vmul.f32 %v3565_v51, %v760_v60 }
 0x2dd   :  { %v776_v22 = vpack.c.bf16 %v4258_v61, %v4258_v61 }
 0x2df   :  { %785 = vmatmul.bf16.vlgmr.msra.gmra.mxu0 %v776_v22  ;;  %798 = vmatmul.bf16.vlgmr.msra.gmra.mxu1 %v776_v22 }
 0x2e0   :  { %811 = vmatmul.bf16.vlgmr.msra.gmra.mxu2 %v776_v22  ;;  %824 = vmatmul.bf16.vlgmr.msra.gmra.mxu3 %v776_v22 }
 0x2e1   :  { %1035 = vmatpush.bf16.msra.mxu0 %v3921_v3  ;;  %1048 = vmatpush.bf16.msra.mxu1 %v3923_v7 }
 0x2e2   :  { %1061 = vmatpush.bf16.msra.mxu2 %v3936_v21  ;;  %1074 = vmatpush.bf16.msra.mxu3 %v3925_v8 }
 0x2e5   :  { %1036 = vmatpush.bf16.msra.mxu0 %v3928_v12  ;;  %1049 = vmatpush.bf16.msra.mxu1 %v3932_v16 }
 0x2e6   :  { %1062 = vmatpush.bf16.msra.mxu2 %v3948_v34  ;;  %1075 = vmatpush.bf16.msra.mxu3 %v3934_v17 }
 0x2e9   :  { %1037 = vmatpush.bf16.msra.mxu0 %v3940_v28  ;;  %1050 = vmatpush.bf16.msra.mxu1 %v3944_v32 }
 0x2ea   :  { %1063 = vmatpush.bf16.msra.mxu2 %v3954_v42  ;;  %1076 = vmatpush.bf16.msra.mxu3 %v3946_v33 }
 0x2ed   :  { %1038 = vmatpush.bf16.msra.mxu0 %v3952_v41  ;;  %1051 = vmatpush.bf16.msra.mxu1 %v3958_v45 }
 0x2ee   :  { %1064 = vmatpush.bf16.msra.mxu2 %v3966_v54  ;;  %1077 = vmatpush.bf16.msra.mxu3 %v3960_v46 }
 0x2f1   :  { %1039 = vmatpush.bf16.msra.mxu0 %v3964_v53  ;;  %1052 = vmatpush.bf16.msra.mxu1 %v3970_v57 }
 0x2f2   :  { %1065 = vmatpush.bf16.msra.mxu2 %v3978_v2  ;;  %1078 = vmatpush.bf16.msra.mxu3 %v3972_v58 }
 0x2f5   :  { %1040 = vmatpush.bf16.msra.mxu0 %v3976_v1  ;;  %1053 = vmatpush.bf16.msra.mxu1 %v3982_v6 }
 0x2f6   :  { %1066 = vmatpush.bf16.msra.mxu2 %v3990_v20  ;;  %1079 = vmatpush.bf16.msra.mxu3 %v3984_v9 }
 0x2f9   :  { %1041 = vmatpush.bf16.msra.mxu0 %v3988_v19  ;;  %1054 = vmatpush.bf16.msra.mxu1 %v3994_v24 }
 0x2fa   :  { %1067 = vmatpush.bf16.msra.mxu2 %v4005_v38  ;;  %1080 = vmatpush.bf16.msra.mxu3 %v3996_v25 }
 0x2fd   :  { %1042 = vmatpush.bf16.msra.mxu0 %v4000_v36  ;;  %1055 = vmatpush.bf16.msra.mxu1 %v4009_v39 }
 0x2fe   :  { %1068 = vmatpush.bf16.msra.mxu2 %v4017_v48  ;;  %1081 = vmatpush.bf16.msra.mxu3 %v4011_v40 }
 0x35c   :  { %v786_v62 = vpop.f32.mrf.mxu0  ;;  %v799_v0 = vpop.f32.mrf.mxu1 }
 0x35d   :  { %v829_v5 = vadd.f32 %v3081_v29, %v786_v62  ;;  %v830_v10 = vadd.f32 %v3082_v63, %v799_v0 }
 0x35f   :  { %v3085_v4 = vmul.f32 -1.442695, %v829_v5  ;;  %v3086_v11 = vmul.f32 -1.442695, %v830_v10 }
 0x361   :  { %3566 = vpow2.f32 %v3085_v4 }
 0x362   :  { %3568 = vpow2.f32 %v3086_v11 }
 0x363   :  { %v812_v26 = vpop.f32.mrf.mxu2  ;;  %v825_v30 = vpop.f32.mrf.mxu3 }
 0x364   :  { %v832_v18 = vadd.f32 %v3084_v14, %v825_v30  ;;  %v788_v27 = vpop.f32.mrf.mxu0  ;;  %v801_v15 = vpop.f32.mrf.mxu1  ;;  %v831_v60 = vadd.f32 %v3083_v50, %v812_v26 }
 0x366   :  { %v3087_v23 = vmul.f32 -1.442695, %v832_v18 }
 0x367   :  { %v3567_v31 = vpop.eup %3566 }
 0x368   :  { %v3569_v37 = vpop.eup %3568  ;;  %v836_v13 = vadd.f32 1.0, %v3567_v31  ;;  %3570 = vpow2.f32 %v3087_v23 }
 0x369   :  { %v855_v35 = vadd.f32 1.0, %v3569_v37 }
 0x36a   :  { %3572 = vrcp.f32 %v836_v13  ;;  %v848_v5 = vand.u32 2147483648, %v836_v13  ;;  %v846_v11 = vand.u32 2147483647, %v836_v13  ;;  %vm842_vm2 = vweird.f32 %v836_v13 }
 0x36b   :  { %3574 = vrcp.f32 %v855_v35  ;;  %v814_v47 = vpop.f32.mrf.mxu2  ;;  %v827_v55 = vpop.f32.mrf.mxu3  ;;  %v867_v10 = vand.u32 2147483648, %v855_v35  ;;  %v865_v30 = vand.u32 2147483647, %v855_v35  ;;  %vm861_vm3 = vweird.f32 %v855_v35 }
 0x36c   :  { %v849_v26 = vor.u32 1.1754944e-38, %v848_v5  ;;  %vm847_vm6 = vcmp.eq.f32.partialorder %v846_v11, 8.507059e+37 }
 0x36d   :  { %v868_v31 = vor.u32 1.1754944e-38, %v867_v10  ;;  %vm866_vm7 = vcmp.eq.f32.partialorder %v865_v30, 8.507059e+37 }
 0x36e   :  { %v3571_v56 = vpop.eup %3570 }
 0x36f   :  { %v875_v59 = vadd.f32 1.0, %v3571_v56 }
 0x370   :  { %v3573_v51 = vpop.eup %3572 }
 0x371   :  { %v3575_v22 = vpop.eup %3574  ;;  %v838_v29 = vmul.f32 %v3573_v51, %v836_v13  ;;  %3576 = vrcp.f32 %v875_v59  ;;  %vm843_vm0 = vweird.f32 %v3573_v51  ;;  %vm881_vm9 = vweird.f32 %v875_v59 }
 0x372   :  { %v857_v63 = vmul.f32 %v3575_v22, %v855_v35  ;;  %3578 = vtanh.f32 %v831_v60  ;;  %vm862_vm1 = vweird.f32 %v3575_v22  ;;  %vm844_vm4 = vmor %vm842_vm2, %vm843_vm0 }
 0x373   :  { %v839_v62 = vsub.f32 1.0, %v838_v29  ;;  %vm863_vm5 = vmor %vm861_vm3, %vm862_vm1 }
 0x374   :  { %v858_v0 = vsub.f32 1.0, %v857_v63 }
 0x375   :  { %v840_v4 = vmul.f32 %v3573_v51, %v839_v62 }
 0x376   :  { %v859_v14 = vmul.f32 %v3575_v22, %v858_v0  ;;  %v887_v0 = vand.u32 2147483648, %v875_v59 }
 0x377   :  { %v3577_v18 = vpop.eup %3576  ;;  %v841_v27 = vadd.f32 %v3573_v51, %v840_v4 }
 0x378   :  { %v860_v15 = vadd.f32 %v3575_v22, %v859_v14  ;;  %v877_v23 = vmul.f32 %v3577_v18, %v875_v59  ;;  %v3579_v47 = vpop.eup %3578  ;;  %vm882_vm8 = vweird.f32 %v3577_v18  ;;  %v888_v10 = vor.u32 1.1754944e-38, %v887_v0 }
 0x379   :  { %v845_v37 = vsel %vm844_vm4, %v3573_v51, %v841_v27  ;;  %v885_v51 = vand.u32 2147483647, %v875_v59  ;;  %vm883_vm10 = vmor %vm881_vm9, %vm882_vm8 }
 0x37a   :  { %v850_v55 = vsel %vm847_vm6, %v849_v26, %v845_v37  ;;  %v864_v50 = vsel %vm863_vm5, %v3575_v22, %v860_v15  ;;  %v878_v56 = vsub.f32 1.0, %v877_v23 }
 0x37b   :  { %v869_v60 = vsel %vm866_vm7, %v868_v31, %v864_v50  ;;  %v892_v29 = vmul.f32 %v3579_v47, %v850_v55  ;;  %vm886_vm11 = vcmp.eq.f32.partialorder %v885_v51, 8.507059e+37 }
 0x37c   :  { %v891_v63 = vmul.f32 %v869_v60, %v4255_v43  ;;  %v879_v62 = vmul.f32 %v3577_v18, %v878_v56 }
 0x37e   :  { %v4307_v13 = vadd.f32 %v892_v29, %v891_v63  ;;  %v880_v35 = vadd.f32 %v3577_v18, %v879_v62 }
 0x380   :  { %3580 = vtanh.f32 %v4307_v13  ;;  %v884_v5 = vsel %vm883_vm10, %v3577_v18, %v880_v35 }
 0x381   :  { %v889_v4 = vsel %vm886_vm11, %v888_v10, %v884_v5 }
 0x386   :  { %v3581_v22 = vpop.eup %3580 }
 0x387   :  { %v4310_v11 = vmul.f32 %v3581_v22, %v889_v4 }
 0x389   :  { %v905_v43 = vpack.c.bf16 %v4310_v11, %v4310_v11 }
 0x38b   :  { %914 = vmatmul.bf16.vlgmr.msrb.gmra.mxu0 %v905_v43  ;;  %927 = vmatmul.bf16.vlgmr.msrb.gmra.mxu1 %v905_v43 }
 0x38c   :  { %940 = vmatmul.bf16.vlgmr.msrb.gmra.mxu2 %v905_v43  ;;  %953 = vmatmul.bf16.vlgmr.msrb.gmra.mxu3 %v905_v43 }
 0x38d   :  { %1164 = vmatpush.bf16.msrb.mxu0 %v3921_v3  ;;  %1177 = vmatpush.bf16.msrb.mxu1 %v3923_v7  ;;  %v3088_v3 = vld [vmem:[%s5006_s0 + $0xa0] sm:$0xff]  ;;  %v3089_v7 = vld [vmem:[%s5006_s0 + $0xa8] sm:$0xff] }
 0x38e   :  { %1190 = vmatpush.bf16.msrb.mxu2 %v3936_v21  ;;  %1203 = vmatpush.bf16.msrb.mxu3 %v3925_v8 }
 0x391   :  { %1165 = vmatpush.bf16.msrb.mxu0 %v3928_v12  ;;  %1178 = vmatpush.bf16.msrb.mxu1 %v3932_v16 }
 0x392   :  { %1191 = vmatpush.bf16.msrb.mxu2 %v3948_v34  ;;  %1204 = vmatpush.bf16.msrb.mxu3 %v3934_v17 }
 0x395   :  { %1166 = vmatpush.bf16.msrb.mxu0 %v3940_v28  ;;  %1179 = vmatpush.bf16.msrb.mxu1 %v3944_v32  ;;  %v3091_v32 = vld [vmem:[%s5006_s0 + $0xb8] sm:$0xff] }
 0x396   :  { %1192 = vmatpush.bf16.msrb.mxu2 %v3954_v42  ;;  %1205 = vmatpush.bf16.msrb.mxu3 %v3946_v33 }
 0x399   :  { %1167 = vmatpush.bf16.msrb.mxu0 %v3952_v41  ;;  %1180 = vmatpush.bf16.msrb.mxu1 %v3958_v45 }
 0x39a   :  { %1193 = vmatpush.bf16.msrb.mxu2 %v3966_v54  ;;  %1206 = vmatpush.bf16.msrb.mxu3 %v3960_v46 }
 0x39d   :  { %1168 = vmatpush.bf16.msrb.mxu0 %v3964_v53  ;;  %1181 = vmatpush.bf16.msrb.mxu1 %v3970_v57 }
 0x39e   :  { %1194 = vmatpush.bf16.msrb.mxu2 %v3978_v2  ;;  %1207 = vmatpush.bf16.msrb.mxu3 %v3972_v58 }
 0x3a1   :  { %1169 = vmatpush.bf16.msrb.mxu0 %v3976_v1  ;;  %1182 = vmatpush.bf16.msrb.mxu1 %v3982_v6  ;;  %v3090_v6 = vld [vmem:[%s5006_s0 + $0xb0] sm:$0xff] }
 0x3a2   :  { %1195 = vmatpush.bf16.msrb.mxu2 %v3990_v20  ;;  %1208 = vmatpush.bf16.msrb.mxu3 %v3984_v9 }
 0x3a5   :  { %1170 = vmatpush.bf16.msrb.mxu0 %v3988_v19  ;;  %1183 = vmatpush.bf16.msrb.mxu1 %v3994_v24 }
 0x3a6   :  { %1196 = vmatpush.bf16.msrb.mxu2 %v4005_v38  ;;  %1209 = vmatpush.bf16.msrb.mxu3 %v3996_v25 }
 0x3a9   :  { %1171 = vmatpush.bf16.msrb.mxu0 %v4000_v36  ;;  %1184 = vmatpush.bf16.msrb.mxu1 %v4009_v39 }
 0x3aa   :  { %1197 = vmatpush.bf16.msrb.mxu2 %v4017_v48  ;;  %1210 = vmatpush.bf16.msrb.mxu3 %v4011_v40 }
 0x408   :  { %v915_v8 = vpop.f32.mrf.mxu0  ;;  %v928_v12 = vpop.f32.mrf.mxu1 }
 0x409   :  { %v958_v16 = vadd.f32 %v3088_v3, %v915_v8  ;;  %v959_v17 = vadd.f32 %v3089_v7, %v928_v12  ;;  %v3095_v12 = vld [vmem:[%s5006_s0 + $0xc0] sm:$0xff] }
 0x40b   :  { %v3092_v21 = vmul.f32 -1.442695, %v958_v16  ;;  %v3093_v28 = vmul.f32 -1.442695, %v959_v17  ;;  %v3096_v16 = vld [vmem:[%s5006_s0 + $0xc8] sm:$0xff] }
 0x40c   :  { %v3223_v17 = vld [vmem:[#allocation7 + $0xe0] sm:$0xf] }
 0x40d   :  { %3582 = vpow2.f32 %v3092_v21  ;;  %v3460_v21 = vld [vmem:[#allocation7 + $0xec] sm:$0xf0] }
 0x40e   :  { %3584 = vpow2.f32 %v3093_v28  ;;  %v3458_v28 = vld [vmem:[#allocation7 + $0xe4] sm:$0xf] }
 0x40f   :  { %v941_v33 = vpop.f32.mrf.mxu2  ;;  %v954_v34 = vpop.f32.mrf.mxu3 }
 0x410   :  { %v961_v41 = vadd.f32 %v3091_v32, %v954_v34  ;;  %v917_v42 = vpop.f32.mrf.mxu0  ;;  %v930_v45 = vpop.f32.mrf.mxu1  ;;  %v960_v24 = vadd.f32 %v3090_v6, %v941_v33  ;;  %v3224_v32 = vor.u32 %v3460_v21, %v3223_v17  ;;  %v3225_v33 = vld [vmem:[#allocation7 + $0xf0] sm:$0xf0]  ;;  %v3231_v34 = vld [vmem:[#allocation7 + $0xe8] sm:$0xf]  ;;  %v3207_v6 = vld [vmem:[#allocation7 + $0xc0] sm:$0xf] }
 0x411   :  { %v3228_v42 = vor.u32 %v3458_v28, %v3225_v33  ;;  %v3447_v17 = vld [vmem:[#allocation7 + $0x8c] sm:$0xf]  ;;  %v3185_v21 = vld [vmem:[#allocation7 + $0x98] sm:$0xf0] }
 0x412   :  { %v3094_v46 = vmul.f32 -1.442695, %v961_v41  ;;  %v3461_v41 = vld [vmem:[#allocation7 + $0xf4] sm:$0xf0]  ;;  %v3188_v33 = vor.u32 %v3447_v17, %v3185_v21  ;;  %v3435_v21 = vld [vmem:[#allocation7 + $0x2c] sm:$0xf] }
 0x413   :  { %v3583_v53 = vpop.eup %3582  ;;  %v3232_v45 = vor.u32 %v3461_v41, %v3231_v34  ;;  %v3437_v17 = vld [vmem:[#allocation7 + $0x34] sm:$0xf0] }
 0x414   :  { %v3585_v54 = vpop.eup %3584  ;;  %v965_v57 = vadd.f32 1.0, %v3583_v53  ;;  %3586 = vpow2.f32 %v3094_v46  ;;  %v3459_v46 = vld [vmem:[#allocation7 + $0xec] sm:$0xf]  ;;  %v3233_v53 = vld [vmem:[#allocation7 + $0xf8] sm:$0xf0] }
 0x415   :  { %v984_v58 = vadd.f32 1.0, %v3585_v54 }
 0x416   :  { %3588 = vrcp.f32 %v965_v57  ;;  %v977_v48 = vand.u32 2147483648, %v965_v57  ;;  %v975_v30 = vand.u32 2147483647, %v965_v57  ;;  %vm971_vm14 = vweird.f32 %v965_v57 }
 0x417   :  { %3590 = vrcp.f32 %v984_v58  ;;  %v943_v1 = vpop.f32.mrf.mxu2  ;;  %v956_v2 = vpop.f32.mrf.mxu3  ;;  %v996_v59 = vand.u32 2147483648, %v984_v58  ;;  %v994_v27 = vand.u32 2147483647, %v984_v58  ;;  %vm990_vm15 = vweird.f32 %v984_v58 }
 0x418   :  { %v978_v23 = vor.u32 1.1754944e-38, %v977_v48  ;;  %vm976_vm2 = vcmp.eq.f32.partialorder %v975_v30, 8.507059e+37  ;;  %v3217_v30 = vld [vmem:[#allocation7 + $0xd8] sm:$0xf0] }
 0x419   :  { %v997_v47 = vor.u32 1.1754944e-38, %v996_v59  ;;  %vm995_vm3 = vcmp.eq.f32.partialorder %v994_v27, 8.507059e+37  ;;  %v3452_v27 = vld [vmem:[#allocation7 + $0xac] sm:$0xf0] }
 0x41a   :  { %v3587_v9 = vpop.eup %3586 }
 0x41b   :  { %v1004_v19 = vadd.f32 1.0, %v3587_v9  ;;  %v3456_v9 = vld [vmem:[#allocation7 + $0xcc] sm:$0xf0] }
 0x41c   :  { %v3589_v20 = vpop.eup %3588 }
 0x41d   :  { %v3591_v25 = vpop.eup %3590  ;;  %v967_v36 = vmul.f32 %v3589_v20, %v965_v57  ;;  %3592 = vrcp.f32 %v1004_v19  ;;  %vm972_vm12 = vweird.f32 %v3589_v20  ;;  %v1016_v10 = vand.u32 2147483648, %v1004_v19 }
 0x41e   :  { %v986_v38 = vmul.f32 %v3591_v25, %v984_v58  ;;  %3594 = vtanh.f32 %v960_v24  ;;  %vm991_vm13 = vweird.f32 %v3591_v25  ;;  %vm973_vm0 = vmor %vm971_vm14, %vm972_vm12  ;;  %vm1010_vm5 = vweird.f32 %v1004_v19  ;;  %v3209_v24 = vld [vmem:[#allocation7 + $0xd0] sm:$0xf0] }
 0x41f   :  { %v968_v39 = vsub.f32 1.0, %v967_v36  ;;  %vm992_vm1 = vmor %vm990_vm15, %vm991_vm13  ;;  %v1014_v22 = vand.u32 2147483647, %v1004_v19  ;;  %v1017_v43 = vor.u32 1.1754944e-38, %v1016_v10  ;;  %v3236_v58 = vor.u32 %v3459_v46, %v3233_v53  ;;  %v3457_v36 = vld [vmem:[#allocation7 + $0xd4] sm:$0xf0] }
 0x420   :  { %v987_v40 = vsub.f32 1.0, %v986_v38  ;;  %v3097_v46 = vld [vmem:[%s5006_s0 + $0xd0] sm:$0xff] }
 0x421   :  { %v969_v14 = vmul.f32 %v3589_v20, %v968_v39  ;;  %vm1015_vm7 = vcmp.eq.f32.partialorder %v1014_v22, 8.507059e+37 }
 0x422   :  { %v988_v18 = vmul.f32 %v3591_v25, %v987_v40  ;;  %v3098_v40 = vld [vmem:[%s5006_s0 + $0xd8] sm:$0xff] }
 0x423   :  { %v3593_v26 = vpop.eup %3592  ;;  %v970_v15 = vadd.f32 %v3589_v20, %v969_v14  ;;  %v3455_v14 = vld [vmem:[#allocation7 + $0xcc] sm:$0xf] }
 0x424   :  { %v989_v31 = vadd.f32 %v3591_v25, %v988_v18  ;;  %v1006_v37 = vmul.f32 %v3593_v26, %v1004_v19  ;;  %v3595_v50 = vpop.eup %3594  ;;  %vm1011_vm4 = vweird.f32 %v3593_v26  ;;  %v3454_v19 = vld [vmem:[#allocation7 + $0xc4] sm:$0xf]  ;;  %v3191_v18 = vld [vmem:[#allocation7 + $0xa0] sm:$0xf] }
 0x425   :  { %v974_v55 = vsel %vm973_vm0, %v3589_v20, %v970_v15  ;;  %vm1012_vm6 = vmor %vm1010_vm5, %vm1011_vm4  ;;  %v3208_v20 = vor.u32 %v3456_v9, %v3207_v6  ;;  %v3212_v48 = vor.u32 %v3454_v19, %v3209_v24  ;;  %v3192_v15 = vor.u32 %v3452_v27, %v3191_v18  ;;  %v3167_v19 = vld [vmem:[#allocation7 + $0x68] sm:$0xf] }
 0x426   :  { %v979_v56 = vsel %vm976_vm2, %v978_v23, %v974_v55  ;;  %v993_v60 = vsel %vm992_vm1, %v3591_v25, %v989_v31  ;;  %v1007_v29 = vsub.f32 1.0, %v1006_v37  ;;  %v3215_v25 = vld [vmem:[#allocation7 + $0xc8] sm:$0xf]  ;;  %v3450_v23 = vld [vmem:[#allocation7 + $0xa4] sm:$0xf] }
 0x427   :  { %v998_v63 = vsel %vm995_vm3, %v997_v47, %v993_v60  ;;  %v1021_v62 = vmul.f32 %v3595_v50, %v979_v56  ;;  %v3216_v59 = vor.u32 %v3457_v36, %v3215_v25  ;;  %v3193_v31 = vld [vmem:[#allocation7 + $0xb0] sm:$0xf0]  ;;  %v3199_v37 = vld [vmem:[#allocation7 + $0xa8] sm:$0xf]  ;;  %v3453_v55 = vld [vmem:[#allocation7 + $0xb4] sm:$0xf0] }
 0x428   :  { %v1020_v35 = vmul.f32 %v998_v63, %v4307_v13  ;;  %v1008_v0 = vmul.f32 %v3593_v26, %v1007_v29  ;;  %v3196_v47 = vor.u32 %v3450_v23, %v3193_v31  ;;  %v3451_v50 = vld [vmem:[#allocation7 + $0xac] sm:$0xf]  ;;  %v3201_v56 = vld [vmem:[#allocation7 + $0xb8] sm:$0xf0]  ;;  %v3200_v63 = vor.u32 %v3453_v55, %v3199_v37  ;;  %v3441_v23 = vld [vmem:[#allocation7 + $0x54] sm:$0xf0] }
 0x429   :  { %v3153_v55 = vld [vmem:[#allocation7 + $0x58] sm:$0xf0] }
 0x42a   :  { %v4359_v51 = vadd.f32 %v1021_v62, %v1020_v35  ;;  %v1009_v5 = vadd.f32 %v3593_v26, %v1008_v0  ;;  %v3204_v62 = vor.u32 %v3451_v50, %v3201_v56  ;;  %v3175_v35 = vld [vmem:[#allocation7 + $0x80] sm:$0xf]  ;;  %v3448_v0 = vld [vmem:[#allocation7 + $0x8c] sm:$0xf0] }
 0x42b   :  { %v3127_v50 = vld [vmem:[#allocation7 + $0x20] sm:$0xf] }
 0x42c   :  { %3596 = vtanh.f32 %v4359_v51  ;;  %v1013_v4 = vsel %vm1012_vm6, %v3593_v26, %v1009_v5  ;;  %v3220_v26 = vor.u32 %v3455_v14, %v3217_v30  ;;  %v3446_v5 = vld [vmem:[#allocation7 + $0x84] sm:$0xf]  ;;  %v3440_v14 = vld [vmem:[#allocation7 + $0x4c] sm:$0xf0] }
 0x42d   :  { %v1018_v7 = vsel %vm1015_vm7, %v1017_v43, %v1013_v4  ;;  %v3176_v43 = vor.u32 %v3448_v0, %v3175_v35  ;;  %v3438_v30 = vld [vmem:[#allocation7 + $0x44] sm:$0xf] }
 0x432   :  { %v3597_v3 = vpop.eup %3596 }
 0x433   :  { %v4362_v8 = vmul.f32 %v3597_v3, %v1018_v7  ;;  %v3177_v3 = vld [vmem:[#allocation7 + $0x90] sm:$0xf0]  ;;  %v3183_v7 = vld [vmem:[#allocation7 + $0x88] sm:$0xf] }
 0x435   :  { %v1034_v13 = vpack.c.bf16 %v4362_v8, %v4362_v8 }
 0x437   :  { %1043 = vmatmul.bf16.vlgmr.msra.gmra.mxu0 %v1034_v13  ;;  %1056 = vmatmul.bf16.vlgmr.msra.gmra.mxu1 %v1034_v13 }
 0x438   :  { %1069 = vmatmul.bf16.vlgmr.msra.gmra.mxu2 %v1034_v13  ;;  %1082 = vmatmul.bf16.vlgmr.msra.gmra.mxu3 %v1034_v13  ;;  %v3449_v13 = vld [vmem:[#allocation7 + $0x94] sm:$0xf0] }
 0x439   :  { %1501 = vmatpush.bf16.msra.mxu0 %v3224_v32  ;;  %1530 = vmatpush.bf16.msra.mxu1 %v3228_v42 }
 0x43a   :  { %1559 = vmatpush.bf16.msra.mxu2 %v3232_v45  ;;  %1588 = vmatpush.bf16.msra.mxu3 %v3236_v58  ;;  %v3159_v45 = vld [vmem:[#allocation7 + $0x60] sm:$0xf] }
 0x43d   :  { %1502 = vmatpush.bf16.msra.mxu0 %v3208_v20  ;;  %1531 = vmatpush.bf16.msra.mxu1 %v3212_v48  ;;  %v3445_v20 = vld [vmem:[#allocation7 + $0x74] sm:$0xf0] }
 0x43e   :  { %1560 = vmatpush.bf16.msra.mxu2 %v3216_v59  ;;  %1589 = vmatpush.bf16.msra.mxu3 %v3220_v26  ;;  %v3168_v36 = vor.u32 %v3445_v20, %v3167_v19  ;;  %v3145_v26 = vld [vmem:[#allocation7 + $0x50] sm:$0xf0] }
 0x43f   :  { %v3148_v35 = vor.u32 %v3438_v30, %v3145_v26 }
 0x441   :  { %1503 = vmatpush.bf16.msra.mxu0 %v3192_v15  ;;  %1532 = vmatpush.bf16.msra.mxu1 %v3196_v47  ;;  %v3151_v15 = vld [vmem:[#allocation7 + $0x48] sm:$0xf]  ;;  %v3439_v47 = vld [vmem:[#allocation7 + $0x4c] sm:$0xf] }
 0x442   :  { %1561 = vmatpush.bf16.msra.mxu2 %v3200_v63  ;;  %1590 = vmatpush.bf16.msra.mxu3 %v3204_v62  ;;  %v3436_v63 = vld [vmem:[#allocation7 + $0x2c] sm:$0xf0]  ;;  %v3152_v0 = vor.u32 %v3441_v23, %v3151_v15 }
 0x445   :  { %1504 = vmatpush.bf16.msra.mxu0 %v3176_v43 }
 0x446   :  { %1591 = vmatpush.bf16.msra.mxu3 %v3188_v33 }
 0x4b4   :  { %v1044_v54 = vpop.f32.mrf.mxu0  ;;  %v1057_v57 = vpop.f32.mrf.mxu1 }
 0x4b5   :  { %v1087_v1 = vadd.f32 %v3095_v12, %v1044_v54  ;;  %v1088_v2 = vadd.f32 %v3096_v16, %v1057_v57  ;;  %v3180_v12 = vor.u32 %v3446_v5, %v3177_v3  ;;  %v3184_v16 = vor.u32 %v3449_v13, %v3183_v7  ;;  %v3444_v57 = vld [vmem:[#allocation7 + $0x6c] sm:$0xf0]  ;;  %v3135_v13 = vld [vmem:[#allocation7 + $0x28] sm:$0xf] }
 0x4b6   :  { %v3160_v58 = vor.u32 %v3444_v57, %v3159_v45  ;;  %v3156_v5 = vor.u32 %v3439_v47, %v3153_v55  ;;  %v3128_v7 = vor.u32 %v3436_v63, %v3127_v50  ;;  %v3136_v33 = vor.u32 %v3437_v17, %v3135_v13  ;;  %v3111_v45 = vld [vmem:[#allocation7] sm:$0xf] }
 0x4b7   :  { %v3099_v38 = vmul.f32 -1.442695, %v1087_v1  ;;  %v3100_v39 = vmul.f32 -1.442695, %v1088_v2  ;;  %1533 = vmatpush.bf16.msra.mxu1 %v3180_v12  ;;  %1562 = vmatpush.bf16.msra.mxu2 %v3184_v16  ;;  %v3442_v1 = vld [vmem:[#allocation7 + $0x64] sm:$0xf]  ;;  %v1295_v63 = vpack.c.bf16 %v4154_v49, %v4102_v44  ;;  %v1297_v44 = vpack.c.bf16 %v4362_v8, %v4310_v11 }
 0x4b8   :  { %v3161_v2 = vld [vmem:[#allocation7 + $0x70] sm:$0xf0]  ;;  %1505 = vmatpush.bf16.msra.mxu0 %v3160_v58  ;;  %v3491_v49 = vld [vmem:[#allocation4 + $0x1ec] sm:$0xf]  ;;  %v3337_v17 = vld [vmem:[#allocation4 + $0x1c0] sm:$0xf] }
 0x4b9   :  { %3598 = vpow2.f32 %v3099_v38  ;;  %v3164_v9 = vor.u32 %v3442_v1, %v3161_v2  ;;  %v3443_v38 = vld [vmem:[#allocation7 + $0x6c] sm:$0xf]  ;;  %v3113_v1 = vld [vmem:[#allocation7 + $0x10] sm:$0xf0]  ;;  %v3119_v2 = vld [vmem:[#allocation7 + $0x8] sm:$0xf] }
 0x4ba   :  { %3600 = vpow2.f32 %v3100_v39  ;;  %v3169_v39 = vld [vmem:[#allocation7 + $0x78] sm:$0xf0] }
 0x4bb   :  { %v1070_v60 = vpop.f32.mrf.mxu2  ;;  %v1083_v29 = vpop.f32.mrf.mxu3  ;;  %1534 = vmatpush.bf16.msra.mxu1 %v3164_v9  ;;  %v3172_v59 = vor.u32 %v3443_v38, %v3169_v39  ;;  %1563 = vmatpush.bf16.msra.mxu2 %v3168_v36  ;;  %v3431_v36 = vld [vmem:[#allocation7 + $0xc] sm:$0xf]  ;;  %v3121_v38 = vld [vmem:[#allocation7 + $0x18] sm:$0xf0] }
 0x4bc   :  { %v1090_v10 = vadd.f32 %v3098_v40, %v1083_v29  ;;  %v1046_v22 = vpop.f32.mrf.mxu0  ;;  %v1059_v4 = vpop.f32.mrf.mxu1  ;;  %v1089_v25 = vadd.f32 %v3097_v46, %v1070_v60  ;;  %v3143_v40 = vld [vmem:[#allocation7 + $0x40] sm:$0xf]  ;;  %v3432_v46 = vld [vmem:[#allocation7 + $0xc] sm:$0xf0] }
 0x4bd   :  { %v3144_v27 = vor.u32 %v3440_v14, %v3143_v40  ;;  %1592 = vmatpush.bf16.msra.mxu3 %v3172_v59  ;;  %v3129_v22 = vld [vmem:[#allocation7 + $0x30] sm:$0xf0]  ;;  %v3112_v58 = vor.u32 %v3432_v46, %v3111_v45  ;;  %v3347_v45 = vld [vmem:[#allocation4 + $0x1d8] sm:$0xf0] }
 0x4be   :  { %v3101_v28 = vmul.f32 -1.442695, %v1090_v10  ;;  %v3434_v10 = vld [vmem:[#allocation7 + $0x24] sm:$0xf] }
 0x4bf   :  { %v3599_v32 = vpop.eup %3598  ;;  %1506 = vmatpush.bf16.msra.mxu0 %v3144_v27  ;;  %1535 = vmatpush.bf16.msra.mxu1 %v3148_v35  ;;  %v3132_v16 = vor.u32 %v3434_v10, %v3129_v22  ;;  %v3124_v27 = vor.u32 %v3431_v36, %v3121_v38  ;;  %v3490_v35 = vld [vmem:[#allocation4 + $0x1e4] sm:$0xf]  ;;  %v1296_v22 = vpack.c.bf16 %v4258_v61, %v4206_v52  ;;  %v3103_v61 = vld [vmem:[%s5006_s0 + $0xe8] sm:$0xff] }
 0x4c0   :  { %v3601_v34 = vpop.eup %3600  ;;  %v4375_v41 = vadd.f32 1.0, %v3599_v32  ;;  %3602 = vpow2.f32 %v3101_v28  ;;  %1564 = vmatpush.bf16.msra.mxu2 %v3152_v0  ;;  %v3137_v28 = vld [vmem:[#allocation7 + $0x38] sm:$0xf0]  ;;  %v3102_v52 = vld [vmem:[%s5006_s0 + $0xe0] sm:$0xff] }
 0x4c1   :  { %v4377_v42 = vadd.f32 1.0, %v3601_v34  ;;  %1593 = vmatpush.bf16.msra.mxu3 %v3156_v5  ;;  %v3140_v34 = vor.u32 %v3435_v21, %v3137_v28  ;;  %v3355_v5 = vld [vmem:[#allocation4 + $0x1f0] sm:$0xf0]  ;;  %v3488_v21 = vld [vmem:[#allocation4 + $0x1cc] sm:$0xf0] }
 0x4c2   :  { %3604 = vrcp.f32 %v4375_v41  ;;  %v1104_v6 = vand.u32 2147483647, %v4375_v41  ;;  %v1106_v29 = vand.u32 2147483648, %v4375_v41  ;;  %vm1100_vm12 = vweird.f32 %v4375_v41  ;;  %v3486_v28 = vld [vmem:[#allocation4 + $0x1c4] sm:$0xf] }
 0x4c3   :  { %3606 = vrcp.f32 %v4377_v42  ;;  %v1072_v53 = vpop.f32.mrf.mxu2  ;;  %v1085_v54 = vpop.f32.mrf.mxu3  ;;  %v1125_v60 = vand.u32 2147483648, %v4377_v42  ;;  %v1123_v3 = vand.u32 2147483647, %v4377_v42  ;;  %1507 = vmatpush.bf16.msra.mxu0 %v3128_v7  ;;  %vm1119_vm11 = vweird.f32 %v4377_v42  ;;  %1536 = vmatpush.bf16.msra.mxu1 %v3132_v16  ;;  %v3493_v7 = vld [vmem:[#allocation4 + $0x1f4] sm:$0xf0] }
 0x4c4   :  { %vm4398_vm8 = vcmp.eq.f32.partialorder %v1104_v6, 8.507059e+37  ;;  %v3430_v53 = vld [vmem:[#allocation7 + $0x4] sm:$0xf]  ;;  %v3433_v6 = vld [vmem:[#allocation7 + $0x14] sm:$0xf0]  ;;  %v1107_v20 = vor.u32 1.1754944e-38, %v1106_v29  ;;  %1565 = vmatpush.bf16.msra.mxu2 %v3136_v33  ;;  %v4437_v10 = vor.u32 %v3490_v35, %v3355_v5 }
 0x4c5   :  { %v1126_v19 = vor.u32 1.1754944e-38, %v1125_v60  ;;  %vm1124_vm15 = vcmp.eq.f32.partialorder %v1123_v3, 8.507059e+37  ;;  %v3116_v39 = vor.u32 %v3430_v53, %v3113_v1  ;;  %v3120_v40 = vor.u32 %v3433_v6, %v3119_v2  ;;  %1594 = vmatpush.bf16.msra.mxu3 %v3140_v34  ;;  %v3361_v3 = vld [vmem:[#allocation4 + $0x1e8] sm:$0xf]  ;;  %v3339_v33 = vld [vmem:[#allocation4 + $0x1d0] sm:$0xf0] }
 0x4c6   :  { %v3603_v24 = vpop.eup %3602  ;;  %v4454_v11 = vor.u32 %v3493_v7, %v3361_v3  ;;  %v3487_v34 = vld [vmem:[#allocation4 + $0x1cc] sm:$0xf]  ;;  %v3345_v1 = vld [vmem:[#allocation4 + $0x1c8] sm:$0xf]  ;;  %v3321_v2 = vld [vmem:[#allocation4 + $0x1a0] sm:$0xf] }
 0x4c7   :  { %v4385_v48 = vadd.f32 1.0, %v3603_v24  ;;  %1508 = vmatpush.bf16.msra.mxu0 %v3112_v58  ;;  %1537 = vmatpush.bf16.msra.mxu1 %v3116_v39  ;;  %v4464_v58 = vor.u32 %v3487_v34, %v3347_v45  ;;  %v3484_v6 = vld [vmem:[#allocation4 + $0x1ac] sm:$0xf0]  ;;  %v3305_v39 = vld [vmem:[#allocation4 + $0x180] sm:$0xf] }
 0x4c8   :  { %v4387_v18 = vpop.eup %3604  ;;  %1566 = vmatpush.bf16.msra.mxu2 %v3120_v40  ;;  %v3480_v40 = vld [vmem:[#allocation4 + $0x18c] sm:$0xf0]  ;;  %v3291_v5 = vld [vmem:[#allocation4 + $0x170] sm:$0xf0]  ;;  %v3481_v3 = vld [vmem:[#allocation4 + $0x194] sm:$0xf0] }
 0x4c9   :  { %v4389_v31 = vpop.eup %3606  ;;  %v1096_v37 = vmul.f32 %v4387_v18, %v4375_v41  ;;  %3608 = vrcp.f32 %v4385_v48  ;;  %vm1101_vm9 = vweird.f32 %v4387_v18  ;;  %1595 = vmatpush.bf16.msra.mxu3 %v3124_v27  ;;  %vm1139_vm1 = vweird.f32 %v4385_v48  ;;  %v3478_v27 = vld [vmem:[#allocation4 + $0x184] sm:$0xf]  ;;  %v3471_v34 = vld [vmem:[#allocation4 + $0x14c] sm:$0xf] }
 0x4ca   :  { %v1115_v56 = vmul.f32 %v4389_v31, %v4377_v42  ;;  %3610 = vtanh.f32 %v1089_v25  ;;  %vm1120_vm10 = vweird.f32 %v4389_v31  ;;  %vm1102_vm13 = vmor %vm1100_vm12, %vm1101_vm9  ;;  %v1143_v47 = vand.u32 2147483647, %v4385_v48 }
 0x4cb   :  { %v1097_v62 = vsub.f32 1.0, %v1096_v37  ;;  %vm1121_vm14 = vmor %vm1119_vm11, %vm1120_vm10 }
 0x4cc   :  { %v1116_v4 = vsub.f32 1.0, %v1115_v56  ;;  %vm1144_vm3 = vcmp.eq.f32.partialorder %v1143_v47, 8.507059e+37  ;;  %v3315_v47 = vld [vmem:[#allocation4 + $0x198] sm:$0xf0] }
 0x4cd   :  { %v1098_v12 = vmul.f32 %v4387_v18, %v1097_v62  ;;  %v3492_v62 = vld [vmem:[#allocation4 + $0x1ec] sm:$0xf0] }
 0x4ce   :  { %v1117_v32 = vmul.f32 %v4389_v31, %v1116_v4  ;;  %v3363_v4 = vld [vmem:[#allocation4 + $0x1f8] sm:$0xf0] }
 0x4cf   :  { %v3609_v54 = vpop.eup %3608  ;;  %v1099_v57 = vadd.f32 %v4387_v18, %v1098_v12  ;;  %v4445_v43 = vor.u32 %v3491_v49, %v3363_v4  ;;  %v3299_v49 = vld [vmem:[#allocation4 + $0x178] sm:$0xf0]  ;;  %v3313_v4 = vld [vmem:[#allocation4 + $0x188] sm:$0xf] }
 0x4d0   :  { %v3611_v9 = vpop.eup %3610  ;;  %v1118_v24 = vadd.f32 %v4389_v31, %v1117_v32  ;;  %v1135_v25 = vmul.f32 %v3609_v54, %v4385_v48  ;;  %vm1140_vm0 = vweird.f32 %v3609_v54  ;;  %v4457_v32 = vor.u32 %v3488_v21, %v3337_v17  ;;  %v3472_v17 = vld [vmem:[#allocation4 + $0x14c] sm:$0xf0] }
 0x4d1   :  { %v1103_v41 = vsel %vm1102_vm13, %v4387_v18, %v1099_v57  ;;  %vm1141_vm2 = vmor %vm1139_vm1, %vm1140_vm0  ;;  %v4462_v57 = vor.u32 %v3486_v28, %v3339_v33  ;;  %v4506_v21 = vor.u32 %v3481_v3, %v3313_v4  ;;  %v3470_v28 = vld [vmem:[#allocation4 + $0x144] sm:$0xf]  ;;  %v3275_v33 = vld [vmem:[#allocation4 + $0x150] sm:$0xf0] }
 0x4d2   :  { %v1108_v59 = vsel %vm4398_vm8, %v1107_v20, %v1103_v41  ;;  %v1122_v14 = vsel %vm1121_vm14, %v4389_v31, %v1118_v24  ;;  %v1136_v30 = vsub.f32 1.0, %v1135_v25  ;;  %v1145_v31 = vand.u32 2147483648, %v4385_v48  ;;  %v3353_v48 = vld [vmem:[#allocation4 + $0x1e0] sm:$0xf]  ;;  %v3323_v20 = vld [vmem:[#allocation4 + $0x1b0] sm:$0xf0] }
 0x4d3   :  { %v1127_v26 = vsel %vm1124_vm15, %v1126_v19, %v1122_v14  ;;  %v1150_v15 = vmul.f32 %v3611_v9, %v1108_v59  ;;  %v4435_v0 = vor.u32 %v3492_v62, %v3353_v48  ;;  %v3482_v9 = vld [vmem:[#allocation4 + $0x1a4] sm:$0xf]  ;;  %v4469_v19 = vor.u32 %v3484_v6, %v3321_v2  ;;  %v3483_v24 = vld [vmem:[#allocation4 + $0x1ac] sm:$0xf]  ;;  %v3331_v25 = vld [vmem:[#allocation4 + $0x1b8] sm:$0xf0] }
 0x4d4   :  { %v1149_v42 = vmul.f32 %v1127_v26, %v4359_v51  ;;  %v1137_v23 = vmul.f32 %v3609_v54, %v1136_v30  ;;  %v1146_v50 = vor.u32 1.1754944e-38, %v1145_v31  ;;  %v4471_v36 = vor.u32 %v3482_v9, %v3323_v20  ;;  %v3489_v41 = vld [vmem:[#allocation4 + $0x1d4] sm:$0xf0]  ;;  %v3307_v26 = vld [vmem:[#allocation4 + $0x190] sm:$0xf0] }
 0x4d5   :  { %v4473_v38 = vor.u32 %v3483_v24, %v3331_v25  ;;  %v4477_v30 = vor.u32 %v3489_v41, %v3345_v1  ;;  %v4480_v31 = vor.u32 %v3480_v40, %v3305_v39  ;;  %v3474_v48 = vld [vmem:[#allocation4 + $0x164] sm:$0xf]  ;;  %v3297_v1 = vld [vmem:[#allocation4 + $0x168] sm:$0xf]  ;;  %v3477_v2 = vld [vmem:[#allocation4 + $0x174] sm:$0xf0]  ;;  %v4517_v9 = vor.u32 %v3470_v28, %v3275_v33 }
 0x4d6   :  { %v4423_v18 = vadd.f32 %v1150_v15, %v1149_v42  ;;  %v1138_v37 = vadd.f32 %v3609_v54, %v1137_v23  ;;  %v3479_v15 = vld [vmem:[#allocation4 + $0x18c] sm:$0xf]  ;;  %v3104_v6 = vld [vmem:[%s5006_s0 + $0xf0] sm:$0xff]  ;;  %v3257_v24 = vld [vmem:[#allocation4 + $0x120] sm:$0xf]  ;;  %v4522_v39 = vor.u32 %v3477_v2, %v3297_v1 }
 0x4d7   :  { %v3468_v25 = vld [vmem:[#allocation4 + $0x12c] sm:$0xf0]  ;;  %v3466_v40 = vld [vmem:[#allocation4 + $0x124] sm:$0xf]  ;;  %v3469_v4 = vld [vmem:[#allocation4 + $0x134] sm:$0xf0] }
 0x4d8   :  { %3612 = vtanh.f32 %v4423_v18  ;;  %v1142_v55 = vsel %vm1141_vm2, %v3609_v54, %v1138_v37  ;;  %v3105_v54 = vld [vmem:[%s5006_s0 + $0xf8] sm:$0xff] }
 0x4d9   :  { %v1147_v56 = vsel %vm1144_vm3, %v1146_v50, %v1142_v55  ;;  %v3329_v55 = vld [vmem:[#allocation4 + $0x1a8] sm:$0xf]  ;;  %v3485_v50 = vld [vmem:[#allocation4 + $0x1b4] sm:$0xf0] }
 0x4da   :  { %v4489_v35 = vor.u32 %v3485_v50, %v3329_v55  ;;  %v3267_v55 = vld [vmem:[#allocation4 + $0x138] sm:$0xf0] }
 0x4de   :  { %v3613_v51 = vpop.eup %3612 }
 0x4df   :  { %v4429_v60 = vmul.f32 %v3613_v51, %v1147_v56  ;;  %v4484_v51 = vor.u32 %v3478_v27, %v3307_v26  ;;  %v4486_v56 = vor.u32 %v3479_v15, %v3315_v47  ;;  %v3281_v26 = vld [vmem:[#allocation4 + $0x148] sm:$0xf]  ;;  %v3473_v15 = vld [vmem:[#allocation4 + $0x154] sm:$0xf0]  ;;  %v3467_v47 = vld [vmem:[#allocation4 + $0x12c] sm:$0xf] }
 0x4e1   :  { %v1163_v29 = vpack.c.bf16 %v4429_v60, %v4429_v60 }
 0x4e3   :  { %1172 = vmatmul.bf16.vlgmr.msrb.gmra.mxu0 %v1163_v29  ;;  %1185 = vmatmul.bf16.vlgmr.msrb.gmra.mxu1 %v1163_v29 }
 0x4e4   :  { %1198 = vmatmul.bf16.vlgmr.msrb.gmra.mxu2 %v1163_v29  ;;  %1211 = vmatmul.bf16.vlgmr.msrb.gmra.mxu3 %v1163_v29  ;;  %v3289_v29 = vld [vmem:[#allocation4 + $0x160] sm:$0xf] }
 0x4e5   :  { %1853 = vmatpush.bf16.msrb.mxu0 %v4435_v0  ;;  %1866 = vmatpush.bf16.msrb.mxu1 %v4437_v10 }
 0x4e6   :  { %1892 = vmatpush.bf16.msrb.mxu3 %v4445_v43  ;;  %1879 = vmatpush.bf16.msrb.mxu2 %v4454_v11 }
 0x4e9   :  { %1854 = vmatpush.bf16.msrb.mxu0 %v4457_v32  ;;  %1867 = vmatpush.bf16.msrb.mxu1 %v4462_v57 }
 0x4ea   :  { %1893 = vmatpush.bf16.msrb.mxu3 %v4464_v58  ;;  %1880 = vmatpush.bf16.msrb.mxu2 %v4477_v30 }
 0x4ed   :  { %1855 = vmatpush.bf16.msrb.mxu0 %v4469_v19  ;;  %1868 = vmatpush.bf16.msrb.mxu1 %v4471_v36 }
 0x4ee   :  { %1894 = vmatpush.bf16.msrb.mxu3 %v4473_v38  ;;  %1881 = vmatpush.bf16.msrb.mxu2 %v4489_v35 }
 0x4f1   :  { %1856 = vmatpush.bf16.msrb.mxu0 %v4480_v31  ;;  %1869 = vmatpush.bf16.msrb.mxu1 %v4484_v51 }
 0x4f2   :  { %1895 = vmatpush.bf16.msrb.mxu3 %v4486_v56  ;;  %1882 = vmatpush.bf16.msrb.mxu2 %v4506_v21 }
 0x4f3   :  { %1509 = vmatmul.bf16.vlgmr.msra.gmra.mxu0 %v1295_v63  ;;  %1538 = vmatmul.bf16.vlgmr.msra.gmra.mxu1 %v1295_v63 }
 0x4f4   :  { %1567 = vmatmul.bf16.vlgmr.msra.gmra.mxu2 %v1295_v63  ;;  %1596 = vmatmul.bf16.vlgmr.msra.gmra.mxu3 %v1295_v63  ;;  %v3476_v63 = vld [vmem:[#allocation4 + $0x16c] sm:$0xf0] }
 0x4f6   :  { %1883 = vmatpush.bf16.msrb.mxu2 %v4522_v39 }
 0x503   :  { %1514 = vmatmul.bf16.gmra.mxu0 %v1296_v22  ;;  %1543 = vmatmul.bf16.gmra.mxu1 %v1296_v22 }
 0x504   :  { %1572 = vmatmul.bf16.gmra.mxu2 %v1296_v22  ;;  %1601 = vmatmul.bf16.gmra.mxu3 %v1296_v22  ;;  %v3475_v22 = vld [vmem:[#allocation4 + $0x16c] sm:$0xf] }
 0x513   :  { %1519 = vmatmul.bf16.gmra.mxu0 %v1297_v44  ;;  %1548 = vmatmul.bf16.gmra.mxu1 %v1297_v44 }
 0x514   :  { %1577 = vmatmul.bf16.gmra.mxu2 %v1297_v44  ;;  %1606 = vmatmul.bf16.gmra.mxu3 %v1297_v44 }
 0x560   :  { %v1173_v8 = vpop.f32.mrf.mxu0  ;;  %v1186_v13 = vpop.f32.mrf.mxu1 }
 0x561   :  { %v1216_v12 = vadd.f32 %v3102_v52, %v1173_v8  ;;  %v1217_v16 = vadd.f32 %v3103_v61, %v1186_v13  ;;  %v4494_v61 = vor.u32 %v3476_v63, %v3289_v29  ;;  %v4500_v13 = vor.u32 %v3474_v48, %v3291_v5 }
 0x563   :  { %v3106_v46 = vmul.f32 -1.442695, %v1216_v12  ;;  %v3107_v53 = vmul.f32 -1.442695, %v1217_v16  ;;  %v4502_v12 = vor.u32 %v3475_v22, %v3299_v49  ;;  %v3273_v16 = vld [vmem:[#allocation4 + $0x140] sm:$0xf]  ;;  %1857 = vmatpush.bf16.msrb.mxu0 %v4494_v61  ;;  %1870 = vmatpush.bf16.msrb.mxu1 %v4500_v13 }
 0x564   :  { %v3265_v49 = vld [vmem:[#allocation4 + $0x128] sm:$0xf] }
 0x565   :  { %3614 = vpow2.f32 %v3106_v46  ;;  %1896 = vmatpush.bf16.msrb.mxu3 %v4502_v12  ;;  %v4564_v2 = vor.u32 %v3469_v4, %v3265_v49 }
 0x566   :  { %3616 = vpow2.f32 %v3107_v53  ;;  %v3283_v53 = vld [vmem:[#allocation4 + $0x158] sm:$0xf0] }
 0x567   :  { %v4475_v59 = vpop.f32.mrf.mxu2  ;;  %v1212_v14 = vpop.f32.mrf.mxu3  ;;  %v4519_v20 = vor.u32 %v3471_v34, %v3283_v53  ;;  %1871 = vmatpush.bf16.msrb.mxu1 %v4517_v9  ;;  %v3462_v34 = vld [vmem:[#allocation4 + $0x104] sm:$0xf] }
 0x568   :  { %v1219_v42 = vadd.f32 %v3105_v54, %v1212_v14  ;;  %v1175_v23 = vpop.f32.mrf.mxu0  ;;  %v1188_v37 = vpop.f32.mrf.mxu1  ;;  %v4510_v54 = vor.u32 %v3472_v17, %v3273_v16  ;;  %v3259_v14 = vld [vmem:[#allocation4 + $0x130] sm:$0xf0]  ;;  %v3241_v16 = vld [vmem:[#allocation4 + $0x100] sm:$0xf]  ;;  %v3464_v17 = vld [vmem:[#allocation4 + $0x10c] sm:$0xf0] }
 0x569   :  { %v1218_v23 = vadd.f32 %v3104_v6, %v4475_v59  ;;  %v4530_v37 = vor.u32 %v3468_v25, %v3257_v24  ;;  %1897 = vmatpush.bf16.msrb.mxu3 %v4519_v20  ;;  %v4539_v63 = vor.u32 %v3466_v40, %v3259_v14  ;;  %v4560_v53 = vor.u32 %v3464_v17, %v3241_v16  ;;  %v3463_v6 = vld [vmem:[#allocation4 + $0x10c] sm:$0xf]  ;;  %v3465_v40 = vld [vmem:[#allocation4 + $0x114] sm:$0xf0]  ;;  %v3251_v14 = vld [vmem:[#allocation4 + $0x118] sm:$0xf0] }
 0x56a   :  { %v3108_v62 = vmul.f32 -1.442695, %v1219_v42  ;;  %1858 = vmatpush.bf16.msrb.mxu0 %v4510_v54 }
 0x56b   :  { %v3615_v44 = vpop.eup %3614  ;;  %1872 = vmatpush.bf16.msrb.mxu1 %v4539_v63 }
 0x56c   :  { %v3617_v7 = vpop.eup %3616  ;;  %v4491_v52 = vadd.f32 1.0, %v3615_v44  ;;  %3618 = vpow2.f32 %v3108_v62  ;;  %v4545_v62 = vor.u32 %v3473_v15, %v3281_v26  ;;  %v4548_v44 = vor.u32 %v3467_v47, %v3267_v55 }
 0x56d   :  { %v4496_v8 = vadd.f32 1.0, %v3617_v7  ;;  %v4574_v47 = vor.u32 %v3463_v6, %v3251_v14 }
 0x56e   :  { %3620 = vrcp.f32 %v4491_v52  ;;  %v1233_v48 = vand.u32 2147483647, %v4491_v52  ;;  %v1235_v22 = vand.u32 2147483648, %v4491_v52  ;;  %1859 = vmatpush.bf16.msrb.mxu0 %v4530_v37  ;;  %1898 = vmatpush.bf16.msrb.mxu3 %v4548_v44  ;;  %vm1229_vm7 = vweird.f32 %v4491_v52 }
 0x56f   :  { %3622 = vrcp.f32 %v4496_v8  ;;  %v1201_v45 = vpop.f32.mrf.mxu2  ;;  %v1214_v46 = vpop.f32.mrf.mxu3  ;;  %v1254_v7 = vand.u32 2147483648, %v4496_v8  ;;  %v1252_v33 = vand.u32 2147483647, %v4496_v8  ;;  %1884 = vmatpush.bf16.msrb.mxu2 %v4545_v62  ;;  %vm1248_vm6 = vweird.f32 %v4496_v8 }
 0x570   :  { %v3243_v45 = vld [vmem:[#allocation4 + $0x110] sm:$0xf0]  ;;  %v1236_v26 = vor.u32 1.1754944e-38, %v1235_v22  ;;  %vm1234_vm10 = vcmp.eq.f32.partialorder %v1233_v48, 8.507059e+37  ;;  %v1539_v6 = vpop.f32.mrf.mxu1 }
 0x571   :  { %v4562_v1 = vor.u32 %v3462_v34, %v3243_v45  ;;  %vm1253_vm11 = vcmp.eq.f32.partialorder %v1252_v33, 8.507059e+37 }
 0x572   :  { %v3619_v41 = vpop.eup %3618  ;;  %1860 = vmatpush.bf16.msrb.mxu0 %v4560_v53  ;;  %1899 = vmatpush.bf16.msrb.mxu3 %v4574_v47 }
 0x573   :  { %v4524_v27 = vadd.f32 1.0, %v3619_v41  ;;  %v3249_v41 = vld [vmem:[#allocation4 + $0x108] sm:$0xf]  ;;  %1873 = vmatpush.bf16.msrb.mxu1 %v4562_v1  ;;  %1885 = vmatpush.bf16.msrb.mxu2 %v4564_v2 }
 0x574   :  { %v4526_v42 = vpop.eup %3620  ;;  %v4583_v22 = vor.u32 %v3465_v40, %v3249_v41 }
 0x575   :  { %v4532_v50 = vpop.eup %3622  ;;  %v1225_v29 = vmul.f32 %v4526_v42, %v4491_v52  ;;  %3624 = vrcp.f32 %v4524_v27  ;;  %vm1230_vm5 = vweird.f32 %v4526_v42  ;;  %vm1268_vm13 = vweird.f32 %v4524_v27 }
 0x576   :  { %v1244_v59 = vmul.f32 %v4532_v50, %v4496_v8  ;;  %3626 = vtanh.f32 %v1218_v23  ;;  %vm1249_vm4 = vweird.f32 %v4532_v50  ;;  %vm1231_vm8 = vmor %vm1229_vm7, %vm1230_vm5  ;;  %v1255_v8 = vor.u32 1.1754944e-38, %v1254_v7  ;;  %1980 = vmatpush.bf16.msra.mxu0 %v4435_v0  ;;  %2019 = vmatpush.bf16.msra.mxu3 %v4445_v43 }
 0x577   :  { %v1226_v5 = vsub.f32 1.0, %v1225_v29  ;;  %vm1250_vm9 = vmor %vm1248_vm6, %vm1249_vm4  ;;  %1993 = vmatpush.bf16.msra.mxu1 %v4437_v10  ;;  %1886 = vmatpush.bf16.msrb.mxu2 %v4583_v22  ;;  %v1274_v7 = vand.u32 2147483648, %v4524_v27 }
 0x578   :  { %v1245_v3 = vsub.f32 1.0, %v1244_v59  ;;  %v4660_v40 = vpop.f32.mrf.mxu1 }
 0x579   :  { %v1227_v28 = vmul.f32 %v4526_v42, %v1226_v5  ;;  %v1275_v17 = vor.u32 1.1754944e-38, %v1274_v7 }
 0x57a   :  { %v1246_v46 = vmul.f32 %v4532_v50, %v1245_v3  ;;  %1981 = vmatpush.bf16.msra.mxu0 %v4457_v32  ;;  %2020 = vmatpush.bf16.msra.mxu3 %v4464_v58 }
 0x57b   :  { %v3625_v24 = vpop.eup %3624  ;;  %v1228_v25 = vadd.f32 %v4526_v42, %v1227_v28  ;;  %2006 = vmatpush.bf16.msra.mxu2 %v4454_v11  ;;  %1994 = vmatpush.bf16.msra.mxu1 %v4462_v57 }
 0x57c   :  { %v1247_v15 = vadd.f32 %v4532_v50, %v1246_v46  ;;  %v1264_v23 = vmul.f32 %v3625_v24, %v4524_v27  ;;  %v3627_v55 = vpop.eup %3626  ;;  %vm1269_vm12 = vweird.f32 %v3625_v24  ;;  %v1510_v46 = vpop.f32.mrf.mxu0 }
 0x57d   :  { %v1232_v52 = vsel %vm1231_vm8, %v4526_v42, %v1228_v25  ;;  %vm1270_vm14 = vmor %vm1268_vm13, %vm1269_vm12  ;;  %v1597_v25 = vpop.f32.mrf.mxu3 }
 0x57e   :  { %v1237_v29 = vsel %vm1234_vm10, %v1236_v26, %v1232_v52  ;;  %v1251_v59 = vsel %vm1250_vm9, %v4532_v50, %v1247_v15  ;;  %v1265_v5 = vsub.f32 1.0, %v1264_v23  ;;  %1982 = vmatpush.bf16.msra.mxu0 %v4469_v19  ;;  %2021 = vmatpush.bf16.msra.mxu3 %v4473_v38 }
 0x57f   :  { %v1256_v49 = vsel %vm1253_vm11, %v1255_v8, %v1251_v59  ;;  %v1279_v4 = vmul.f32 %v3627_v55, %v1237_v29  ;;  %2007 = vmatpush.bf16.msra.mxu2 %v4477_v30  ;;  %1995 = vmatpush.bf16.msra.mxu1 %v4471_v36 }
 0x580   :  { %v1278_v42 = vmul.f32 %v1256_v49, %v4423_v18  ;;  %v1266_v48 = vmul.f32 %v3625_v24, %v1265_v5  ;;  %v1272_v18 = vand.u32 2147483647, %v4524_v27  ;;  %v4668_v23 = vpop.f32.mrf.mxu1 }
 0x581   :  { %5019 = vst [vmem:[#allocation18_spill] sm:$0xff] %v4668_v23 }
 0x582   :  { %v1280_v3 = vadd.f32 %v1279_v4, %v1278_v42  ;;  %v1267_v50 = vadd.f32 %v3625_v24, %v1266_v48  ;;  %vm1273_vm15 = vcmp.eq.f32.partialorder %v1272_v18, 8.507059e+37  ;;  %1983 = vmatpush.bf16.msra.mxu0 %v4480_v31  ;;  %2022 = vmatpush.bf16.msra.mxu3 %v4486_v56 }
 0x583   :  { %2008 = vmatpush.bf16.msra.mxu2 %v4489_v35  ;;  %1996 = vmatpush.bf16.msra.mxu1 %v4484_v51 }
 0x584   :  { %3628 = vtanh.f32 %v1280_v3  ;;  %1286 = vst [vmem:[#allocation10] sm:$0xff] %v1280_v3  ;;  %v1271_v16 = vsel %vm1270_vm14, %v3625_v24, %v1267_v50  ;;  %v1568_v24 = vpop.f32.mrf.mxu2  ;;  %v4658_v41 = vpop.f32.mrf.mxu0 }
 0x585   :  { %v1276_v33 = vsel %vm1273_vm15, %v1275_v17, %v1271_v16  ;;  %v4664_v26 = vpop.f32.mrf.mxu3 }
 0x586   :  { %1984 = vmatpush.bf16.msra.mxu0 %v4494_v61  ;;  %2023 = vmatpush.bf16.msra.mxu3 %v4502_v12 }
 0x587   :  { %2009 = vmatpush.bf16.msra.mxu2 %v4506_v21  ;;  %1997 = vmatpush.bf16.msra.mxu1 %v4500_v13 }
 0x588   :  { %v4676_v29 = vpop.f32.mrf.mxu1 }
 0x589   :  { %5023 = vst [vmem:[#allocation22_spill] sm:$0xff] %v4676_v29 }
 0x58a   :  { %v3629_v28 = vpop.eup %3628  ;;  %1985 = vmatpush.bf16.msra.mxu0 %v4510_v54  ;;  %2024 = vmatpush.bf16.msra.mxu3 %v4519_v20 }
 0x58b   :  { %v1282_v34 = vmul.f32 %v3629_v28, %v1276_v33  ;;  %2010 = vmatpush.bf16.msra.mxu2 %v4522_v39  ;;  %1998 = vmatpush.bf16.msra.mxu1 %v4517_v9 }
 0x58c   :  { %v4662_v14 = vpop.f32.mrf.mxu2  ;;  %v4666_v15 = vpop.f32.mrf.mxu0 }
 0x58d   :  { %1285 = vst [vmem:[#allocation9] sm:$0xff] %v1282_v34  ;;  %v1298_v27 = vpack.c.bf16 %v1282_v34, %v4429_v60  ;;  %v3237_v60 = vld [vmem:[%s5007_s1 + $0x8] sm:$0xff]  ;;  %v4672_v52 = vpop.f32.mrf.mxu3  ;;  %v1331_v34 = vld [vmem:[%s5011_s5] sm:$0xf]  ;;  %s2881_s1 = sshll.u32 %s5013_s7, 4  ;;  %s2882_s1 = int_to_ptr.hbm [resolvable:$true] %s2881_s1 }
 0x58e   :  { %1986 = vmatpush.bf16.msra.mxu0 %v4530_v37  ;;  %2025 = vmatpush.bf16.msra.mxu3 %v4548_v44  ;;  %v1692_v45 = vpack.c.bf16 %v3237_v60, %v3237_v60  ;;  %5017 = vst [vmem:[#allocation16_spill] sm:$0xff] %v4662_v14 }
 0x58f   :  { %1524 = vmatmul.bf16.gmra.mxu0 %v1298_v27  ;;  %1553 = vmatmul.bf16.gmra.mxu1 %v1298_v27  ;;  %5018 = vst [vmem:[#allocation17_spill] sm:$0xff] %v4666_v15 }
 0x590   :  { %1582 = vmatmul.bf16.gmra.mxu2 %v1298_v27  ;;  %1611 = vmatmul.bf16.gmra.mxu3 %v1298_v27  ;;  %5021 = vst [vmem:[#allocation20_spill] sm:$0xff] %v4672_v52  ;;  %v4684_v4 = vpop.f32.mrf.mxu1 }
 0x591   :  { %2011 = vmatpush.bf16.msra.mxu2 %v4545_v62  ;;  %1999 = vmatpush.bf16.msra.mxu1 %v4539_v63  ;;  %5027 = vst [vmem:[#allocation26_spill] sm:$0xff] %v4684_v4 }
 0x592   :  { %1987 = vmatpush.bf16.msra.mxu0 %v4560_v53  ;;  %2026 = vmatpush.bf16.msra.mxu3 %v4574_v47 }
 0x594   :  { %v4670_v8 = vpop.f32.mrf.mxu2  ;;  %v4674_v55 = vpop.f32.mrf.mxu0 }
 0x595   :  { %2012 = vmatpush.bf16.msra.mxu2 %v4564_v2  ;;  %2000 = vmatpush.bf16.msra.mxu1 %v4562_v1  ;;  %5020 = vst [vmem:[#allocation19_spill] sm:$0xff] %v4670_v8  ;;  %v4680_v5 = vpop.f32.mrf.mxu3 }
 0x596   :  { %5022 = vst [vmem:[#allocation21_spill] sm:$0xff] %v4674_v55 }
 0x597   :  { %5025 = vst [vmem:[#allocation24_spill] sm:$0xff] %v4680_v5 }
 0x598   :  { %v4692_v50 = vpop.f32.mrf.mxu1 }
 0x599   :  { %2013 = vmatpush.bf16.msra.mxu2 %v4583_v22  ;;  %5031 = vst [vmem:[#allocation30_spill] sm:$0xff] %v4692_v50 }
 0x59c   :  { %v4678_v59 = vpop.f32.mrf.mxu2  ;;  %v4682_v49 = vpop.f32.mrf.mxu0 }
 0x59d   :  { %5024 = vst [vmem:[#allocation23_spill] sm:$0xff] %v4678_v59  ;;  %v4688_v48 = vpop.f32.mrf.mxu3 }
 0x59e   :  { %5026 = vst [vmem:[#allocation25_spill] sm:$0xff] %v4682_v49 }
 0x59f   :  { %1861 = vmatmul.bf16.vlgmr.msrb.gmra.mxu0 %v1692_v45  ;;  %1874 = vmatmul.bf16.vlgmr.msrb.gmra.mxu1 %v1692_v45  ;;  %5029 = vst [vmem:[#allocation28_spill] sm:$0xff] %v4688_v48  ;;  %v4723_v48 = vperm.slane %v1331_v34, 3 }
 0x5a0   :  { %1887 = vmatmul.bf16.vlgmr.msrb.gmra.mxu2 %v1692_v45  ;;  %1900 = vmatmul.bf16.vlgmr.msrb.gmra.mxu3 %v1692_v45  ;;  %v4713_v45 = vperm.slane %v1331_v34, 0 }
 0x5a1   :  { %2108 = vmatpush.bf16.msrb.mxu0 %v4435_v0  ;;  %2121 = vmatpush.bf16.msrb.mxu1 %v4437_v10  ;;  %v1598_v4 = vadd.f32 %v1597_v25, %v4723_v48 }
 0x5a2   :  { %2134 = vmatpush.bf16.msrb.mxu2 %v4454_v11  ;;  %2147 = vmatpush.bf16.msrb.mxu3 %v4445_v43 }
 0x5a4   :  { %v4686_v42 = vpop.f32.mrf.mxu2  ;;  %v4690_v3 = vpop.f32.mrf.mxu0 }
 0x5a5   :  { %2109 = vmatpush.bf16.msrb.mxu0 %v4457_v32  ;;  %2122 = vmatpush.bf16.msrb.mxu1 %v4462_v57  ;;  %5028 = vst [vmem:[#allocation27_spill] sm:$0xff] %v4686_v42  ;;  %v4696_v18 = vpop.f32.mrf.mxu3 }
 0x5a6   :  { %2135 = vmatpush.bf16.msrb.mxu2 %v4477_v30  ;;  %2148 = vmatpush.bf16.msrb.mxu3 %v4464_v58  ;;  %5030 = vst [vmem:[#allocation29_spill] sm:$0xff] %v4690_v3 }
 0x5a7   :  { %5033 = vst [vmem:[#allocation32_spill] sm:$0xff] %v4696_v18 }
 0x5a9   :  { %2110 = vmatpush.bf16.msrb.mxu0 %v4469_v19  ;;  %2123 = vmatpush.bf16.msrb.mxu1 %v4471_v36 }
 0x5aa   :  { %2136 = vmatpush.bf16.msrb.mxu2 %v4489_v35  ;;  %2149 = vmatpush.bf16.msrb.mxu3 %v4473_v38 }
 0x5ac   :  { %v4694_v7 = vpop.f32.mrf.mxu2 }
 0x5ad   :  { %2111 = vmatpush.bf16.msrb.mxu0 %v4480_v31  ;;  %2124 = vmatpush.bf16.msrb.mxu1 %v4484_v51  ;;  %5032 = vst [vmem:[#allocation31_spill] sm:$0xff] %v4694_v7  ;;  %v4715_v7 = vperm.slane %v1331_v34, 1 }
 0x5ae   :  { %2137 = vmatpush.bf16.msrb.mxu2 %v4506_v21  ;;  %2150 = vmatpush.bf16.msrb.mxu3 %v4486_v56 }
 0x5b1   :  { %2112 = vmatpush.bf16.msrb.mxu0 %v4494_v61  ;;  %2125 = vmatpush.bf16.msrb.mxu1 %v4500_v13 }
 0x5b2   :  { %2138 = vmatpush.bf16.msrb.mxu2 %v4522_v39  ;;  %2151 = vmatpush.bf16.msrb.mxu3 %v4502_v12 }
 0x5b5   :  { %2113 = vmatpush.bf16.msrb.mxu0 %v4510_v54  ;;  %2126 = vmatpush.bf16.msrb.mxu1 %v4517_v9 }
 0x5b6   :  { %2139 = vmatpush.bf16.msrb.mxu2 %v4545_v62  ;;  %2152 = vmatpush.bf16.msrb.mxu3 %v4519_v20 }
 0x5b9   :  { %2114 = vmatpush.bf16.msrb.mxu0 %v4530_v37  ;;  %2127 = vmatpush.bf16.msrb.mxu1 %v4539_v63 }
 0x5ba   :  { %2140 = vmatpush.bf16.msrb.mxu2 %v4564_v2  ;;  %2153 = vmatpush.bf16.msrb.mxu3 %v4548_v44 }
 0x5bd   :  { %2115 = vmatpush.bf16.msrb.mxu0 %v4560_v53  ;;  %2128 = vmatpush.bf16.msrb.mxu1 %v4562_v1 }
 0x5be   :  { %2141 = vmatpush.bf16.msrb.mxu2 %v4583_v22  ;;  %2154 = vmatpush.bf16.msrb.mxu3 %v4574_v47 }
 0x60c   :  { %v4698_v16 = vpop.f32.mrf.mxu0  ;;  %v4700_v17 = vpop.f32.mrf.mxu1 }
 0x60d   :  { %5034 = vst [vmem:[#allocation33_spill] sm:$0xff] %v4698_v16  ;;  %v1511_v16 = vadd.f32 %v1510_v46, %v4713_v45 }
 0x60e   :  { %5035 = vst [vmem:[#allocation34_spill] sm:$0xff] %v4700_v17  ;;  %v1540_v17 = vadd.f32 %v1539_v6, %v4715_v7 }
 0x613   :  { %v4702_v28 = vpop.f32.mrf.mxu2  ;;  %v4704_v33 = vpop.f32.mrf.mxu3 }
 0x614   :  { %5036 = vst [vmem:[#allocation35_spill] sm:$0xff] %v4702_v28  ;;  %v4709_v27 = vpop.f32.mrf.mxu0  ;;  %v4711_v60 = vpop.f32.mrf.mxu1 }
 0x615   :  { %5037 = vst [vmem:[#allocation36_spill] sm:$0xff] %v4704_v33 }
 0x616   :  { %5038 = vst [vmem:[#allocation37_spill] sm:$0xff] %v4709_v27 }
 0x617   :  { %5039 = vst [vmem:[#allocation38_spill] sm:$0xff] %v4711_v60 }
 0x61b   :  { %v4719_v18 = vpop.f32.mrf.mxu2  ;;  %v4721_v28 = vpop.f32.mrf.mxu3 }
 0x61c   :  { %5040 = vst [vmem:[#allocation39_spill] sm:$0xff] %v4719_v18  ;;  %v1862_v33 = vpop.f32.mrf.mxu0  ;;  %v1875_v50 = vpop.f32.mrf.mxu1 }
 0x61d   :  { %5041 = vst [vmem:[#allocation40_spill] sm:$0xff] %v4721_v28  ;;  %v1905_v3 = vadd.f32 %v1862_v33, %v1511_v16  ;;  %v1906_v42 = vadd.f32 %v1875_v50, %v1540_v17  ;;  %v4726_v50 = vperm.slane %v1331_v34, 2 }
 0x61f   :  { %v3367_v27 = vmul.f32 -1.442695, %v1905_v3  ;;  %v3368_v60 = vmul.f32 -1.442695, %v1906_v42  ;;  %v1569_v25 = vadd.f32 %v1568_v24, %v4726_v50 }
 0x621   :  { %3630 = vpow2.f32 %v3367_v27 }
 0x622   :  { %3632 = vpow2.f32 %v3368_v60 }
 0x623   :  { %v1888_v49 = vpop.f32.mrf.mxu2  ;;  %v1901_v46 = vpop.f32.mrf.mxu3 }
 0x624   :  { %v1908_v59 = vadd.f32 %v1901_v46, %v1598_v4  ;;  %v1864_v6 = vpop.f32.mrf.mxu0  ;;  %v1877_v5 = vpop.f32.mrf.mxu1  ;;  %v1907_v4 = vadd.f32 %v1888_v49, %v1569_v25 }
 0x626   :  { %v3369_v18 = vmul.f32 -1.442695, %v1908_v59 }
 0x627   :  { %v3631_v29 = vpop.eup %3630 }
 0x628   :  { %v3633_v28 = vpop.eup %3632  ;;  %v1912_v55 = vadd.f32 1.0, %v3631_v29  ;;  %3634 = vpow2.f32 %v3369_v18 }
 0x629   :  { %v1931_v16 = vadd.f32 1.0, %v3633_v28 }
 0x62a   :  { %3636 = vrcp.f32 %v1912_v55  ;;  %v1924_v18 = vand.u32 2147483648, %v1912_v55  ;;  %v1922_v6 = vand.u32 2147483647, %v1912_v55  ;;  %vm1918_vm2 = vweird.f32 %v1912_v55 }
 0x62b   :  { %3638 = vrcp.f32 %v1931_v16  ;;  %v1903_v42 = vpop.f32.mrf.mxu3  ;;  %v1890_v3 = vpop.f32.mrf.mxu2  ;;  %v1943_v28 = vand.u32 2147483648, %v1931_v16  ;;  %vm1937_vm3 = vweird.f32 %v1931_v16 }
 0x62c   :  { %v1941_v3 = vand.u32 2147483647, %v1931_v16  ;;  %v1925_v49 = vor.u32 1.1754944e-38, %v1924_v18  ;;  %vm1923_vm6 = vcmp.eq.f32.partialorder %v1922_v6, 8.507059e+37 }
 0x62e   :  { %v3635_v17 = vpop.eup %3634  ;;  %vm1942_vm7 = vcmp.eq.f32.partialorder %v1941_v3, 8.507059e+37 }
 0x62f   :  { %v1951_v33 = vadd.f32 1.0, %v3635_v17 }
 0x630   :  { %v3637_v27 = vpop.eup %3636 }
 0x631   :  { %v3639_v60 = vpop.eup %3638  ;;  %v1914_v5 = vmul.f32 %v3637_v27, %v1912_v55  ;;  %3640 = vrcp.f32 %v1951_v33  ;;  %vm1919_vm0 = vweird.f32 %v3637_v27  ;;  %vm1957_vm9 = vweird.f32 %v1951_v33 }
 0x632   :  { %v1933_v59 = vmul.f32 %v3639_v60, %v1931_v16  ;;  %3642 = vtanh.f32 %v1907_v4  ;;  %vm1938_vm1 = vweird.f32 %v3639_v60  ;;  %vm1920_vm4 = vmor %vm1918_vm2, %vm1919_vm0  ;;  %v3238_v4 = vld [vmem:[%s5008_s2 + $0x8] sm:$0xff]  ;;  %v1961_v14 = vand.u32 2147483647, %v1951_v33 }
 0x633   :  { %v1915_v46 = vsub.f32 1.0, %v1914_v5  ;;  %vm1939_vm5 = vmor %vm1937_vm3, %vm1938_vm1  ;;  %v1944_v5 = vor.u32 1.1754944e-38, %v1943_v28  ;;  %v1963_v28 = vand.u32 2147483648, %v1951_v33 }
 0x634   :  { %v1934_v29 = vsub.f32 1.0, %v1933_v59  ;;  %vm1962_vm11 = vcmp.eq.f32.partialorder %v1961_v14, 8.507059e+37  ;;  %v1513_v14 = vadd.f32 %v4658_v41, %v4713_v45 }
 0x635   :  { %v1916_v34 = vmul.f32 %v3637_v27, %v1915_v46  ;;  %v1964_v6 = vor.u32 1.1754944e-38, %v1963_v28 }
 0x636   :  { %v1935_v42 = vmul.f32 %v3639_v60, %v1934_v29 }
 0x637   :  { %v3641_v8 = vpop.eup %3640  ;;  %v1917_v24 = vadd.f32 %v3637_v27, %v1916_v34 }
 0x638   :  { %v1936_v17 = vadd.f32 %v3639_v60, %v1935_v42  ;;  %v1953_v25 = vmul.f32 %v3641_v8, %v1951_v33  ;;  %v3643_v46 = vpop.eup %3642  ;;  %vm1958_vm8 = vweird.f32 %v3641_v8 }
 0x639   :  { %v1921_v59 = vsel %vm1920_vm4, %v3637_v27, %v1917_v24  ;;  %vm1959_vm10 = vmor %vm1957_vm9, %vm1958_vm8 }
 0x63a   :  { %v1926_v29 = vsel %vm1923_vm6, %v1925_v49, %v1921_v59  ;;  %v1940_v52 = vsel %vm1939_vm5, %v3639_v60, %v1936_v17  ;;  %v1954_v23 = vsub.f32 1.0, %v1953_v25 }
 0x63b   :  { %v1945_v34 = vsel %vm1942_vm7, %v1944_v5, %v1940_v52  ;;  %v1968_v55 = vmul.f32 %v3643_v46, %v1926_v29  ;;  %v1600_v5 = vadd.f32 %v4664_v26, %v4723_v48 }
 0x63c   :  { %v1967_v16 = vmul.f32 %v3238_v4, %v1945_v34  ;;  %v1955_v15 = vmul.f32 %v3641_v8, %v1954_v23 }
 0x63e   :  { %v4732_v18 = vadd.f32 %v1968_v55, %v1967_v16  ;;  %v1956_v42 = vadd.f32 %v3641_v8, %v1955_v15  ;;  %v1542_v15 = vadd.f32 %v4660_v40, %v4715_v7 }
 0x640   :  { %3644 = vtanh.f32 %v4732_v18  ;;  %v1960_v27 = vsel %vm1959_vm10, %v3641_v8, %v1956_v42 }
 0x641   :  { %v1965_v3 = vsel %vm1962_vm11, %v1964_v6, %v1960_v27 }
 0x646   :  { %v3645_v60 = vpop.eup %3644 }
 0x647   :  { %v1971_v24 = vmul.f32 %v3645_v60, %v1965_v3  ;;  %v5042_v60 = vld [vmem:[#allocation16_spill] sm:$0xff] }
 0x648   :  { %v1571_v26 = vadd.f32 %v5042_v60, %v4726_v50 }
 0x649   :  { %1972 = vst [vmem:[%s5012_s6] sm:$0xff] %v1971_v24  ;;  %v1979_v23 = vpack.c.bf16 %v1971_v24, %v1971_v24 }
 0x64b   :  { %1988 = vmatmul.bf16.vlgmr.msra.gmra.mxu0 %v1979_v23  ;;  %2001 = vmatmul.bf16.vlgmr.msra.gmra.mxu1 %v1979_v23 }
 0x64c   :  { %2014 = vmatmul.bf16.vlgmr.msra.gmra.mxu2 %v1979_v23  ;;  %2027 = vmatmul.bf16.vlgmr.msra.gmra.mxu3 %v1979_v23 }
 0x64d   :  { %2236 = vmatpush.bf16.msra.mxu0 %v4435_v0  ;;  %2249 = vmatpush.bf16.msra.mxu1 %v4437_v10 }
 0x64e   :  { %2262 = vmatpush.bf16.msra.mxu2 %v4454_v11  ;;  %2275 = vmatpush.bf16.msra.mxu3 %v4445_v43 }
 0x651   :  { %2237 = vmatpush.bf16.msra.mxu0 %v4457_v32  ;;  %2250 = vmatpush.bf16.msra.mxu1 %v4462_v57 }
 0x652   :  { %2263 = vmatpush.bf16.msra.mxu2 %v4477_v30  ;;  %2276 = vmatpush.bf16.msra.mxu3 %v4464_v58 }
 0x655   :  { %2238 = vmatpush.bf16.msra.mxu0 %v4469_v19  ;;  %2251 = vmatpush.bf16.msra.mxu1 %v4471_v36 }
 0x656   :  { %2264 = vmatpush.bf16.msra.mxu2 %v4489_v35  ;;  %2277 = vmatpush.bf16.msra.mxu3 %v4473_v38 }
 0x659   :  { %2239 = vmatpush.bf16.msra.mxu0 %v4480_v31  ;;  %2252 = vmatpush.bf16.msra.mxu1 %v4484_v51 }
 0x65a   :  { %2265 = vmatpush.bf16.msra.mxu2 %v4506_v21  ;;  %2278 = vmatpush.bf16.msra.mxu3 %v4486_v56 }
 0x65d   :  { %2240 = vmatpush.bf16.msra.mxu0 %v4494_v61  ;;  %2253 = vmatpush.bf16.msra.mxu1 %v4500_v13 }
 0x65e   :  { %2266 = vmatpush.bf16.msra.mxu2 %v4522_v39  ;;  %2279 = vmatpush.bf16.msra.mxu3 %v4502_v12 }
 0x661   :  { %2241 = vmatpush.bf16.msra.mxu0 %v4510_v54  ;;  %2254 = vmatpush.bf16.msra.mxu1 %v4517_v9 }
 0x662   :  { %2267 = vmatpush.bf16.msra.mxu2 %v4545_v62  ;;  %2280 = vmatpush.bf16.msra.mxu3 %v4519_v20 }
 0x665   :  { %2242 = vmatpush.bf16.msra.mxu0 %v4530_v37  ;;  %2255 = vmatpush.bf16.msra.mxu1 %v4539_v63 }
 0x666   :  { %2268 = vmatpush.bf16.msra.mxu2 %v4564_v2  ;;  %2281 = vmatpush.bf16.msra.mxu3 %v4548_v44 }
 0x669   :  { %2243 = vmatpush.bf16.msra.mxu0 %v4560_v53  ;;  %2256 = vmatpush.bf16.msra.mxu1 %v4562_v1 }
 0x66a   :  { %2269 = vmatpush.bf16.msra.mxu2 %v4583_v22  ;;  %2282 = vmatpush.bf16.msra.mxu3 %v4574_v47 }
 0x6c8   :  { %v1989_v8 = vpop.f32.mrf.mxu0  ;;  %v2002_v52 = vpop.f32.mrf.mxu1 }
 0x6c9   :  { %v2032_v33 = vadd.f32 %v1989_v8, %v1513_v14  ;;  %v2033_v49 = vadd.f32 %v2002_v52, %v1542_v15 }
 0x6cb   :  { %v3370_v17 = vmul.f32 -1.442695, %v2032_v33  ;;  %v3371_v25 = vmul.f32 -1.442695, %v2033_v49 }
 0x6cd   :  { %3646 = vpow2.f32 %v3370_v17 }
 0x6ce   :  { %3648 = vpow2.f32 %v3371_v25 }
 0x6cf   :  { %v2015_v4 = vpop.f32.mrf.mxu2  ;;  %v2028_v59 = vpop.f32.mrf.mxu3 }
 0x6d0   :  { %v2035_v46 = vadd.f32 %v2028_v59, %v1600_v5  ;;  %v1991_v29 = vpop.f32.mrf.mxu0  ;;  %v2004_v34 = vpop.f32.mrf.mxu1  ;;  %v2034_v23 = vadd.f32 %v2015_v4, %v1571_v26 }
 0x6d2   :  { %v3372_v41 = vmul.f32 -1.442695, %v2035_v46 }
 0x6d3   :  { %v3647_v55 = vpop.eup %3646 }
 0x6d4   :  { %v3649_v16 = vpop.eup %3648  ;;  %v2039_v40 = vadd.f32 1.0, %v3647_v55  ;;  %3650 = vpow2.f32 %v3372_v41 }
 0x6d5   :  { %v2058_v42 = vadd.f32 1.0, %v3649_v16 }
 0x6d6   :  { %3652 = vrcp.f32 %v2039_v40  ;;  %v2051_v49 = vand.u32 2147483648, %v2039_v40  ;;  %v2049_v5 = vand.u32 2147483647, %v2039_v40  ;;  %vm2045_vm14 = vweird.f32 %v2039_v40 }
 0x6d7   :  { %3654 = vrcp.f32 %v2058_v42  ;;  %v2017_v28 = vpop.f32.mrf.mxu2  ;;  %v2030_v27 = vpop.f32.mrf.mxu3  ;;  %v2070_v17 = vand.u32 2147483648, %v2058_v42  ;;  %v2068_v46 = vand.u32 2147483647, %v2058_v42  ;;  %vm2064_vm15 = vweird.f32 %v2058_v42 }
 0x6d8   :  { %v2052_v4 = vor.u32 1.1754944e-38, %v2051_v49  ;;  %vm2050_vm2 = vcmp.eq.f32.partialorder %v2049_v5, 8.507059e+37 }
 0x6d9   :  { %v2071_v16 = vor.u32 1.1754944e-38, %v2070_v17  ;;  %vm2069_vm3 = vcmp.eq.f32.partialorder %v2068_v46, 8.507059e+37  ;;  %v5044_v46 = vld [vmem:[#allocation18_spill] sm:$0xff] }
 0x6da   :  { %v3651_v6 = vpop.eup %3650 }
 0x6db   :  { %v2078_v3 = vadd.f32 1.0, %v3651_v6 }
 0x6dc   :  { %v3653_v24 = vpop.eup %3652 }
 0x6dd   :  { %v3655_v14 = vpop.eup %3654  ;;  %v2041_v15 = vmul.f32 %v3653_v24, %v2039_v40  ;;  %3656 = vrcp.f32 %v2078_v3  ;;  %vm2046_vm12 = vweird.f32 %v3653_v24  ;;  %vm2084_vm5 = vweird.f32 %v2078_v3 }
 0x6de   :  { %v2060_v8 = vmul.f32 %v3655_v14, %v2058_v42  ;;  %3658 = vtanh.f32 %v2034_v23  ;;  %vm2065_vm13 = vweird.f32 %v3655_v14  ;;  %vm2047_vm0 = vmor %vm2045_vm14, %vm2046_vm12 }
 0x6df   :  { %v2042_v52 = vsub.f32 1.0, %v2041_v15  ;;  %vm2066_vm1 = vmor %vm2064_vm15, %vm2065_vm13 }
 0x6e0   :  { %v2061_v33 = vsub.f32 1.0, %v2060_v8 }
 0x6e1   :  { %v2043_v25 = vmul.f32 %v3653_v24, %v2042_v52 }
 0x6e2   :  { %v2062_v59 = vmul.f32 %v3655_v14, %v2061_v33  ;;  %v2090_v33 = vand.u32 2147483648, %v2078_v3 }
 0x6e3   :  { %v3657_v29 = vpop.eup %3656  ;;  %v2044_v34 = vadd.f32 %v3653_v24, %v2043_v25 }
 0x6e4   :  { %v2063_v41 = vadd.f32 %v3655_v14, %v2062_v59  ;;  %v2080_v55 = vmul.f32 %v3657_v29, %v2078_v3  ;;  %v3659_v27 = vpop.eup %3658  ;;  %vm2085_vm4 = vweird.f32 %v3657_v29  ;;  %v2091_v17 = vor.u32 1.1754944e-38, %v2090_v33 }
 0x6e5   :  { %v2048_v28 = vsel %vm2047_vm0, %v3653_v24, %v2044_v34  ;;  %v2088_v24 = vand.u32 2147483647, %v2078_v3  ;;  %vm2086_vm6 = vmor %vm2084_vm5, %vm2085_vm4  ;;  %v5043_v3 = vld [vmem:[#allocation17_spill] sm:$0xff] }
 0x6e6   :  { %v2053_v6 = vsel %vm2050_vm2, %v2052_v4, %v2048_v28  ;;  %v2067_v60 = vsel %vm2066_vm1, %v3655_v14, %v2063_v41  ;;  %v2081_v26 = vsub.f32 1.0, %v2080_v55  ;;  %v1516_v59 = vadd.f32 %v5043_v3, %v4713_v45 }
 0x6e7   :  { %v2072_v23 = vsel %vm2069_vm3, %v2071_v16, %v2067_v60  ;;  %v2095_v15 = vmul.f32 %v3659_v27, %v2053_v6  ;;  %vm2089_vm7 = vcmp.eq.f32.partialorder %v2088_v24, 8.507059e+37  ;;  %v5045_v27 = vld [vmem:[#allocation20_spill] sm:$0xff] }
 0x6e8   :  { %v2094_v8 = vmul.f32 %v2072_v23, %v4732_v18  ;;  %v2082_v52 = vmul.f32 %v3657_v29, %v2081_v26  ;;  %v1603_v6 = vadd.f32 %v5045_v27, %v4723_v48 }
 0x6ea   :  { %v4779_v40 = vadd.f32 %v2095_v15, %v2094_v8  ;;  %v2083_v42 = vadd.f32 %v3657_v29, %v2082_v52 }
 0x6ec   :  { %3660 = vtanh.f32 %v4779_v40  ;;  %v2087_v49 = vsel %vm2086_vm6, %v3657_v29, %v2083_v42  ;;  %v1545_v29 = vadd.f32 %v5044_v46, %v4715_v7 }
 0x6ed   :  { %v2092_v25 = vsel %vm2089_vm7, %v2091_v17, %v2087_v49 }
 0x6f2   :  { %v3661_v14 = vpop.eup %3660 }
 0x6f3   :  { %v2098_v5 = vmul.f32 %v3661_v14, %v2092_v25 }
 0x6f5   :  { %3373 = vst [vmem:[%s5012_s6 + $0x8] sm:$0xff] %v2098_v5  ;;  %v2107_v18 = vpack.c.bf16 %v2098_v5, %v2098_v5  ;;  %v5046_v5 = vld [vmem:[#allocation19_spill] sm:$0xff] }
 0x6f7   :  { %2116 = vmatmul.bf16.vlgmr.msrb.gmra.mxu0 %v2107_v18  ;;  %2129 = vmatmul.bf16.vlgmr.msrb.gmra.mxu1 %v2107_v18 }
 0x6f8   :  { %2142 = vmatmul.bf16.vlgmr.msrb.gmra.mxu2 %v2107_v18  ;;  %2155 = vmatmul.bf16.vlgmr.msrb.gmra.mxu3 %v2107_v18  ;;  %v1574_v18 = vadd.f32 %v5046_v5, %v4726_v50 }
 0x6f9   :  { %2364 = vmatpush.bf16.msrb.mxu0 %v4435_v0  ;;  %2377 = vmatpush.bf16.msrb.mxu1 %v4437_v10 }
 0x6fa   :  { %2390 = vmatpush.bf16.msrb.mxu2 %v4454_v11  ;;  %2403 = vmatpush.bf16.msrb.mxu3 %v4445_v43 }
 0x6fd   :  { %2365 = vmatpush.bf16.msrb.mxu0 %v4457_v32  ;;  %2378 = vmatpush.bf16.msrb.mxu1 %v4462_v57 }
 0x6fe   :  { %2391 = vmatpush.bf16.msrb.mxu2 %v4477_v30  ;;  %2404 = vmatpush.bf16.msrb.mxu3 %v4464_v58 }
 0x701   :  { %2366 = vmatpush.bf16.msrb.mxu0 %v4469_v19  ;;  %2379 = vmatpush.bf16.msrb.mxu1 %v4471_v36 }
 0x702   :  { %2392 = vmatpush.bf16.msrb.mxu2 %v4489_v35  ;;  %2405 = vmatpush.bf16.msrb.mxu3 %v4473_v38 }
 0x705   :  { %2367 = vmatpush.bf16.msrb.mxu0 %v4480_v31  ;;  %2380 = vmatpush.bf16.msrb.mxu1 %v4484_v51 }
 0x706   :  { %2393 = vmatpush.bf16.msrb.mxu2 %v4506_v21  ;;  %2406 = vmatpush.bf16.msrb.mxu3 %v4486_v56 }
 0x709   :  { %2368 = vmatpush.bf16.msrb.mxu0 %v4494_v61  ;;  %2381 = vmatpush.bf16.msrb.mxu1 %v4500_v13 }
 0x70a   :  { %2394 = vmatpush.bf16.msrb.mxu2 %v4522_v39  ;;  %2407 = vmatpush.bf16.msrb.mxu3 %v4502_v12 }
 0x70d   :  { %2369 = vmatpush.bf16.msrb.mxu0 %v4510_v54  ;;  %2382 = vmatpush.bf16.msrb.mxu1 %v4517_v9 }
 0x70e   :  { %2395 = vmatpush.bf16.msrb.mxu2 %v4545_v62  ;;  %2408 = vmatpush.bf16.msrb.mxu3 %v4519_v20 }
 0x711   :  { %2370 = vmatpush.bf16.msrb.mxu0 %v4530_v37  ;;  %2383 = vmatpush.bf16.msrb.mxu1 %v4539_v63 }
 0x712   :  { %2396 = vmatpush.bf16.msrb.mxu2 %v4564_v2  ;;  %2409 = vmatpush.bf16.msrb.mxu3 %v4548_v44 }
 0x715   :  { %2371 = vmatpush.bf16.msrb.mxu0 %v4560_v53  ;;  %2384 = vmatpush.bf16.msrb.mxu1 %v4562_v1 }
 0x716   :  { %2397 = vmatpush.bf16.msrb.mxu2 %v4583_v22  ;;  %2410 = vmatpush.bf16.msrb.mxu3 %v4574_v47 }
 0x774   :  { %v2117_v34 = vpop.f32.mrf.mxu0  ;;  %v2130_v4 = vpop.f32.mrf.mxu1 }
 0x775   :  { %v2160_v41 = vadd.f32 %v2117_v34, %v1516_v59  ;;  %v2161_v55 = vadd.f32 %v2130_v4, %v1545_v29 }
 0x777   :  { %v3374_v16 = vmul.f32 -1.442695, %v2160_v41  ;;  %v3375_v28 = vmul.f32 -1.442695, %v2161_v55 }
 0x779   :  { %3662 = vpow2.f32 %v3374_v16 }
 0x77a   :  { %3664 = vpow2.f32 %v3375_v28 }
 0x77b   :  { %v2143_v60 = vpop.f32.mrf.mxu2  ;;  %v2156_v26 = vpop.f32.mrf.mxu3 }
 0x77c   :  { %v2163_v23 = vadd.f32 %v2156_v26, %v1603_v6  ;;  %v2119_v15 = vpop.f32.mrf.mxu0  ;;  %v2132_v8 = vpop.f32.mrf.mxu1  ;;  %v2162_v46 = vadd.f32 %v2143_v60, %v1574_v18 }
 0x77e   :  { %v3376_v52 = vmul.f32 -1.442695, %v2163_v23 }
 0x77f   :  { %v3663_v42 = vpop.eup %3662 }
 0x780   :  { %v3665_v33 = vpop.eup %3664  ;;  %v2167_v24 = vadd.f32 1.0, %v3663_v42  ;;  %3666 = vpow2.f32 %v3376_v52 }
 0x781   :  { %v2186_v49 = vadd.f32 1.0, %v3665_v33 }
 0x782   :  { %3668 = vrcp.f32 %v2167_v24  ;;  %v2179_v16 = vand.u32 2147483648, %v2167_v24  ;;  %v2177_v6 = vand.u32 2147483647, %v2167_v24  ;;  %vm2173_vm10 = vweird.f32 %v2167_v24 }
 0x783   :  { %3670 = vrcp.f32 %v2186_v49  ;;  %v2145_v17 = vpop.f32.mrf.mxu2  ;;  %v2158_v14 = vpop.f32.mrf.mxu3  ;;  %v2198_v28 = vand.u32 2147483648, %v2186_v49  ;;  %v2196_v23 = vand.u32 2147483647, %v2186_v49  ;;  %vm2192_vm11 = vweird.f32 %v2186_v49 }
 0x784   :  { %v2180_v60 = vor.u32 1.1754944e-38, %v2179_v16  ;;  %vm2178_vm14 = vcmp.eq.f32.partialorder %v2177_v6, 8.507059e+37 }
 0x785   :  { %v2199_v33 = vor.u32 1.1754944e-38, %v2198_v28  ;;  %vm2197_vm15 = vcmp.eq.f32.partialorder %v2196_v23, 8.507059e+37  ;;  %v5048_v23 = vld [vmem:[#allocation22_spill] sm:$0xff] }
 0x786   :  { %v3667_v25 = vpop.eup %3666 }
 0x787   :  { %v2206_v3 = vadd.f32 1.0, %v3667_v25 }
 0x788   :  { %v3669_v59 = vpop.eup %3668 }
 0x789   :  { %v3671_v29 = vpop.eup %3670  ;;  %v2169_v34 = vmul.f32 %v3669_v59, %v2167_v24  ;;  %3672 = vrcp.f32 %v2206_v3  ;;  %vm2174_vm8 = vweird.f32 %v3669_v59  ;;  %vm2212_vm1 = vweird.f32 %v2206_v3 }
 0x78a   :  { %v2188_v4 = vmul.f32 %v3671_v29, %v2186_v49  ;;  %3674 = vtanh.f32 %v2162_v46  ;;  %vm2193_vm9 = vweird.f32 %v3671_v29  ;;  %vm2175_vm12 = vmor %vm2173_vm10, %vm2174_vm8 }
 0x78b   :  { %v2170_v41 = vsub.f32 1.0, %v2169_v34  ;;  %vm2194_vm13 = vmor %vm2192_vm11, %vm2193_vm9 }
 0x78c   :  { %v2189_v55 = vsub.f32 1.0, %v2188_v4 }
 0x78d   :  { %v2171_v27 = vmul.f32 %v3669_v59, %v2170_v41 }
 0x78e   :  { %v2190_v26 = vmul.f32 %v3671_v29, %v2189_v55  ;;  %v2218_v55 = vand.u32 2147483648, %v2206_v3 }
 0x78f   :  { %v3673_v15 = vpop.eup %3672  ;;  %v2172_v8 = vadd.f32 %v3669_v59, %v2171_v27 }
 0x790   :  { %v2191_v52 = vadd.f32 %v3671_v29, %v2190_v26  ;;  %v2208_v42 = vmul.f32 %v3673_v15, %v2206_v3  ;;  %v3675_v14 = vpop.eup %3674  ;;  %vm2213_vm0 = vweird.f32 %v3673_v15  ;;  %v2219_v28 = vor.u32 1.1754944e-38, %v2218_v55 }
 0x791   :  { %v2176_v17 = vsel %vm2175_vm12, %v3669_v59, %v2172_v8  ;;  %v2216_v59 = vand.u32 2147483647, %v2206_v3  ;;  %vm2214_vm2 = vmor %vm2212_vm1, %vm2213_vm0  ;;  %v5047_v3 = vld [vmem:[#allocation21_spill] sm:$0xff] }
 0x792   :  { %v2181_v25 = vsel %vm2178_vm14, %v2180_v60, %v2176_v17  ;;  %v2195_v5 = vsel %vm2194_vm13, %v3671_v29, %v2191_v52  ;;  %v2209_v18 = vsub.f32 1.0, %v2208_v42  ;;  %v1518_v26 = vadd.f32 %v5047_v3, %v4713_v45 }
 0x793   :  { %v2200_v46 = vsel %vm2197_vm15, %v2199_v33, %v2195_v5  ;;  %v2223_v34 = vmul.f32 %v3675_v14, %v2181_v25  ;;  %vm2217_vm3 = vcmp.eq.f32.partialorder %v2216_v59, 8.507059e+37  ;;  %v5049_v14 = vld [vmem:[#allocation24_spill] sm:$0xff] }
 0x794   :  { %v2222_v4 = vmul.f32 %v2200_v46, %v4779_v40  ;;  %v2210_v41 = vmul.f32 %v3673_v15, %v2209_v18  ;;  %v1605_v25 = vadd.f32 %v5049_v14, %v4723_v48 }
 0x796   :  { %v4826_v24 = vadd.f32 %v2223_v34, %v2222_v4  ;;  %v2211_v49 = vadd.f32 %v3673_v15, %v2210_v41 }
 0x798   :  { %3676 = vtanh.f32 %v4826_v24  ;;  %v2215_v16 = vsel %vm2214_vm2, %v3673_v15, %v2211_v49  ;;  %v1547_v15 = vadd.f32 %v5048_v23, %v4715_v7 }
 0x799   :  { %v2220_v27 = vsel %vm2217_vm3, %v2219_v28, %v2215_v16 }
 0x79e   :  { %v3677_v29 = vpop.eup %3676 }
 0x79f   :  { %v2226_v6 = vmul.f32 %v3677_v29, %v2220_v27 }
 0x7a1   :  { %3377 = vst [vmem:[%s5012_s6 + $0x10] sm:$0xff] %v2226_v6  ;;  %v2235_v40 = vpack.c.bf16 %v2226_v6, %v2226_v6  ;;  %v5050_v6 = vld [vmem:[#allocation23_spill] sm:$0xff] }
 0x7a3   :  { %2244 = vmatmul.bf16.vlgmr.msra.gmra.mxu0 %v2235_v40  ;;  %2257 = vmatmul.bf16.vlgmr.msra.gmra.mxu1 %v2235_v40 }
 0x7a4   :  { %2270 = vmatmul.bf16.vlgmr.msra.gmra.mxu2 %v2235_v40  ;;  %2283 = vmatmul.bf16.vlgmr.msra.gmra.mxu3 %v2235_v40  ;;  %v1576_v40 = vadd.f32 %v5050_v6, %v4726_v50 }
 0x7a5   :  { %2492 = vmatpush.bf16.msra.mxu0 %v4435_v0  ;;  %2505 = vmatpush.bf16.msra.mxu1 %v4437_v10 }
 0x7a6   :  { %2518 = vmatpush.bf16.msra.mxu2 %v4454_v11  ;;  %2531 = vmatpush.bf16.msra.mxu3 %v4445_v43 }
 0x7a9   :  { %2493 = vmatpush.bf16.msra.mxu0 %v4457_v32  ;;  %2506 = vmatpush.bf16.msra.mxu1 %v4462_v57 }
 0x7aa   :  { %2519 = vmatpush.bf16.msra.mxu2 %v4477_v30  ;;  %2532 = vmatpush.bf16.msra.mxu3 %v4464_v58 }
 0x7ad   :  { %2494 = vmatpush.bf16.msra.mxu0 %v4469_v19  ;;  %2507 = vmatpush.bf16.msra.mxu1 %v4471_v36 }
 0x7ae   :  { %2520 = vmatpush.bf16.msra.mxu2 %v4489_v35  ;;  %2533 = vmatpush.bf16.msra.mxu3 %v4473_v38 }
 0x7b1   :  { %2495 = vmatpush.bf16.msra.mxu0 %v4480_v31  ;;  %2508 = vmatpush.bf16.msra.mxu1 %v4484_v51 }
 0x7b2   :  { %2521 = vmatpush.bf16.msra.mxu2 %v4506_v21  ;;  %2534 = vmatpush.bf16.msra.mxu3 %v4486_v56 }
 0x7b5   :  { %2496 = vmatpush.bf16.msra.mxu0 %v4494_v61  ;;  %2509 = vmatpush.bf16.msra.mxu1 %v4500_v13 }
 0x7b6   :  { %2522 = vmatpush.bf16.msra.mxu2 %v4522_v39  ;;  %2535 = vmatpush.bf16.msra.mxu3 %v4502_v12 }
 0x7b9   :  { %2497 = vmatpush.bf16.msra.mxu0 %v4510_v54  ;;  %2510 = vmatpush.bf16.msra.mxu1 %v4517_v9 }
 0x7ba   :  { %2523 = vmatpush.bf16.msra.mxu2 %v4545_v62  ;;  %2536 = vmatpush.bf16.msra.mxu3 %v4519_v20 }
 0x7bd   :  { %2498 = vmatpush.bf16.msra.mxu0 %v4530_v37  ;;  %2511 = vmatpush.bf16.msra.mxu1 %v4539_v63 }
 0x7be   :  { %2524 = vmatpush.bf16.msra.mxu2 %v4564_v2  ;;  %2537 = vmatpush.bf16.msra.mxu3 %v4548_v44 }
 0x7c1   :  { %2499 = vmatpush.bf16.msra.mxu0 %v4560_v53  ;;  %2512 = vmatpush.bf16.msra.mxu1 %v4562_v1 }
 0x7c2   :  { %2525 = vmatpush.bf16.msra.mxu2 %v4583_v22  ;;  %2538 = vmatpush.bf16.msra.mxu3 %v4574_v47 }
 0x820   :  { %v2245_v8 = vpop.f32.mrf.mxu0  ;;  %v2258_v60 = vpop.f32.mrf.mxu1 }
 0x821   :  { %v2288_v52 = vadd.f32 %v2245_v8, %v1518_v26  ;;  %v2289_v42 = vadd.f32 %v2258_v60, %v1547_v15 }
 0x823   :  { %v3378_v33 = vmul.f32 -1.442695, %v2288_v52  ;;  %v3379_v17 = vmul.f32 -1.442695, %v2289_v42 }
 0x825   :  { %3678 = vpow2.f32 %v3378_v33 }
 0x826   :  { %3680 = vpow2.f32 %v3379_v17 }
 0x827   :  { %v2271_v5 = vpop.f32.mrf.mxu2  ;;  %v2284_v18 = vpop.f32.mrf.mxu3 }
 0x828   :  { %v2291_v46 = vadd.f32 %v2284_v18, %v1605_v25  ;;  %v2247_v34 = vpop.f32.mrf.mxu0  ;;  %v2260_v4 = vpop.f32.mrf.mxu1  ;;  %v2290_v23 = vadd.f32 %v2271_v5, %v1576_v40 }
 0x82a   :  { %v3380_v41 = vmul.f32 -1.442695, %v2291_v46 }
 0x82b   :  { %v3679_v49 = vpop.eup %3678 }
 0x82c   :  { %v3681_v55 = vpop.eup %3680  ;;  %v2295_v59 = vadd.f32 1.0, %v3679_v49  ;;  %3682 = vpow2.f32 %v3380_v41 }
 0x82d   :  { %v2314_v16 = vadd.f32 1.0, %v3681_v55 }
 0x82e   :  { %3684 = vrcp.f32 %v2295_v59  ;;  %v2307_v33 = vand.u32 2147483648, %v2295_v59  ;;  %v2305_v25 = vand.u32 2147483647, %v2295_v59  ;;  %vm2301_vm6 = vweird.f32 %v2295_v59 }
 0x82f   :  { %3686 = vrcp.f32 %v2314_v16  ;;  %v2273_v28 = vpop.f32.mrf.mxu2  ;;  %v2286_v29 = vpop.f32.mrf.mxu3  ;;  %v2326_v17 = vand.u32 2147483648, %v2314_v16  ;;  %v2324_v46 = vand.u32 2147483647, %v2314_v16  ;;  %vm2320_vm7 = vweird.f32 %v2314_v16 }
 0x830   :  { %v2308_v5 = vor.u32 1.1754944e-38, %v2307_v33  ;;  %vm2306_vm10 = vcmp.eq.f32.partialorder %v2305_v25, 8.507059e+37 }
 0x831   :  { %v2327_v55 = vor.u32 1.1754944e-38, %v2326_v17  ;;  %vm2325_vm11 = vcmp.eq.f32.partialorder %v2324_v46, 8.507059e+37  ;;  %v5052_v46 = vld [vmem:[#allocation26_spill] sm:$0xff] }
 0x832   :  { %v3683_v27 = vpop.eup %3682 }
 0x833   :  { %v2334_v3 = vadd.f32 1.0, %v3683_v27 }
 0x834   :  { %v3685_v26 = vpop.eup %3684 }
 0x835   :  { %v3687_v15 = vpop.eup %3686  ;;  %v2297_v8 = vmul.f32 %v3685_v26, %v2295_v59  ;;  %3688 = vrcp.f32 %v2334_v3  ;;  %vm2302_vm4 = vweird.f32 %v3685_v26  ;;  %vm2340_vm13 = vweird.f32 %v2334_v3 }
 0x836   :  { %v2316_v60 = vmul.f32 %v3687_v15, %v2314_v16  ;;  %3690 = vtanh.f32 %v2290_v23  ;;  %vm2321_vm5 = vweird.f32 %v3687_v15  ;;  %vm2303_vm8 = vmor %vm2301_vm6, %vm2302_vm4 }
 0x837   :  { %v2298_v52 = vsub.f32 1.0, %v2297_v8  ;;  %vm2322_vm9 = vmor %vm2320_vm7, %vm2321_vm5 }
 0x838   :  { %v2317_v42 = vsub.f32 1.0, %v2316_v60 }
 0x839   :  { %v2299_v14 = vmul.f32 %v3685_v26, %v2298_v52 }
 0x83a   :  { %v2318_v18 = vmul.f32 %v3687_v15, %v2317_v42  ;;  %v2346_v42 = vand.u32 2147483648, %v2334_v3 }
 0x83b   :  { %v3689_v34 = vpop.eup %3688  ;;  %v2300_v4 = vadd.f32 %v3685_v26, %v2299_v14 }
 0x83c   :  { %v2319_v41 = vadd.f32 %v3687_v15, %v2318_v18  ;;  %v2336_v49 = vmul.f32 %v3689_v34, %v2334_v3  ;;  %v3691_v29 = vpop.eup %3690  ;;  %vm2341_vm12 = vweird.f32 %v3689_v34  ;;  %v2347_v17 = vor.u32 1.1754944e-38, %v2346_v42 }
 0x83d   :  { %v2304_v28 = vsel %vm2303_vm8, %v3685_v26, %v2300_v4  ;;  %v2344_v26 = vand.u32 2147483647, %v2334_v3  ;;  %vm2342_vm14 = vmor %vm2340_vm13, %vm2341_vm12  ;;  %v5051_v3 = vld [vmem:[#allocation25_spill] sm:$0xff] }
 0x83e   :  { %v2309_v27 = vsel %vm2306_vm10, %v2308_v5, %v2304_v28  ;;  %v2323_v6 = vsel %vm2322_vm9, %v3687_v15, %v2319_v41  ;;  %v2337_v40 = vsub.f32 1.0, %v2336_v49  ;;  %v1521_v18 = vadd.f32 %v5051_v3, %v4713_v45 }
 0x83f   :  { %v2328_v23 = vsel %vm2325_vm11, %v2327_v55, %v2323_v6  ;;  %v2351_v8 = vmul.f32 %v3691_v29, %v2309_v27  ;;  %vm2345_vm15 = vcmp.eq.f32.partialorder %v2344_v26, 8.507059e+37  ;;  %v5053_v29 = vld [vmem:[#allocation28_spill] sm:$0xff] }
 0x840   :  { %v2350_v60 = vmul.f32 %v2328_v23, %v4826_v24  ;;  %v2338_v52 = vmul.f32 %v3689_v34, %v2337_v40  ;;  %v1608_v27 = vadd.f32 %v5053_v29, %v4723_v48 }
 0x842   :  { %v4873_v59 = vadd.f32 %v2351_v8, %v2350_v60  ;;  %v2339_v16 = vadd.f32 %v3689_v34, %v2338_v52 }
 0x844   :  { %3692 = vtanh.f32 %v4873_v59  ;;  %v2343_v33 = vsel %vm2342_vm14, %v3689_v34, %v2339_v16  ;;  %v1550_v34 = vadd.f32 %v5052_v46, %v4715_v7 }
 0x845   :  { %v2348_v14 = vsel %vm2345_vm15, %v2347_v17, %v2343_v33 }
 0x84a   :  { %v3693_v15 = vpop.eup %3692 }
 0x84b   :  { %v2354_v25 = vmul.f32 %v3693_v15, %v2348_v14 }
 0x84d   :  { %3381 = vst [vmem:[%s5012_s6 + $0x18] sm:$0xff] %v2354_v25  ;;  %v2363_v24 = vpack.c.bf16 %v2354_v25, %v2354_v25  ;;  %v5054_v25 = vld [vmem:[#allocation27_spill] sm:$0xff] }
 0x84f   :  { %2372 = vmatmul.bf16.vlgmr.msrb.gmra.mxu0 %v2363_v24  ;;  %2385 = vmatmul.bf16.vlgmr.msrb.gmra.mxu1 %v2363_v24 }
 0x850   :  { %2398 = vmatmul.bf16.vlgmr.msrb.gmra.mxu2 %v2363_v24  ;;  %2411 = vmatmul.bf16.vlgmr.msrb.gmra.mxu3 %v2363_v24  ;;  %v1579_v24 = vadd.f32 %v5054_v25, %v4726_v50 }
 0x851   :  { %2620 = vmatpush.bf16.msrb.mxu0 %v4435_v0  ;;  %2633 = vmatpush.bf16.msrb.mxu1 %v4437_v10 }
 0x852   :  { %2646 = vmatpush.bf16.msrb.mxu2 %v4454_v11  ;;  %2659 = vmatpush.bf16.msrb.mxu3 %v4445_v43 }
 0x855   :  { %2621 = vmatpush.bf16.msrb.mxu0 %v4457_v32  ;;  %2634 = vmatpush.bf16.msrb.mxu1 %v4462_v57 }
 0x856   :  { %2647 = vmatpush.bf16.msrb.mxu2 %v4477_v30  ;;  %2660 = vmatpush.bf16.msrb.mxu3 %v4464_v58 }
 0x859   :  { %2622 = vmatpush.bf16.msrb.mxu0 %v4469_v19  ;;  %2635 = vmatpush.bf16.msrb.mxu1 %v4471_v36 }
 0x85a   :  { %2648 = vmatpush.bf16.msrb.mxu2 %v4489_v35  ;;  %2661 = vmatpush.bf16.msrb.mxu3 %v4473_v38 }
 0x85d   :  { %2623 = vmatpush.bf16.msrb.mxu0 %v4480_v31  ;;  %2636 = vmatpush.bf16.msrb.mxu1 %v4484_v51 }
 0x85e   :  { %2649 = vmatpush.bf16.msrb.mxu2 %v4506_v21  ;;  %2662 = vmatpush.bf16.msrb.mxu3 %v4486_v56 }
 0x861   :  { %2624 = vmatpush.bf16.msrb.mxu0 %v4494_v61  ;;  %2637 = vmatpush.bf16.msrb.mxu1 %v4500_v13 }
 0x862   :  { %2650 = vmatpush.bf16.msrb.mxu2 %v4522_v39  ;;  %2663 = vmatpush.bf16.msrb.mxu3 %v4502_v12 }
 0x865   :  { %2625 = vmatpush.bf16.msrb.mxu0 %v4510_v54  ;;  %2638 = vmatpush.bf16.msrb.mxu1 %v4517_v9 }
 0x866   :  { %2651 = vmatpush.bf16.msrb.mxu2 %v4545_v62  ;;  %2664 = vmatpush.bf16.msrb.mxu3 %v4519_v20 }
 0x869   :  { %2626 = vmatpush.bf16.msrb.mxu0 %v4530_v37  ;;  %2639 = vmatpush.bf16.msrb.mxu1 %v4539_v63 }
 0x86a   :  { %2652 = vmatpush.bf16.msrb.mxu2 %v4564_v2  ;;  %2665 = vmatpush.bf16.msrb.mxu3 %v4548_v44 }
 0x86d   :  { %2627 = vmatpush.bf16.msrb.mxu0 %v4560_v53  ;;  %2640 = vmatpush.bf16.msrb.mxu1 %v4562_v1 }
 0x86e   :  { %2653 = vmatpush.bf16.msrb.mxu2 %v4583_v22  ;;  %2666 = vmatpush.bf16.msrb.mxu3 %v4574_v47 }
 0x8cc   :  { %v2373_v4 = vpop.f32.mrf.mxu0  ;;  %v2386_v5 = vpop.f32.mrf.mxu1 }
 0x8cd   :  { %v2416_v41 = vadd.f32 %v2373_v4, %v1521_v18  ;;  %v2417_v49 = vadd.f32 %v2386_v5, %v1550_v34 }
 0x8cf   :  { %v3382_v55 = vmul.f32 -1.442695, %v2416_v41  ;;  %v3383_v28 = vmul.f32 -1.442695, %v2417_v49 }
 0x8d1   :  { %3694 = vpow2.f32 %v3382_v55 }
 0x8d2   :  { %3696 = vpow2.f32 %v3383_v28 }
 0x8d3   :  { %v2399_v6 = vpop.f32.mrf.mxu2  ;;  %v2412_v40 = vpop.f32.mrf.mxu3 }
 0x8d4   :  { %v2419_v23 = vadd.f32 %v2412_v40, %v1608_v27  ;;  %v2375_v8 = vpop.f32.mrf.mxu0  ;;  %v2388_v60 = vpop.f32.mrf.mxu1  ;;  %v2418_v46 = vadd.f32 %v2399_v6, %v1579_v24 }
 0x8d6   :  { %v3384_v52 = vmul.f32 -1.442695, %v2419_v23 }
 0x8d7   :  { %v3695_v16 = vpop.eup %3694 }
 0x8d8   :  { %v3697_v42 = vpop.eup %3696  ;;  %v2423_v26 = vadd.f32 1.0, %v3695_v16  ;;  %3698 = vpow2.f32 %v3384_v52 }
 0x8d9   :  { %v2442_v33 = vadd.f32 1.0, %v3697_v42 }
 0x8da   :  { %3700 = vrcp.f32 %v2423_v26  ;;  %v2435_v55 = vand.u32 2147483648, %v2423_v26  ;;  %v2433_v27 = vand.u32 2147483647, %v2423_v26  ;;  %vm2429_vm2 = vweird.f32 %v2423_v26 }
 0x8db   :  { %3702 = vrcp.f32 %v2442_v33  ;;  %v2401_v17 = vpop.f32.mrf.mxu2  ;;  %v2414_v15 = vpop.f32.mrf.mxu3  ;;  %v2454_v28 = vand.u32 2147483648, %v2442_v33  ;;  %v2452_v23 = vand.u32 2147483647, %v2442_v33  ;;  %vm2448_vm3 = vweird.f32 %v2442_v33 }
 0x8dc   :  { %v2436_v6 = vor.u32 1.1754944e-38, %v2435_v55  ;;  %vm2434_vm6 = vcmp.eq.f32.partialorder %v2433_v27, 8.507059e+37 }
 0x8dd   :  { %v2455_v42 = vor.u32 1.1754944e-38, %v2454_v28  ;;  %vm2453_vm7 = vcmp.eq.f32.partialorder %v2452_v23, 8.507059e+37 }
 0x8de   :  { %v3699_v14 = vpop.eup %3698 }
 0x8df   :  { %v2462_v3 = vadd.f32 1.0, %v3699_v14 }
 0x8e0   :  { %v3701_v18 = vpop.eup %3700 }
 0x8e1   :  { %v3703_v34 = vpop.eup %3702  ;;  %v2425_v4 = vmul.f32 %v3701_v18, %v2423_v26  ;;  %3704 = vrcp.f32 %v2462_v3  ;;  %vm2430_vm0 = vweird.f32 %v3701_v18  ;;  %vm2468_vm9 = vweird.f32 %v2462_v3 }
 0x8e2   :  { %v2444_v5 = vmul.f32 %v3703_v34, %v2442_v33  ;;  %3706 = vtanh.f32 %v2418_v46  ;;  %vm2449_vm1 = vweird.f32 %v3703_v34  ;;  %vm2431_vm4 = vmor %vm2429_vm2, %vm2430_vm0 }
 0x8e3   :  { %v2426_v41 = vsub.f32 1.0, %v2425_v4  ;;  %vm2450_vm5 = vmor %vm2448_vm3, %vm2449_vm1 }
 0x8e4   :  { %v2445_v49 = vsub.f32 1.0, %v2444_v5 }
 0x8e5   :  { %v2427_v29 = vmul.f32 %v3701_v18, %v2426_v41 }
 0x8e6   :  { %v2446_v40 = vmul.f32 %v3703_v34, %v2445_v49  ;;  %v2474_v49 = vand.u32 2147483648, %v2462_v3 }
 0x8e7   :  { %v3705_v8 = vpop.eup %3704  ;;  %v2428_v60 = vadd.f32 %v3701_v18, %v2427_v29 }
 0x8e8   :  { %v2447_v52 = vadd.f32 %v3703_v34, %v2446_v40  ;;  %v2464_v16 = vmul.f32 %v3705_v8, %v2462_v3  ;;  %v3707_v15 = vpop.eup %3706  ;;  %vm2469_vm8 = vweird.f32 %v3705_v8  ;;  %v2475_v28 = vor.u32 1.1754944e-38, %v2474_v49 }
 0x8e9   :  { %v2432_v17 = vsel %vm2431_vm4, %v3701_v18, %v2428_v60  ;;  %v2472_v18 = vand.u32 2147483647, %v2462_v3  ;;  %vm2470_vm10 = vmor %vm2468_vm9, %vm2469_vm8 }
 0x8ea   :  { %v2437_v14 = vsel %vm2434_vm6, %v2436_v6, %v2432_v17  ;;  %v2451_v25 = vsel %vm2450_vm5, %v3703_v34, %v2447_v52  ;;  %v2465_v24 = vsub.f32 1.0, %v2464_v16 }
 0x8eb   :  { %v2456_v46 = vsel %vm2453_vm7, %v2455_v42, %v2451_v25  ;;  %v2479_v4 = vmul.f32 %v3707_v15, %v2437_v14  ;;  %vm2473_vm11 = vcmp.eq.f32.partialorder %v2472_v18, 8.507059e+37 }
 0x8ec   :  { %v2478_v5 = vmul.f32 %v2456_v46, %v4873_v59  ;;  %v2466_v41 = vmul.f32 %v3705_v8, %v2465_v24 }
 0x8ee   :  { %v4920_v26 = vadd.f32 %v2479_v4, %v2478_v5  ;;  %v2467_v33 = vadd.f32 %v3705_v8, %v2466_v41 }
 0x8f0   :  { %3708 = vtanh.f32 %v4920_v26  ;;  %v2471_v55 = vsel %vm2470_vm10, %v3705_v8, %v2467_v33 }
 0x8f1   :  { %v2476_v29 = vsel %vm2473_vm11, %v2475_v28, %v2471_v55 }
 0x8f6   :  { %v3709_v34 = vpop.eup %3708 }
 0x8f7   :  { %v2482_v27 = vmul.f32 %v3709_v34, %v2476_v29 }
 0x8f9   :  { %3385 = vst [vmem:[%s5012_s6 + $0x20] sm:$0xff] %v2482_v27  ;;  %v2491_v59 = vpack.c.bf16 %v2482_v27, %v2482_v27 }
 0x8fb   :  { %2500 = vmatmul.bf16.vlgmr.msra.gmra.mxu0 %v2491_v59  ;;  %2513 = vmatmul.bf16.vlgmr.msra.gmra.mxu1 %v2491_v59 }
 0x8fc   :  { %2526 = vmatmul.bf16.vlgmr.msra.gmra.mxu2 %v2491_v59  ;;  %2539 = vmatmul.bf16.vlgmr.msra.gmra.mxu3 %v2491_v59 }
 0x8fd   :  { %2748 = vmatpush.bf16.msra.mxu0 %v4435_v0  ;;  %2761 = vmatpush.bf16.msra.mxu1 %v4437_v10  ;;  %v5055_v0 = vld [vmem:[#allocation29_spill] sm:$0xff] }
 0x8fe   :  { %2774 = vmatpush.bf16.msra.mxu2 %v4454_v11  ;;  %2787 = vmatpush.bf16.msra.mxu3 %v4445_v43  ;;  %v1523_v10 = vadd.f32 %v5055_v0, %v4713_v45  ;;  %v5056_v43 = vld [vmem:[#allocation30_spill] sm:$0xff] }
 0x8ff   :  { %v1552_v11 = vadd.f32 %v5056_v43, %v4715_v7 }
 0x901   :  { %2749 = vmatpush.bf16.msra.mxu0 %v4457_v32  ;;  %2762 = vmatpush.bf16.msra.mxu1 %v4462_v57 }
 0x902   :  { %2775 = vmatpush.bf16.msra.mxu2 %v4477_v30  ;;  %2788 = vmatpush.bf16.msra.mxu3 %v4464_v58  ;;  %v5057_v30 = vld [vmem:[#allocation32_spill] sm:$0xff] }
 0x905   :  { %2750 = vmatpush.bf16.msra.mxu0 %v4469_v19  ;;  %2763 = vmatpush.bf16.msra.mxu1 %v4471_v36 }
 0x906   :  { %2776 = vmatpush.bf16.msra.mxu2 %v4489_v35  ;;  %2789 = vmatpush.bf16.msra.mxu3 %v4473_v38 }
 0x909   :  { %2751 = vmatpush.bf16.msra.mxu0 %v4480_v31  ;;  %2764 = vmatpush.bf16.msra.mxu1 %v4484_v51  ;;  %v1610_v31 = vadd.f32 %v5057_v30, %v4723_v48 }
 0x90a   :  { %2777 = vmatpush.bf16.msra.mxu2 %v4506_v21  ;;  %2790 = vmatpush.bf16.msra.mxu3 %v4486_v56 }
 0x90d   :  { %2752 = vmatpush.bf16.msra.mxu0 %v4494_v61  ;;  %2765 = vmatpush.bf16.msra.mxu1 %v4500_v13 }
 0x90e   :  { %2778 = vmatpush.bf16.msra.mxu2 %v4522_v39  ;;  %2791 = vmatpush.bf16.msra.mxu3 %v4502_v12 }
 0x911   :  { %2753 = vmatpush.bf16.msra.mxu0 %v4510_v54  ;;  %2766 = vmatpush.bf16.msra.mxu1 %v4517_v9 }
 0x912   :  { %2779 = vmatpush.bf16.msra.mxu2 %v4545_v62  ;;  %2792 = vmatpush.bf16.msra.mxu3 %v4519_v20  ;;  %v5058_v62 = vld [vmem:[#allocation31_spill] sm:$0xff] }
 0x915   :  { %2754 = vmatpush.bf16.msra.mxu0 %v4530_v37  ;;  %2767 = vmatpush.bf16.msra.mxu1 %v4539_v63 }
 0x916   :  { %2780 = vmatpush.bf16.msra.mxu2 %v4564_v2  ;;  %2793 = vmatpush.bf16.msra.mxu3 %v4548_v44  ;;  %v1581_v44 = vadd.f32 %v5058_v62, %v4726_v50 }
 0x919   :  { %2755 = vmatpush.bf16.msra.mxu0 %v4560_v53  ;;  %2768 = vmatpush.bf16.msra.mxu1 %v4562_v1 }
 0x91a   :  { %2781 = vmatpush.bf16.msra.mxu2 %v4583_v22  ;;  %2794 = vmatpush.bf16.msra.mxu3 %v4574_v47 }
 0x978   :  { %v2501_v32 = vpop.f32.mrf.mxu0  ;;  %v2514_v57 = vpop.f32.mrf.mxu1 }
 0x979   :  { %v2544_v58 = vadd.f32 %v2501_v32, %v1523_v10  ;;  %v2545_v19 = vadd.f32 %v2514_v57, %v1552_v11 }
 0x97b   :  { %v3386_v36 = vmul.f32 -1.442695, %v2544_v58  ;;  %v3387_v38 = vmul.f32 -1.442695, %v2545_v19  ;;  %v5059_v58 = vld [vmem:[#allocation33_spill] sm:$0xff] }
 0x97c   :  { %v1526_v19 = vadd.f32 %v5059_v58, %v4713_v45 }
 0x97d   :  { %3710 = vpow2.f32 %v3386_v36  ;;  %v5060_v36 = vld [vmem:[#allocation34_spill] sm:$0xff] }
 0x97e   :  { %3712 = vpow2.f32 %v3387_v38  ;;  %v1555_v38 = vadd.f32 %v5060_v36, %v4715_v7 }
 0x97f   :  { %v2527_v51 = vpop.f32.mrf.mxu2  ;;  %v2540_v56 = vpop.f32.mrf.mxu3 }
 0x980   :  { %v2547_v35 = vadd.f32 %v2540_v56, %v1610_v31  ;;  %v2503_v61 = vpop.f32.mrf.mxu0  ;;  %v2516_v13 = vpop.f32.mrf.mxu1  ;;  %v2546_v2 = vadd.f32 %v2527_v51, %v1581_v44 }
 0x981   :  { %v5061_v13 = vld [vmem:[#allocation36_spill] sm:$0xff] }
 0x982   :  { %v3388_v12 = vmul.f32 -1.442695, %v2547_v35 }
 0x983   :  { %v3711_v21 = vpop.eup %3710 }
 0x984   :  { %v3713_v54 = vpop.eup %3712  ;;  %v2551_v9 = vadd.f32 1.0, %v3711_v21  ;;  %3714 = vpow2.f32 %v3388_v12  ;;  %v1613_v12 = vadd.f32 %v5061_v13, %v4723_v48 }
 0x985   :  { %v2570_v20 = vadd.f32 1.0, %v3713_v54 }
 0x986   :  { %3716 = vrcp.f32 %v2551_v9  ;;  %v2563_v8 = vand.u32 2147483648, %v2551_v9  ;;  %v2561_v52 = vand.u32 2147483647, %v2551_v9  ;;  %vm2557_vm14 = vweird.f32 %v2551_v9 }
 0x987   :  { %3718 = vrcp.f32 %v2570_v20  ;;  %v2529_v39 = vpop.f32.mrf.mxu2  ;;  %v2542_v37 = vpop.f32.mrf.mxu3  ;;  %v2582_v60 = vand.u32 2147483648, %v2570_v20  ;;  %v2580_v42 = vand.u32 2147483647, %v2570_v20  ;;  %vm2576_vm15 = vweird.f32 %v2570_v20 }
 0x988   :  { %v2564_v14 = vor.u32 1.1754944e-38, %v2563_v8  ;;  %vm2562_vm2 = vcmp.eq.f32.partialorder %v2561_v52, 8.507059e+37 }
 0x989   :  { %v2583_v46 = vor.u32 1.1754944e-38, %v2582_v60  ;;  %vm2581_vm3 = vcmp.eq.f32.partialorder %v2580_v42, 8.507059e+37 }
 0x98a   :  { %v3715_v63 = vpop.eup %3714 }
 0x98b   :  { %v2590_v53 = vadd.f32 1.0, %v3715_v63 }
 0x98c   :  { %v3717_v1 = vpop.eup %3716 }
 0x98d   :  { %v3719_v47 = vpop.eup %3718  ;;  %v2553_v22 = vmul.f32 %v3717_v1, %v2551_v9  ;;  %3720 = vrcp.f32 %v2590_v53  ;;  %vm2558_vm12 = vweird.f32 %v3717_v1  ;;  %v2602_v59 = vand.u32 2147483648, %v2590_v53 }
 0x98e   :  { %v2572_v3 = vmul.f32 %v3719_v47, %v2570_v20  ;;  %3722 = vtanh.f32 %v2546_v2  ;;  %vm2577_vm13 = vweird.f32 %v3719_v47  ;;  %vm2559_vm0 = vmor %vm2557_vm14, %vm2558_vm12  ;;  %vm2596_vm5 = vweird.f32 %v2590_v53 }
 0x98f   :  { %v2554_v40 = vsub.f32 1.0, %v2553_v22  ;;  %vm2578_vm1 = vmor %vm2576_vm15, %vm2577_vm13  ;;  %v2600_v0 = vand.u32 2147483647, %v2590_v53  ;;  %v2603_v43 = vor.u32 1.1754944e-38, %v2602_v59  ;;  %v5062_v22 = vld [vmem:[#allocation35_spill] sm:$0xff] }
 0x990   :  { %v2573_v23 = vsub.f32 1.0, %v2572_v3  ;;  %v1584_v3 = vadd.f32 %v5062_v22, %v4726_v50 }
 0x991   :  { %v2555_v6 = vmul.f32 %v3717_v1, %v2554_v40  ;;  %vm2601_vm7 = vcmp.eq.f32.partialorder %v2600_v0, 8.507059e+37 }
 0x992   :  { %v2574_v16 = vmul.f32 %v3719_v47, %v2573_v23 }
 0x993   :  { %v3721_v17 = vpop.eup %3720  ;;  %v2556_v15 = vadd.f32 %v3717_v1, %v2555_v6 }
 0x994   :  { %v2575_v25 = vadd.f32 %v3719_v47, %v2574_v16  ;;  %v2592_v24 = vmul.f32 %v3721_v17, %v2590_v53  ;;  %v3723_v5 = vpop.eup %3722  ;;  %vm2597_vm4 = vweird.f32 %v3721_v17 }
 0x995   :  { %v2560_v4 = vsel %vm2559_vm0, %v3717_v1, %v2556_v15  ;;  %vm2598_vm6 = vmor %vm2596_vm5, %vm2597_vm4 }
 0x996   :  { %v2565_v41 = vsel %vm2562_vm2, %v2564_v14, %v2560_v4  ;;  %v2579_v33 = vsel %vm2578_vm1, %v3719_v47, %v2575_v25  ;;  %v2593_v49 = vsub.f32 1.0, %v2592_v24 }
 0x997   :  { %v2584_v18 = vsel %vm2581_vm3, %v2583_v46, %v2579_v33  ;;  %v2607_v55 = vmul.f32 %v3723_v5, %v2565_v41 }
 0x998   :  { %v2606_v28 = vmul.f32 %v2584_v18, %v4920_v26  ;;  %v2594_v34 = vmul.f32 %v3721_v17, %v2593_v49 }
 0x99a   :  { %v4967_v29 = vadd.f32 %v2607_v55, %v2606_v28  ;;  %v2595_v27 = vadd.f32 %v3721_v17, %v2594_v34 }
 0x99c   :  { %3724 = vtanh.f32 %v4967_v29  ;;  %v2599_v10 = vsel %vm2598_vm6, %v3721_v17, %v2595_v27 }
 0x99d   :  { %v2604_v32 = vsel %vm2601_vm7, %v2603_v43, %v2599_v10 }
 0x9a2   :  { %v3725_v11 = vpop.eup %3724 }
 0x9a3   :  { %v2610_v57 = vmul.f32 %v3725_v11, %v2604_v32 }
 0x9a5   :  { %3389 = vst [vmem:[%s5012_s6 + $0x28] sm:$0xff] %v2610_v57  ;;  %v2619_v26 = vpack.c.bf16 %v2610_v57, %v2610_v57 }
 0x9a7   :  { %2628 = vmatmul.bf16.vlgmr.msrb.gmra.mxu0 %v2619_v26  ;;  %2641 = vmatmul.bf16.vlgmr.msrb.gmra.mxu1 %v2619_v26 }
 0x9a8   :  { %2654 = vmatmul.bf16.vlgmr.msrb.gmra.mxu2 %v2619_v26  ;;  %2667 = vmatmul.bf16.vlgmr.msrb.gmra.mxu3 %v2619_v26 }
 0xa24   :  { %v2629_v30 = vpop.f32.mrf.mxu0  ;;  %v2642_v31 = vpop.f32.mrf.mxu1 }
 0xa25   :  { %v2672_v51 = vadd.f32 %v2629_v30, %v1526_v19  ;;  %v2673_v56 = vadd.f32 %v2642_v31, %v1555_v38 }
 0xa27   :  { %v3390_v35 = vmul.f32 -1.442695, %v2672_v51  ;;  %v3391_v61 = vmul.f32 -1.442695, %v2673_v56  ;;  %v5063_v51 = vld [vmem:[#allocation37_spill] sm:$0xff] }
 0xa28   :  { %v1528_v56 = vadd.f32 %v5063_v51, %v4713_v45 }
 0xa29   :  { %3726 = vpow2.f32 %v3390_v35  ;;  %v5064_v35 = vld [vmem:[#allocation38_spill] sm:$0xff] }
 0xa2a   :  { %3728 = vpow2.f32 %v3391_v61  ;;  %v1557_v61 = vadd.f32 %v5064_v35, %v4715_v7 }
 0xa2b   :  { %v2655_v21 = vpop.f32.mrf.mxu2  ;;  %v2668_v54 = vpop.f32.mrf.mxu3 }
 0xa2c   :  { %v2675_v9 = vadd.f32 %v2668_v54, %v1613_v12  ;;  %v2631_v20 = vpop.f32.mrf.mxu0  ;;  %v2644_v39 = vpop.f32.mrf.mxu1  ;;  %v2674_v8 = vadd.f32 %v2655_v21, %v1584_v3 }
 0xa2d   :  { %v5065_v39 = vld [vmem:[#allocation40_spill] sm:$0xff] }
 0xa2e   :  { %v3392_v37 = vmul.f32 -1.442695, %v2675_v9 }
 0xa2f   :  { %v3727_v63 = vpop.eup %3726 }
 0xa30   :  { %v3729_v62 = vpop.eup %3728  ;;  %v2679_v44 = vadd.f32 1.0, %v3727_v63  ;;  %3730 = vpow2.f32 %v3392_v37  ;;  %v1615_v37 = vadd.f32 %v5065_v39, %v4723_v48 }
 0xa31   :  { %v2698_v53 = vadd.f32 1.0, %v3729_v62 }
 0xa32   :  { %3732 = vrcp.f32 %v2679_v44  ;;  %v2691_v17 = vand.u32 2147483648, %v2679_v44  ;;  %v2689_v25 = vand.u32 2147483647, %v2679_v44  ;;  %vm2685_vm10 = vweird.f32 %v2679_v44 }
 0xa33   :  { %3734 = vrcp.f32 %v2698_v53  ;;  %v2657_v1 = vpop.f32.mrf.mxu2  ;;  %v2670_v2 = vpop.f32.mrf.mxu3  ;;  %v2710_v15 = vand.u32 2147483648, %v2698_v53  ;;  %v2708_v46 = vand.u32 2147483647, %v2698_v53  ;;  %vm2704_vm11 = vweird.f32 %v2698_v53 }
 0xa34   :  { %v2692_v41 = vor.u32 1.1754944e-38, %v2691_v17  ;;  %vm2690_vm14 = vcmp.eq.f32.partialorder %v2689_v25, 8.507059e+37 }
 0xa35   :  { %v2711_v18 = vor.u32 1.1754944e-38, %v2710_v15  ;;  %vm2709_vm15 = vcmp.eq.f32.partialorder %v2708_v46, 8.507059e+37 }
 0xa36   :  { %v3731_v47 = vpop.eup %3730 }
 0xa37   :  { %v2718_v40 = vadd.f32 1.0, %v3731_v47 }
 0xa38   :  { %v3733_v23 = vpop.eup %3732 }
 0xa39   :  { %v3735_v60 = vpop.eup %3734  ;;  %v2681_v6 = vmul.f32 %v3733_v23, %v2679_v44  ;;  %3736 = vrcp.f32 %v2718_v40  ;;  %vm2686_vm8 = vweird.f32 %v3733_v23  ;;  %v2730_v26 = vand.u32 2147483648, %v2718_v40 }
 0xa3a   :  { %v2700_v52 = vmul.f32 %v3735_v60, %v2698_v53  ;;  %3738 = vtanh.f32 %v2674_v8  ;;  %vm2705_vm9 = vweird.f32 %v3735_v60  ;;  %vm2687_vm12 = vmor %vm2685_vm10, %vm2686_vm8  ;;  %vm2724_vm1 = vweird.f32 %v2718_v40  ;;  %v5066_v8 = vld [vmem:[#allocation39_spill] sm:$0xff] }
 0xa3b   :  { %v2682_v16 = vsub.f32 1.0, %v2681_v6  ;;  %vm2706_vm13 = vmor %vm2704_vm11, %vm2705_vm9  ;;  %v2728_v58 = vand.u32 2147483647, %v2718_v40  ;;  %v2731_v36 = vor.u32 1.1754944e-38, %v2730_v26  ;;  %v1586_v48 = vadd.f32 %v5066_v8, %v4726_v50 }
 0xa3c   :  { %v2701_v42 = vsub.f32 1.0, %v2700_v52 }
 0xa3d   :  { %v2683_v14 = vmul.f32 %v3733_v23, %v2682_v16  ;;  %vm2729_vm3 = vcmp.eq.f32.partialorder %v2728_v58, 8.507059e+37 }
 0xa3e   :  { %v2702_v24 = vmul.f32 %v3735_v60, %v2701_v42 }
 0xa3f   :  { %v3737_v4 = vpop.eup %3736  ;;  %v2684_v5 = vadd.f32 %v3733_v23, %v2683_v14 }
 0xa40   :  { %v2703_v33 = vadd.f32 %v3735_v60, %v2702_v24  ;;  %v2720_v49 = vmul.f32 %v3737_v4, %v2718_v40  ;;  %v3739_v28 = vpop.eup %3738  ;;  %vm2725_vm0 = vweird.f32 %v3737_v4 }
 0xa41   :  { %v2688_v55 = vsel %vm2687_vm12, %v3733_v23, %v2684_v5  ;;  %vm2726_vm2 = vmor %vm2724_vm1, %vm2725_vm0 }
 0xa42   :  { %v2693_v34 = vsel %vm2690_vm14, %v2692_v41, %v2688_v55  ;;  %v2707_v27 = vsel %vm2706_vm13, %v3735_v60, %v2703_v33  ;;  %v2721_v59 = vsub.f32 1.0, %v2720_v49 }
 0xa43   :  { %v2712_v0 = vsel %vm2709_vm15, %v2711_v18, %v2707_v27  ;;  %v2735_v10 = vmul.f32 %v3739_v28, %v2693_v34 }
 0xa44   :  { %v2734_v43 = vmul.f32 %v2712_v0, %v4967_v29  ;;  %v2722_v11 = vmul.f32 %v3737_v4, %v2721_v59 }
 0xa46   :  { %v4982_v32 = vadd.f32 %v2735_v10, %v2734_v43  ;;  %v2723_v57 = vadd.f32 %v3737_v4, %v2722_v11 }
 0xa48   :  { %3740 = vtanh.f32 %v4982_v32  ;;  %v2727_v19 = vsel %vm2726_vm2, %v3737_v4, %v2723_v57 }
 0xa49   :  { %v2732_v30 = vsel %vm2729_vm3, %v2731_v36, %v2727_v19 }
 0xa4e   :  { %v3741_v38 = vpop.eup %3740 }
 0xa4f   :  { %v2738_v31 = vmul.f32 %v3741_v38, %v2732_v30 }
 0xa51   :  { %3393 = vst [vmem:[%s5012_s6 + $0x30] sm:$0xff] %v2738_v31  ;;  %v2747_v29 = vpack.c.bf16 %v2738_v31, %v2738_v31 }
 0xa53   :  { %2756 = vmatmul.bf16.vlgmr.msra.gmra.mxu0 %v2747_v29  ;;  %2769 = vmatmul.bf16.vlgmr.msra.gmra.mxu1 %v2747_v29 }
 0xa54   :  { %2782 = vmatmul.bf16.vlgmr.msra.gmra.mxu2 %v2747_v29  ;;  %2795 = vmatmul.bf16.vlgmr.msra.gmra.mxu3 %v2747_v29 }
 0xad0   :  { %v2757_v13 = vpop.f32.mrf.mxu0  ;;  %v2770_v12 = vpop.f32.mrf.mxu1 }
 0xad1   :  { %v2800_v21 = vadd.f32 %v2757_v13, %v1528_v56  ;;  %v2801_v54 = vadd.f32 %v2770_v12, %v1557_v61 }
 0xad3   :  { %v3394_v9 = vmul.f32 -1.442695, %v2800_v21  ;;  %v3395_v20 = vmul.f32 -1.442695, %v2801_v54 }
 0xad5   :  { %3742 = vpow2.f32 %v3394_v9 }
 0xad6   :  { %3744 = vpow2.f32 %v3395_v20 }
 0xad7   :  { %v2783_v63 = vpop.f32.mrf.mxu2  ;;  %v2796_v62 = vpop.f32.mrf.mxu3 }
 0xad8   :  { %v2803_v44 = vadd.f32 %v2796_v62, %v1615_v37  ;;  %v2759_v53 = vpop.f32.mrf.mxu0  ;;  %v2772_v1 = vpop.f32.mrf.mxu1  ;;  %v2802_v52 = vadd.f32 %v2783_v63, %v1586_v48 }
 0xada   :  { %v3396_v45 = vmul.f32 -1.442695, %v2803_v44 }
 0xadb   :  { %v3743_v2 = vpop.eup %3742 }
 0xadc   :  { %v3745_v47 = vpop.eup %3744  ;;  %v2807_v7 = vadd.f32 1.0, %v3743_v2  ;;  %3746 = vpow2.f32 %v3396_v45 }
 0xadd   :  { %v2826_v22 = vadd.f32 1.0, %v3745_v47 }
 0xade   :  { %3748 = vrcp.f32 %v2807_v7  ;;  %v2819_v25 = vand.u32 2147483648, %v2807_v7  ;;  %v2817_v4 = vand.u32 2147483647, %v2807_v7  ;;  %vm2813_vm6 = vweird.f32 %v2807_v7 }
 0xadf   :  { %3750 = vrcp.f32 %v2826_v22  ;;  %v2785_v3 = vpop.f32.mrf.mxu2  ;;  %v2798_v40 = vpop.f32.mrf.mxu3  ;;  %v2838_v24 = vand.u32 2147483648, %v2826_v22  ;;  %v2836_v41 = vand.u32 2147483647, %v2826_v22  ;;  %vm2832_vm7 = vweird.f32 %v2826_v22 }
 0xae0   :  { %v2820_v49 = vor.u32 1.1754944e-38, %v2819_v25  ;;  %vm2818_vm10 = vcmp.eq.f32.partialorder %v2817_v4, 8.507059e+37 }
 0xae1   :  { %v2839_v28 = vor.u32 1.1754944e-38, %v2838_v24  ;;  %vm2837_vm11 = vcmp.eq.f32.partialorder %v2836_v41, 8.507059e+37 }
 0xae2   :  { %v3747_v23 = vpop.eup %3746 }
 0xae3   :  { %v2846_v60 = vadd.f32 1.0, %v3747_v23 }
 0xae4   :  { %v3749_v6 = vpop.eup %3748 }
 0xae5   :  { %v3751_v16 = vpop.eup %3750  ;;  %v2809_v42 = vmul.f32 %v3749_v6, %v2807_v7  ;;  %3752 = vrcp.f32 %v2846_v60  ;;  %vm2814_vm4 = vweird.f32 %v3749_v6  ;;  %v2858_v36 = vand.u32 2147483648, %v2846_v60 }
 0xae6   :  { %v2828_v17 = vmul.f32 %v3751_v16, %v2826_v22  ;;  %3754 = vtanh.f32 %v2802_v52  ;;  %vm2833_vm5 = vweird.f32 %v3751_v16  ;;  %vm2815_vm8 = vmor %vm2813_vm6, %vm2814_vm4  ;;  %vm2852_vm13 = vweird.f32 %v2846_v60 }
 0xae7   :  { %v2810_v15 = vsub.f32 1.0, %v2809_v42  ;;  %vm2834_vm9 = vmor %vm2832_vm7, %vm2833_vm5  ;;  %v2856_v38 = vand.u32 2147483647, %v2846_v60  ;;  %v2859_v31 = vor.u32 1.1754944e-38, %v2858_v36 }
 0xae8   :  { %v2829_v14 = vsub.f32 1.0, %v2828_v17 }
 0xae9   :  { %v2811_v46 = vmul.f32 %v3749_v6, %v2810_v15  ;;  %vm2857_vm15 = vcmp.eq.f32.partialorder %v2856_v38, 8.507059e+37 }
 0xaea   :  { %v2830_v5 = vmul.f32 %v3751_v16, %v2829_v14 }
 0xaeb   :  { %v3753_v33 = vpop.eup %3752  ;;  %v2812_v50 = vadd.f32 %v3749_v6, %v2811_v46 }
 0xaec   :  { %v2831_v18 = vadd.f32 %v3751_v16, %v2830_v5  ;;  %v2848_v55 = vmul.f32 %v3753_v33, %v2846_v60  ;;  %v3755_v27 = vpop.eup %3754  ;;  %vm2853_vm12 = vweird.f32 %v3753_v33 }
 0xaed   :  { %v2816_v34 = vsel %vm2815_vm8, %v3749_v6, %v2812_v50  ;;  %vm2854_vm14 = vmor %vm2852_vm13, %vm2853_vm12 }
 0xaee   :  { %v2821_v59 = vsel %vm2818_vm10, %v2820_v49, %v2816_v34  ;;  %v2835_v0 = vsel %vm2834_vm9, %v3751_v16, %v2831_v18  ;;  %v2849_v10 = vsub.f32 1.0, %v2848_v55 }
 0xaef   :  { %v2840_v43 = vsel %vm2837_vm11, %v2839_v28, %v2835_v0  ;;  %v2863_v11 = vmul.f32 %v3755_v27, %v2821_v59 }
 0xaf0   :  { %v2862_v57 = vmul.f32 %v2840_v43, %v4982_v32  ;;  %v2850_v26 = vmul.f32 %v3753_v33, %v2849_v10 }
 0xaf2   :  { %v2864_v58 = vadd.f32 %v2863_v11, %v2862_v57  ;;  %v2851_v19 = vadd.f32 %v3753_v33, %v2850_v26 }
 0xaf4   :  { %3756 = vtanh.f32 %v2864_v58  ;;  %2872 = vst [vmem:[#allocation10 + $0x8] sm:$0xff] %v2864_v58  ;;  %v2855_v30 = vsel %vm2854_vm14, %v3753_v33, %v2851_v19 }
 0xaf5   :  { %2900 = dma.vmem_to_hbm [thread:$0]  %s2893_s28, 256, %s2895_s9, [#allocation11], %s3867_s10, %s3867_s10, %s3868_s11   ;;  %v2860_v29 = vsel %vm2857_vm15, %v2859_v31, %v2855_v30 }
 0xafa   :  { %v3757_v32 = vpop.eup %3756 }
 0xafb   :  { %v2866_v51 = vmul.f32 %v3757_v32, %v2860_v29 }
 0xafd   :  { %3397 = vst [vmem:[%s5012_s6 + $0x38] sm:$0xff] %v2866_v51 }
 0xafe   :  { %2870 = vst [vmem:[#allocation9 + $0x8] sm:$0xff] %v2866_v51 }
 0xaff   :  { %2887 = dma.vmem_to_hbm [thread:$0]  %s2880_s12, 256, %s2882_s1, [#allocation6], %s3867_s10, %s3867_s10, %s3868_s11  }
 0xb00   :  { %3858 = dma.done.wait [#allocation6], 256  }
 0xb01   :  { %3859 = vsyncadd [#allocation6], 4294967040 }
 0xb02   :  { %3860 = dma.done.wait [#allocation11], 256  }
 0xb03   :  { %3861 = vsyncadd [#allocation11], 4294967040 }
 0xb04   :  { %2911 = vsyncpa [#allocation5], 1 }
 0xb05   :  { %2912 = vsyncpa [#allocation8], 1 }
 0xb06   :  { %2913 = vsyncpa [#allocation6], 1 }
 0xb07   :  { %2914 = vsyncpa [#allocation11], 1 }

</bundles_post_ra>
